<compile_context>
chip_gen: v7x
topology: tpu7x:2x2x1
jax: 0.10.0
libtpu: 0.0.40
codegen_flags: <defaults>
</compile_context>

<pallas_src>
import functools

import jax
import jax.numpy as jnp
import numpy as np
from jax import lax
from jax.experimental import pallas as pl
from jax.experimental.pallas import tpu as pltpu


def _round_up(x, m):
    return ((x + m - 1) // m) * m


def _make_pool_matrix(H, W):
    """Constant (H*W//4, H*W) matrix P with P @ flat(x) == flat(avg_pool2x2(x))."""
    Ho, Wo = H // 2, W // 2
    P = np.zeros((Ho * Wo, H * W), np.float32)
    for i in range(Ho):
        for j in range(Wo):
            r = i * Wo + j
            for dy in range(2):
                for dx in range(2):
                    P[r, (2 * i + dy) * W + (2 * j + dx)] = 0.25
    return jnp.asarray(P)


# ------------------------------- fused kernel --------------------------------

def _resblock_kernel(xp_ref, w1_ref, b1_ref, w2_ref, b2_ref, wsc_ref, bsc_ref,
                     *rest, H, W, Cp, downsample):
    """One image per grid step; the whole residual block fused.

    xp_ref : (H+2, W+2, Cp)  zero-padded input (spatial halo 1, channels -> Cp)
    w*_ref : (9, Cp, Cp)     3x3 conv taps in HWIO order;  b*_ref: (1, Cp)
    wsc_ref: (Cp, Cp)        1x1 shortcut (identity matrix if not learnable)
    pool   : (H*W//4, H*W)   constant 2x2 avg-pool matrix (only if downsample)
    o_ref  : (Ho, Wo, Cp)
    h1p_scr: (H+2, W+16, Cp) VMEM scratch: zero-padded relu(conv1 out), interior
                             starts at column 8 so the store is sublane-aligned.
    """
    if downsample:
        pool_ref, o_ref, h1p_scr = rest
    else:
        o_ref, h1p_scr = rest
    M = H * W

    # ---- conv1 = 3x3(relu(x)): 9 shifted-slice matmuls accumulated on the MXU
    acc = jnp.zeros((M, Cp), jnp.float32)
    for t in range(9):
        dy, dx = divmod(t, 3)
        patch = jnp.maximum(xp_ref[dy:dy + H, dx:dx + W, :], 0.0)  # fused ReLU (VPU)
        acc = acc + jnp.dot(patch.reshape(M, Cp), w1_ref[t],
                            preferred_element_type=jnp.float32)
    h1 = acc + b1_ref[...]                                         # (M, Cp)

    # ---- zero-pad relu(h1) into VMEM scratch so conv2 sees a zero halo -------
    h1p_scr[...] = jnp.zeros_like(h1p_scr)
    h1p_scr[1:H + 1, 8:8 + W, :] = jnp.maximum(h1, 0.0).reshape(H, W, Cp)

    # ---- conv2 = 3x3(relu(h1)) ------------------------------------------------
    acc = jnp.zeros((M, Cp), jnp.float32)
    for t in range(9):
        dy, dx = divmod(t, 3)
        patch = h1p_scr[dy:dy + H, 7 + dx:7 + dx + W, :]
        acc = acc + jnp.dot(patch.reshape(M, Cp), w2_ref[t],
                            preferred_element_type=jnp.float32)
    h2 = acc + b2_ref[...]

    # ---- shortcut (1x1 conv on the ORIGINAL x, or identity), fused ------------
    x_flat = xp_ref[1:H + 1, 1:W + 1, :].reshape(M, Cp)
    sc = jnp.dot(x_flat, wsc_ref[...],
                 preferred_element_type=jnp.float32) + bsc_ref[...]

    s = h2 + sc                                                    # residual add

    if downsample:
        # 2x2 avg-pool as one tiny constant matmul (rides the idle MXU slot,
        # avoids sublane relayouts); bias rows already sum correctly (4*0.25).
        o = jnp.dot(pool_ref[...], s, preferred_element_type=jnp.float32)
        o_ref[...] = o.reshape(H // 2, W // 2, Cp)
    else:
        o_ref[...] = s.reshape(H, W, Cp)


# ----------------------------- wrapper / forward ------------------------------

@functools.partial(jax.jit, static_argnames=("downsample",))
def residual_block_forward(x_nchw, params, downsample=True):
    """Pallas ResidualBlock.forward. NCHW in / NCHW out (matches PyTorch)."""
    w1, b1, w2, b2 = params["w1"], params["b1"], params["w2"], params["b2"]
    x = jnp.transpose(x_nchw, (0, 2, 3, 1)).astype(jnp.float32)    # -> NHWC
    N, H, W, Cin = x.shape
    Cout = w2.shape[-1]
    learnable_sc = (Cin != Cout) or downsample
    Cp = _round_up(max(Cin, Cout), 128)   # lane-dense / MXU-native channel width

    # zero-pad: spatial halo of 1 (3x3 convs) + channels -> Cp (relu(0)=0, so
    # padding before the fused ReLU is exact).
    xp = jnp.pad(x, ((0, 0), (1, 1), (1, 1), (0, Cp - Cin)))

    def pad_conv3(w, ci, co):              # (3,3,ci,co) HWIO -> (9, Cp, Cp)
        w = jnp.pad(w.astype(jnp.float32),
                    ((0, 0), (0, 0), (0, Cp - ci), (0, Cp - co)))
        return w.reshape(9, Cp, Cp)

    w1p = pad_conv3(w1, Cin, Cin)
    w2p = pad_conv3(w2, Cin, Cout)
    b1p = jnp.pad(b1.astype(jnp.float32), (0, Cp - Cin)).reshape(1, Cp)
    b2p = jnp.pad(b2.astype(jnp.float32), (0, Cp - Cout)).reshape(1, Cp)

    if learnable_sc:
        wscp = jnp.pad(params["wsc"].astype(jnp.float32),
                       ((0, Cp - Cin), (0, Cp - Cout)))
        bscp = jnp.pad(params["bsc"].astype(jnp.float32),
                       (0, Cp - Cout)).reshape(1, Cp)
    else:  # identity shortcut (Cin == Cout, no downsample)
        wscp = jnp.eye(Cp, dtype=jnp.float32)
        bscp = jnp.zeros((1, Cp), jnp.float32)

    Ho, Wo = (H // 2, W // 2) if downsample else (H, W)

    inputs = [xp, w1p, b1p, w2p, b2p, wscp, bscp]
    in_specs = [
        pl.BlockSpec((None, H + 2, W + 2, Cp), lambda n: (n, 0, 0, 0)),
        # constant index maps -> weights DMA'd once, stay resident across steps
        pl.BlockSpec((9, Cp, Cp), lambda n: (0, 0, 0)),
        pl.BlockSpec((1, Cp), lambda n: (0, 0)),
        pl.BlockSpec((9, Cp, Cp), lambda n: (0, 0, 0)),
        pl.BlockSpec((1, Cp), lambda n: (0, 0)),
        pl.BlockSpec((Cp, Cp), lambda n: (0, 0)),
        pl.BlockSpec((1, Cp), lambda n: (0, 0)),
    ]
    if downsample:
        inputs.append(_make_pool_matrix(H, W))
        in_specs.append(pl.BlockSpec((H * W // 4, H * W), lambda n: (0, 0)))

    kernel = functools.partial(_resblock_kernel, H=H, W=W, Cp=Cp,
                               downsample=downsample)

    out_padded = pl.pallas_call(
        kernel,
        out_shape=jax.ShapeDtypeStruct((N, Ho, Wo, Cp), jnp.float32),
        grid=(N,),                                   # one image per grid step
        in_specs=in_specs,
        out_specs=pl.BlockSpec((None, Ho, Wo, Cp), lambda n: (n, 0, 0, 0)),
        scratch_shapes=[pltpu.VMEM((H + 2, W + 16, Cp), jnp.float32)],
        compiler_params=pltpu.CompilerParams(
            dimension_semantics=("parallel",),       # v7x: split batch over 2 TCs
            vmem_limit_bytes=32 * 1024 * 1024,
        ),
    )(*inputs)

    out = out_padded[..., :Cout]                     # strip channel padding
    return jnp.transpose(out, (0, 3, 1, 2))          # NHWC -> NCHW


# ------------------------------ pure-JAX reference ----------------------------

def _ref_forward(x_nchw, params, downsample=True):
    w1, b1, w2, b2 = params["w1"], params["b1"], params["w2"], params["b2"]
    x = jnp.transpose(x_nchw, (0, 2, 3, 1)).astype(jnp.float32)
    dn = ("NHWC", "HWIO", "NHWC")
    Cin, Cout = x.shape[-1], w2.shape[-1]
    learnable_sc = (Cin != Cout) or downsample

    def conv3x3(h, w, b):
        return lax.conv_general_dilated(
            h, w, (1, 1), [(1, 1), (1, 1)], dimension_numbers=dn) + b

    def avgpool(h):
        N, H, W, C = h.shape
        return h.reshape(N, H // 2, 2, W // 2, 2, C).mean(axis=(2, 4))

    h = jnp.maximum(x, 0.0)
    h = conv3x3(h, w1, b1)
    h = jnp.maximum(h, 0.0)
    h = conv3x3(h, w2, b2)
    if downsample:
        h = avgpool(h)

    if learnable_sc:
        sc = jnp.einsum("nhwc,cd->nhwd", x, params["wsc"]) + params["bsc"]
        if downsample:
            sc = avgpool(sc)
    else:
        sc = x

    return jnp.transpose(h + sc, (0, 3, 1, 2))


# ------------------------------------ main ------------------------------------

if __name__ == "__main__":
    key = jax.random.PRNGKey(0)
    kx, k1, k2, k3, k4, k5, k6 = jax.random.split(key, 7)

    N, Cin, Hh, Ww = 2, 4, 16, 16
    Cout = 8
    downsample = True

    x = jax.random.normal(kx, (N, Cin, Hh, Ww), dtype=jnp.float32)   # NCHW input

    params = {
        # conv weights stored HWIO (kH, kW, Cin, Cout); deterministic init.
        "w1": 0.1 * jax.random.normal(k1, (3, 3, Cin, Cin), dtype=jnp.float32),
        "b1": 0.1 * jax.random.normal(k2, (Cin,), dtype=jnp.float32),
        "w2": 0.1 * jax.random.normal(k3, (3, 3, Cin, Cout), dtype=jnp.float32),
        "b2": 0.1 * jax.random.normal(k4, (Cout,), dtype=jnp.float32),
        "wsc": 0.1 * jax.random.normal(k5, (Cin, Cout), dtype=jnp.float32),  # 1x1 conv
        "bsc": 0.1 * jax.random.normal(k6, (Cout,), dtype=jnp.float32),
    }

    out = jax.block_until_ready(residual_block_forward(x, params, downsample=downsample))
    ref = jax.block_until_ready(_ref_forward(x, params, downsample=downsample))

    np.testing.assert_allclose(np.asarray(out), np.asarray(ref), rtol=1e-4, atol=1e-5)
    assert out.shape == (N, Cout, Hh // 2, Ww // 2)

    print("KERNEL_OK")
</pallas_src>

<mosaic_0001>
module attributes {stable_mosaic.version = 11 : i64} {
  func.func @_resblock_kernel(%arg0: i32, %arg1: memref<1x18x18x128xf32, #tpu.memory_space<vmem>>, %arg2: memref<9x128x128xf32, #tpu.memory_space<vmem>>, %arg3: memref<1x128xf32, #tpu.memory_space<vmem>>, %arg4: memref<9x128x128xf32, #tpu.memory_space<vmem>>, %arg5: memref<1x128xf32, #tpu.memory_space<vmem>>, %arg6: memref<128x128xf32, #tpu.memory_space<vmem>>, %arg7: memref<1x128xf32, #tpu.memory_space<vmem>>, %arg8: memref<64x256xf32, #tpu.memory_space<vmem>>, %arg9: memref<1x8x8x128xf32, #tpu.memory_space<vmem>>, %arg10: memref<18x32x128xf32, #tpu.memory_space<vmem>>) attributes {dimension_semantics = [#tpu.dimension_semantics<parallel>], iteration_bounds = array<i64: 2>, scalar_prefetch = 0 : i64, scratch_operands = 1 : i64, tpu.core_type = #tpu.core_type<tc>, window_params = [{transform_indices = @transform_0, window_bounds = array<i64: 1, 18, 18, 128>}, {pipeline_mode = #tpu.pipeline_mode<synchronous>, transform_indices = @transform_1, window_bounds = array<i64: 9, 128, 128>}, {pipeline_mode = #tpu.pipeline_mode<synchronous>, transform_indices = @transform_2, window_bounds = array<i64: 1, 128>}, {pipeline_mode = #tpu.pipeline_mode<synchronous>, transform_indices = @transform_3, window_bounds = array<i64: 9, 128, 128>}, {pipeline_mode = #tpu.pipeline_mode<synchronous>, transform_indices = @transform_4, window_bounds = array<i64: 1, 128>}, {pipeline_mode = #tpu.pipeline_mode<synchronous>, transform_indices = @transform_5, window_bounds = array<i64: 128, 128>}, {pipeline_mode = #tpu.pipeline_mode<synchronous>, transform_indices = @transform_6, window_bounds = array<i64: 1, 128>}, {pipeline_mode = #tpu.pipeline_mode<synchronous>, transform_indices = @transform_7, window_bounds = array<i64: 64, 256>}, {transform_indices = @transform_8, window_bounds = array<i64: 1, 8, 8, 128>}]} {
    %cst = arith.constant 0.000000e+00 : f32
    %0 = vector.broadcast %cst : f32 to vector<256x128xf32>
    %c0 = arith.constant 0 : index
    %c0_0 = arith.constant 0 : index
    %c0_1 = arith.constant 0 : index
    %c0_2 = arith.constant 0 : index
    %1 = vector.load %arg1[%c0, %c0_0, %c0_1, %c0_2] : memref<1x18x18x128xf32, #tpu.memory_space<vmem>>, vector<1x16x16x128xf32>
    %2 = vector.shape_cast %1 : vector<1x16x16x128xf32> to vector<16x16x128xf32>
    %cst_3 = arith.constant 0.000000e+00 : f32
    %3 = vector.broadcast %cst_3 : f32 to vector<16x16x128xf32>
    %4 = arith.maximumf %2, %3 : vector<16x16x128xf32>
    %5 = vector.shape_cast %4 : vector<16x16x128xf32> to vector<256x128xf32>
    %c0_4 = arith.constant 0 : index
    %c0_5 = arith.constant 0 : index
    %c0_6 = arith.constant 0 : index
    %6 = vector.load %arg2[%c0_4, %c0_5, %c0_6] : memref<9x128x128xf32, #tpu.memory_space<vmem>>, vector<1x128x128xf32>
    %7 = vector.shape_cast %6 : vector<1x128x128xf32> to vector<128x128xf32>
    %cst_7 = arith.constant dense<0.000000e+00> : vector<256x128xf32>
    %8 = tpu.matmul %5, %7, %cst_7 {dimension_numbers = #tpu.dot_dimension_numbers<[1], [0], [0], [1], [0, 0, 1, 1], [], []>} : vector<256x128xf32>, vector<128x128xf32>, vector<256x128xf32> -> vector<256x128xf32>
    %9 = arith.addf %0, %8 : vector<256x128xf32>
    %c0_8 = arith.constant 0 : index
    %c0_9 = arith.constant 0 : index
    %c1 = arith.constant 1 : index
    %c0_10 = arith.constant 0 : index
    %10 = vector.load %arg1[%c0_8, %c0_9, %c1, %c0_10] : memref<1x18x18x128xf32, #tpu.memory_space<vmem>>, vector<1x16x16x128xf32>
    %11 = vector.shape_cast %10 : vector<1x16x16x128xf32> to vector<16x16x128xf32>
    %cst_11 = arith.constant 0.000000e+00 : f32
    %12 = vector.broadcast %cst_11 : f32 to vector<16x16x128xf32>
    %13 = arith.maximumf %11, %12 : vector<16x16x128xf32>
    %14 = vector.shape_cast %13 : vector<16x16x128xf32> to vector<256x128xf32>
    %c1_12 = arith.constant 1 : index
    %c0_13 = arith.constant 0 : index
    %c0_14 = arith.constant 0 : index
    %15 = vector.load %arg2[%c1_12, %c0_13, %c0_14] : memref<9x128x128xf32, #tpu.memory_space<vmem>>, vector<1x128x128xf32>
    %16 = vector.shape_cast %15 : vector<1x128x128xf32> to vector<128x128xf32>
    %cst_15 = arith.constant dense<0.000000e+00> : vector<256x128xf32>
    %17 = tpu.matmul %14, %16, %cst_15 {dimension_numbers = #tpu.dot_dimension_numbers<[1], [0], [0], [1], [0, 0, 1, 1], [], []>} : vector<256x128xf32>, vector<128x128xf32>, vector<256x128xf32> -> vector<256x128xf32>
    %18 = arith.addf %9, %17 : vector<256x128xf32>
    %c0_16 = arith.constant 0 : index
    %c0_17 = arith.constant 0 : index
    %c2 = arith.constant 2 : index
    %c0_18 = arith.constant 0 : index
    %19 = vector.load %arg1[%c0_16, %c0_17, %c2, %c0_18] : memref<1x18x18x128xf32, #tpu.memory_space<vmem>>, vector<1x16x16x128xf32>
    %20 = vector.shape_cast %19 : vector<1x16x16x128xf32> to vector<16x16x128xf32>
    %cst_19 = arith.constant 0.000000e+00 : f32
    %21 = vector.broadcast %cst_19 : f32 to vector<16x16x128xf32>
    %22 = arith.maximumf %20, %21 : vector<16x16x128xf32>
    %23 = vector.shape_cast %22 : vector<16x16x128xf32> to vector<256x128xf32>
    %c2_20 = arith.constant 2 : index
    %c0_21 = arith.constant 0 : index
    %c0_22 = arith.constant 0 : index
    %24 = vector.load %arg2[%c2_20, %c0_21, %c0_22] : memref<9x128x128xf32, #tpu.memory_space<vmem>>, vector<1x128x128xf32>
    %25 = vector.shape_cast %24 : vector<1x128x128xf32> to vector<128x128xf32>
    %cst_23 = arith.constant dense<0.000000e+00> : vector<256x128xf32>
    %26 = tpu.matmul %23, %25, %cst_23 {dimension_numbers = #tpu.dot_dimension_numbers<[1], [0], [0], [1], [0, 0, 1, 1], [], []>} : vector<256x128xf32>, vector<128x128xf32>, vector<256x128xf32> -> vector<256x128xf32>
    %27 = arith.addf %18, %26 : vector<256x128xf32>
    %c0_24 = arith.constant 0 : index
    %c1_25 = arith.constant 1 : index
    %c0_26 = arith.constant 0 : index
    %c0_27 = arith.constant 0 : index
    %28 = vector.load %arg1[%c0_24, %c1_25, %c0_26, %c0_27] : memref<1x18x18x128xf32, #tpu.memory_space<vmem>>, vector<1x16x16x128xf32>
    %29 = vector.shape_cast %28 : vector<1x16x16x128xf32> to vector<16x16x128xf32>
    %cst_28 = arith.constant 0.000000e+00 : f32
    %30 = vector.broadcast %cst_28 : f32 to vector<16x16x128xf32>
    %31 = arith.maximumf %29, %30 : vector<16x16x128xf32>
    %32 = vector.shape_cast %31 : vector<16x16x128xf32> to vector<256x128xf32>
    %c3 = arith.constant 3 : index
    %c0_29 = arith.constant 0 : index
    %c0_30 = arith.constant 0 : index
    %33 = vector.load %arg2[%c3, %c0_29, %c0_30] : memref<9x128x128xf32, #tpu.memory_space<vmem>>, vector<1x128x128xf32>
    %34 = vector.shape_cast %33 : vector<1x128x128xf32> to vector<128x128xf32>
    %cst_31 = arith.constant dense<0.000000e+00> : vector<256x128xf32>
    %35 = tpu.matmul %32, %34, %cst_31 {dimension_numbers = #tpu.dot_dimension_numbers<[1], [0], [0], [1], [0, 0, 1, 1], [], []>} : vector<256x128xf32>, vector<128x128xf32>, vector<256x128xf32> -> vector<256x128xf32>
    %36 = arith.addf %27, %35 : vector<256x128xf32>
    %c0_32 = arith.constant 0 : index
    %c1_33 = arith.constant 1 : index
    %c1_34 = arith.constant 1 : index
    %c0_35 = arith.constant 0 : index
    %37 = vector.load %arg1[%c0_32, %c1_33, %c1_34, %c0_35] : memref<1x18x18x128xf32, #tpu.memory_space<vmem>>, vector<1x16x16x128xf32>
    %38 = vector.shape_cast %37 : vector<1x16x16x128xf32> to vector<16x16x128xf32>
    %cst_36 = arith.constant 0.000000e+00 : f32
    %39 = vector.broadcast %cst_36 : f32 to vector<16x16x128xf32>
    %40 = arith.maximumf %38, %39 : vector<16x16x128xf32>
    %41 = vector.shape_cast %40 : vector<16x16x128xf32> to vector<256x128xf32>
    %c4 = arith.constant 4 : index
    %c0_37 = arith.constant 0 : index
    %c0_38 = arith.constant 0 : index
    %42 = vector.load %arg2[%c4, %c0_37, %c0_38] : memref<9x128x128xf32, #tpu.memory_space<vmem>>, vector<1x128x128xf32>
    %43 = vector.shape_cast %42 : vector<1x128x128xf32> to vector<128x128xf32>
    %cst_39 = arith.constant dense<0.000000e+00> : vector<256x128xf32>
    %44 = tpu.matmul %41, %43, %cst_39 {dimension_numbers = #tpu.dot_dimension_numbers<[1], [0], [0], [1], [0, 0, 1, 1], [], []>} : vector<256x128xf32>, vector<128x128xf32>, vector<256x128xf32> -> vector<256x128xf32>
    %45 = arith.addf %36, %44 : vector<256x128xf32>
    %c0_40 = arith.constant 0 : index
    %c1_41 = arith.constant 1 : index
    %c2_42 = arith.constant 2 : index
    %c0_43 = arith.constant 0 : index
    %46 = vector.load %arg1[%c0_40, %c1_41, %c2_42, %c0_43] : memref<1x18x18x128xf32, #tpu.memory_space<vmem>>, vector<1x16x16x128xf32>
    %47 = vector.shape_cast %46 : vector<1x16x16x128xf32> to vector<16x16x128xf32>
    %cst_44 = arith.constant 0.000000e+00 : f32
    %48 = vector.broadcast %cst_44 : f32 to vector<16x16x128xf32>
    %49 = arith.maximumf %47, %48 : vector<16x16x128xf32>
    %50 = vector.shape_cast %49 : vector<16x16x128xf32> to vector<256x128xf32>
    %c5 = arith.constant 5 : index
    %c0_45 = arith.constant 0 : index
    %c0_46 = arith.constant 0 : index
    %51 = vector.load %arg2[%c5, %c0_45, %c0_46] : memref<9x128x128xf32, #tpu.memory_space<vmem>>, vector<1x128x128xf32>
    %52 = vector.shape_cast %51 : vector<1x128x128xf32> to vector<128x128xf32>
    %cst_47 = arith.constant dense<0.000000e+00> : vector<256x128xf32>
    %53 = tpu.matmul %50, %52, %cst_47 {dimension_numbers = #tpu.dot_dimension_numbers<[1], [0], [0], [1], [0, 0, 1, 1], [], []>} : vector<256x128xf32>, vector<128x128xf32>, vector<256x128xf32> -> vector<256x128xf32>
    %54 = arith.addf %45, %53 : vector<256x128xf32>
    %c0_48 = arith.constant 0 : index
    %c2_49 = arith.constant 2 : index
    %c0_50 = arith.constant 0 : index
    %c0_51 = arith.constant 0 : index
    %55 = vector.load %arg1[%c0_48, %c2_49, %c0_50, %c0_51] : memref<1x18x18x128xf32, #tpu.memory_space<vmem>>, vector<1x16x16x128xf32>
    %56 = vector.shape_cast %55 : vector<1x16x16x128xf32> to vector<16x16x128xf32>
    %cst_52 = arith.constant 0.000000e+00 : f32
    %57 = vector.broadcast %cst_52 : f32 to vector<16x16x128xf32>
    %58 = arith.maximumf %56, %57 : vector<16x16x128xf32>
    %59 = vector.shape_cast %58 : vector<16x16x128xf32> to vector<256x128xf32>
    %c6 = arith.constant 6 : index
    %c0_53 = arith.constant 0 : index
    %c0_54 = arith.constant 0 : index
    %60 = vector.load %arg2[%c6, %c0_53, %c0_54] : memref<9x128x128xf32, #tpu.memory_space<vmem>>, vector<1x128x128xf32>
    %61 = vector.shape_cast %60 : vector<1x128x128xf32> to vector<128x128xf32>
    %cst_55 = arith.constant dense<0.000000e+00> : vector<256x128xf32>
    %62 = tpu.matmul %59, %61, %cst_55 {dimension_numbers = #tpu.dot_dimension_numbers<[1], [0], [0], [1], [0, 0, 1, 1], [], []>} : vector<256x128xf32>, vector<128x128xf32>, vector<256x128xf32> -> vector<256x128xf32>
    %63 = arith.addf %54, %62 : vector<256x128xf32>
    %c0_56 = arith.constant 0 : index
    %c2_57 = arith.constant 2 : index
    %c1_58 = arith.constant 1 : index
    %c0_59 = arith.constant 0 : index
    %64 = vector.load %arg1[%c0_56, %c2_57, %c1_58, %c0_59] : memref<1x18x18x128xf32, #tpu.memory_space<vmem>>, vector<1x16x16x128xf32>
    %65 = vector.shape_cast %64 : vector<1x16x16x128xf32> to vector<16x16x128xf32>
    %cst_60 = arith.constant 0.000000e+00 : f32
    %66 = vector.broadcast %cst_60 : f32 to vector<16x16x128xf32>
    %67 = arith.maximumf %65, %66 : vector<16x16x128xf32>
    %68 = vector.shape_cast %67 : vector<16x16x128xf32> to vector<256x128xf32>
    %c7 = arith.constant 7 : index
    %c0_61 = arith.constant 0 : index
    %c0_62 = arith.constant 0 : index
    %69 = vector.load %arg2[%c7, %c0_61, %c0_62] : memref<9x128x128xf32, #tpu.memory_space<vmem>>, vector<1x128x128xf32>
    %70 = vector.shape_cast %69 : vector<1x128x128xf32> to vector<128x128xf32>
    %cst_63 = arith.constant dense<0.000000e+00> : vector<256x128xf32>
    %71 = tpu.matmul %68, %70, %cst_63 {dimension_numbers = #tpu.dot_dimension_numbers<[1], [0], [0], [1], [0, 0, 1, 1], [], []>} : vector<256x128xf32>, vector<128x128xf32>, vector<256x128xf32> -> vector<256x128xf32>
    %72 = arith.addf %63, %71 : vector<256x128xf32>
    %c0_64 = arith.constant 0 : index
    %c2_65 = arith.constant 2 : index
    %c2_66 = arith.constant 2 : index
    %c0_67 = arith.constant 0 : index
    %73 = vector.load %arg1[%c0_64, %c2_65, %c2_66, %c0_67] : memref<1x18x18x128xf32, #tpu.memory_space<vmem>>, vector<1x16x16x128xf32>
    %74 = vector.shape_cast %73 : vector<1x16x16x128xf32> to vector<16x16x128xf32>
    %cst_68 = arith.constant 0.000000e+00 : f32
    %75 = vector.broadcast %cst_68 : f32 to vector<16x16x128xf32>
    %76 = arith.maximumf %74, %75 : vector<16x16x128xf32>
    %77 = vector.shape_cast %76 : vector<16x16x128xf32> to vector<256x128xf32>
    %c8 = arith.constant 8 : index
    %c0_69 = arith.constant 0 : index
    %c0_70 = arith.constant 0 : index
    %78 = vector.load %arg2[%c8, %c0_69, %c0_70] : memref<9x128x128xf32, #tpu.memory_space<vmem>>, vector<1x128x128xf32>
    %79 = vector.shape_cast %78 : vector<1x128x128xf32> to vector<128x128xf32>
    %cst_71 = arith.constant dense<0.000000e+00> : vector<256x128xf32>
    %80 = tpu.matmul %77, %79, %cst_71 {dimension_numbers = #tpu.dot_dimension_numbers<[1], [0], [0], [1], [0, 0, 1, 1], [], []>} : vector<256x128xf32>, vector<128x128xf32>, vector<256x128xf32> -> vector<256x128xf32>
    %81 = arith.addf %72, %80 : vector<256x128xf32>
    %c0_72 = arith.constant 0 : index
    %c0_73 = arith.constant 0 : index
    %82 = vector.load %arg3[%c0_72, %c0_73] : memref<1x128xf32, #tpu.memory_space<vmem>>, vector<1x128xf32>
    %83 = vector.broadcast %82 : vector<1x128xf32> to vector<256x128xf32>
    %84 = arith.addf %81, %83 : vector<256x128xf32>
    %cst_74 = arith.constant 0.000000e+00 : f32
    %85 = vector.broadcast %cst_74 : f32 to vector<18x32x128xf32>
    %c0_75 = arith.constant 0 : index
    %c0_76 = arith.constant 0 : index
    %c0_77 = arith.constant 0 : index
    %86 = vector.load %arg10[%c0_75, %c0_76, %c0_77] : memref<18x32x128xf32, #tpu.memory_space<vmem>>, vector<18x32x128xf32>
    tpu.vector_store %arg10[%c0_75, %c0_76, %c0_77], %85 {strides = array<i32>} : memref<18x32x128xf32, #tpu.memory_space<vmem>>, vector<18x32x128xf32>,
    %cst_78 = arith.constant 0.000000e+00 : f32
    %87 = vector.broadcast %cst_78 : f32 to vector<256x128xf32>
    %88 = arith.maximumf %84, %87 : vector<256x128xf32>
    %89 = vector.shape_cast %88 : vector<256x128xf32> to vector<16x16x128xf32>
    %c1_79 = arith.constant 1 : index
    %c8_80 = arith.constant 8 : index
    %c0_81 = arith.constant 0 : index
    %90 = vector.load %arg10[%c1_79, %c8_80, %c0_81] : memref<18x32x128xf32, #tpu.memory_space<vmem>>, vector<16x16x128xf32>
    tpu.vector_store %arg10[%c1_79, %c8_80, %c0_81], %89 {strides = array<i32>} : memref<18x32x128xf32, #tpu.memory_space<vmem>>, vector<16x16x128xf32>,
    %cst_82 = arith.constant 0.000000e+00 : f32
    %91 = vector.broadcast %cst_82 : f32 to vector<256x128xf32>
    %c0_83 = arith.constant 0 : index
    %c7_84 = arith.constant 7 : index
    %c0_85 = arith.constant 0 : index
    %92 = vector.load %arg10[%c0_83, %c7_84, %c0_85] : memref<18x32x128xf32, #tpu.memory_space<vmem>>, vector<16x16x128xf32>
    %93 = vector.shape_cast %92 : vector<16x16x128xf32> to vector<256x128xf32>
    %c0_86 = arith.constant 0 : index
    %c0_87 = arith.constant 0 : index
    %c0_88 = arith.constant 0 : index
    %94 = vector.load %arg4[%c0_86, %c0_87, %c0_88] : memref<9x128x128xf32, #tpu.memory_space<vmem>>, vector<1x128x128xf32>
    %95 = vector.shape_cast %94 : vector<1x128x128xf32> to vector<128x128xf32>
    %cst_89 = arith.constant dense<0.000000e+00> : vector<256x128xf32>
    %96 = tpu.matmul %93, %95, %cst_89 {dimension_numbers = #tpu.dot_dimension_numbers<[1], [0], [0], [1], [0, 0, 1, 1], [], []>} : vector<256x128xf32>, vector<128x128xf32>, vector<256x128xf32> -> vector<256x128xf32>
    %97 = arith.addf %91, %96 : vector<256x128xf32>
    %c0_90 = arith.constant 0 : index
    %c8_91 = arith.constant 8 : index
    %c0_92 = arith.constant 0 : index
    %98 = vector.load %arg10[%c0_90, %c8_91, %c0_92] : memref<18x32x128xf32, #tpu.memory_space<vmem>>, vector<16x16x128xf32>
    %99 = vector.shape_cast %98 : vector<16x16x128xf32> to vector<256x128xf32>
    %c1_93 = arith.constant 1 : index
    %c0_94 = arith.constant 0 : index
    %c0_95 = arith.constant 0 : index
    %100 = vector.load %arg4[%c1_93, %c0_94, %c0_95] : memref<9x128x128xf32, #tpu.memory_space<vmem>>, vector<1x128x128xf32>
    %101 = vector.shape_cast %100 : vector<1x128x128xf32> to vector<128x128xf32>
    %cst_96 = arith.constant dense<0.000000e+00> : vector<256x128xf32>
    %102 = tpu.matmul %99, %101, %cst_96 {dimension_numbers = #tpu.dot_dimension_numbers<[1], [0], [0], [1], [0, 0, 1, 1], [], []>} : vector<256x128xf32>, vector<128x128xf32>, vector<256x128xf32> -> vector<256x128xf32>
    %103 = arith.addf %97, %102 : vector<256x128xf32>
    %c0_97 = arith.constant 0 : index
    %c9 = arith.constant 9 : index
    %c0_98 = arith.constant 0 : index
    %104 = vector.load %arg10[%c0_97, %c9, %c0_98] : memref<18x32x128xf32, #tpu.memory_space<vmem>>, vector<16x16x128xf32>
    %105 = vector.shape_cast %104 : vector<16x16x128xf32> to vector<256x128xf32>
    %c2_99 = arith.constant 2 : index
    %c0_100 = arith.constant 0 : index
    %c0_101 = arith.constant 0 : index
    %106 = vector.load %arg4[%c2_99, %c0_100, %c0_101] : memref<9x128x128xf32, #tpu.memory_space<vmem>>, vector<1x128x128xf32>
    %107 = vector.shape_cast %106 : vector<1x128x128xf32> to vector<128x128xf32>
    %cst_102 = arith.constant dense<0.000000e+00> : vector<256x128xf32>
    %108 = tpu.matmul %105, %107, %cst_102 {dimension_numbers = #tpu.dot_dimension_numbers<[1], [0], [0], [1], [0, 0, 1, 1], [], []>} : vector<256x128xf32>, vector<128x128xf32>, vector<256x128xf32> -> vector<256x128xf32>
    %109 = arith.addf %103, %108 : vector<256x128xf32>
    %c1_103 = arith.constant 1 : index
    %c7_104 = arith.constant 7 : index
    %c0_105 = arith.constant 0 : index
    %110 = vector.load %arg10[%c1_103, %c7_104, %c0_105] : memref<18x32x128xf32, #tpu.memory_space<vmem>>, vector<16x16x128xf32>
    %111 = vector.shape_cast %110 : vector<16x16x128xf32> to vector<256x128xf32>
    %c3_106 = arith.constant 3 : index
    %c0_107 = arith.constant 0 : index
    %c0_108 = arith.constant 0 : index
    %112 = vector.load %arg4[%c3_106, %c0_107, %c0_108] : memref<9x128x128xf32, #tpu.memory_space<vmem>>, vector<1x128x128xf32>
    %113 = vector.shape_cast %112 : vector<1x128x128xf32> to vector<128x128xf32>
    %cst_109 = arith.constant dense<0.000000e+00> : vector<256x128xf32>
    %114 = tpu.matmul %111, %113, %cst_109 {dimension_numbers = #tpu.dot_dimension_numbers<[1], [0], [0], [1], [0, 0, 1, 1], [], []>} : vector<256x128xf32>, vector<128x128xf32>, vector<256x128xf32> -> vector<256x128xf32>
    %115 = arith.addf %109, %114 : vector<256x128xf32>
    %c1_110 = arith.constant 1 : index
    %c8_111 = arith.constant 8 : index
    %c0_112 = arith.constant 0 : index
    %116 = vector.load %arg10[%c1_110, %c8_111, %c0_112] : memref<18x32x128xf32, #tpu.memory_space<vmem>>, vector<16x16x128xf32>
    %117 = vector.shape_cast %116 : vector<16x16x128xf32> to vector<256x128xf32>
    %c4_113 = arith.constant 4 : index
    %c0_114 = arith.constant 0 : index
    %c0_115 = arith.constant 0 : index
    %118 = vector.load %arg4[%c4_113, %c0_114, %c0_115] : memref<9x128x128xf32, #tpu.memory_space<vmem>>, vector<1x128x128xf32>
    %119 = vector.shape_cast %118 : vector<1x128x128xf32> to vector<128x128xf32>
    %cst_116 = arith.constant dense<0.000000e+00> : vector<256x128xf32>
    %120 = tpu.matmul %117, %119, %cst_116 {dimension_numbers = #tpu.dot_dimension_numbers<[1], [0], [0], [1], [0, 0, 1, 1], [], []>} : vector<256x128xf32>, vector<128x128xf32>, vector<256x128xf32> -> vector<256x128xf32>
    %121 = arith.addf %115, %120 : vector<256x128xf32>
    %c1_117 = arith.constant 1 : index
    %c9_118 = arith.constant 9 : index
    %c0_119 = arith.constant 0 : index
    %122 = vector.load %arg10[%c1_117, %c9_118, %c0_119] : memref<18x32x128xf32, #tpu.memory_space<vmem>>, vector<16x16x128xf32>
    %123 = vector.shape_cast %122 : vector<16x16x128xf32> to vector<256x128xf32>
    %c5_120 = arith.constant 5 : index
    %c0_121 = arith.constant 0 : index
    %c0_122 = arith.constant 0 : index
    %124 = vector.load %arg4[%c5_120, %c0_121, %c0_122] : memref<9x128x128xf32, #tpu.memory_space<vmem>>, vector<1x128x128xf32>
    %125 = vector.shape_cast %124 : vector<1x128x128xf32> to vector<128x128xf32>
    %cst_123 = arith.constant dense<0.000000e+00> : vector<256x128xf32>
    %126 = tpu.matmul %123, %125, %cst_123 {dimension_numbers = #tpu.dot_dimension_numbers<[1], [0], [0], [1], [0, 0, 1, 1], [], []>} : vector<256x128xf32>, vector<128x128xf32>, vector<256x128xf32> -> vector<256x128xf32>
    %127 = arith.addf %121, %126 : vector<256x128xf32>
    %c2_124 = arith.constant 2 : index
    %c7_125 = arith.constant 7 : index
    %c0_126 = arith.constant 0 : index
    %128 = vector.load %arg10[%c2_124, %c7_125, %c0_126] : memref<18x32x128xf32, #tpu.memory_space<vmem>>, vector<16x16x128xf32>
    %129 = vector.shape_cast %128 : vector<16x16x128xf32> to vector<256x128xf32>
    %c6_127 = arith.constant 6 : index
    %c0_128 = arith.constant 0 : index
    %c0_129 = arith.constant 0 : index
    %130 = vector.load %arg4[%c6_127, %c0_128, %c0_129] : memref<9x128x128xf32, #tpu.memory_space<vmem>>, vector<1x128x128xf32>
    %131 = vector.shape_cast %130 : vector<1x128x128xf32> to vector<128x128xf32>
    %cst_130 = arith.constant dense<0.000000e+00> : vector<256x128xf32>
    %132 = tpu.matmul %129, %131, %cst_130 {dimension_numbers = #tpu.dot_dimension_numbers<[1], [0], [0], [1], [0, 0, 1, 1], [], []>} : vector<256x128xf32>, vector<128x128xf32>, vector<256x128xf32> -> vector<256x128xf32>
    %133 = arith.addf %127, %132 : vector<256x128xf32>
    %c2_131 = arith.constant 2 : index
    %c8_132 = arith.constant 8 : index
    %c0_133 = arith.constant 0 : index
    %134 = vector.load %arg10[%c2_131, %c8_132, %c0_133] : memref<18x32x128xf32, #tpu.memory_space<vmem>>, vector<16x16x128xf32>
    %135 = vector.shape_cast %134 : vector<16x16x128xf32> to vector<256x128xf32>
    %c7_134 = arith.constant 7 : index
    %c0_135 = arith.constant 0 : index
    %c0_136 = arith.constant 0 : index
    %136 = vector.load %arg4[%c7_134, %c0_135, %c0_136] : memref<9x128x128xf32, #tpu.memory_space<vmem>>, vector<1x128x128xf32>
    %137 = vector.shape_cast %136 : vector<1x128x128xf32> to vector<128x128xf32>
    %cst_137 = arith.constant dense<0.000000e+00> : vector<256x128xf32>
    %138 = tpu.matmul %135, %137, %cst_137 {dimension_numbers = #tpu.dot_dimension_numbers<[1], [0], [0], [1], [0, 0, 1, 1], [], []>} : vector<256x128xf32>, vector<128x128xf32>, vector<256x128xf32> -> vector<256x128xf32>
    %139 = arith.addf %133, %138 : vector<256x128xf32>
    %c2_138 = arith.constant 2 : index
    %c9_139 = arith.constant 9 : index
    %c0_140 = arith.constant 0 : index
    %140 = vector.load %arg10[%c2_138, %c9_139, %c0_140] : memref<18x32x128xf32, #tpu.memory_space<vmem>>, vector<16x16x128xf32>
    %141 = vector.shape_cast %140 : vector<16x16x128xf32> to vector<256x128xf32>
    %c8_141 = arith.constant 8 : index
    %c0_142 = arith.constant 0 : index
    %c0_143 = arith.constant 0 : index
    %142 = vector.load %arg4[%c8_141, %c0_142, %c0_143] : memref<9x128x128xf32, #tpu.memory_space<vmem>>, vector<1x128x128xf32>
    %143 = vector.shape_cast %142 : vector<1x128x128xf32> to vector<128x128xf32>
    %cst_144 = arith.constant dense<0.000000e+00> : vector<256x128xf32>
    %144 = tpu.matmul %141, %143, %cst_144 {dimension_numbers = #tpu.dot_dimension_numbers<[1], [0], [0], [1], [0, 0, 1, 1], [], []>} : vector<256x128xf32>, vector<128x128xf32>, vector<256x128xf32> -> vector<256x128xf32>
    %145 = arith.addf %139, %144 : vector<256x128xf32>
    %c0_145 = arith.constant 0 : index
    %c0_146 = arith.constant 0 : index
    %146 = vector.load %arg5[%c0_145, %c0_146] : memref<1x128xf32, #tpu.memory_space<vmem>>, vector<1x128xf32>
    %147 = vector.broadcast %146 : vector<1x128xf32> to vector<256x128xf32>
    %148 = arith.addf %145, %147 : vector<256x128xf32>
    %c0_147 = arith.constant 0 : index
    %c1_148 = arith.constant 1 : index
    %c1_149 = arith.constant 1 : index
    %c0_150 = arith.constant 0 : index
    %149 = vector.load %arg1[%c0_147, %c1_148, %c1_149, %c0_150] : memref<1x18x18x128xf32, #tpu.memory_space<vmem>>, vector<1x16x16x128xf32>
    %150 = vector.shape_cast %149 : vector<1x16x16x128xf32> to vector<16x16x128xf32>
    %151 = vector.shape_cast %150 : vector<16x16x128xf32> to vector<256x128xf32>
    %c0_151 = arith.constant 0 : index
    %c0_152 = arith.constant 0 : index
    %152 = vector.load %arg6[%c0_151, %c0_152] : memref<128x128xf32, #tpu.memory_space<vmem>>, vector<128x128xf32>
    %cst_153 = arith.constant dense<0.000000e+00> : vector<256x128xf32>
    %153 = tpu.matmul %151, %152, %cst_153 {dimension_numbers = #tpu.dot_dimension_numbers<[1], [0], [0], [1], [0, 0, 1, 1], [], []>} : vector<256x128xf32>, vector<128x128xf32>, vector<256x128xf32> -> vector<256x128xf32>
    %c0_154 = arith.constant 0 : index
    %c0_155 = arith.constant 0 : index
    %154 = vector.load %arg7[%c0_154, %c0_155] : memref<1x128xf32, #tpu.memory_space<vmem>>, vector<1x128xf32>
    %155 = vector.broadcast %154 : vector<1x128xf32> to vector<256x128xf32>
    %156 = arith.addf %153, %155 : vector<256x128xf32>
    %157 = arith.addf %148, %156 : vector<256x128xf32>
    %c0_156 = arith.constant 0 : index
    %c0_157 = arith.constant 0 : index
    %158 = vector.load %arg8[%c0_156, %c0_157] : memref<64x256xf32, #tpu.memory_space<vmem>>, vector<64x256xf32>
    %cst_158 = arith.constant dense<0.000000e+00> : vector<64x128xf32>
    %159 = tpu.matmul %158, %157, %cst_158 {dimension_numbers = #tpu.dot_dimension_numbers<[1], [0], [0], [1], [0, 0, 1, 1], [], []>} : vector<64x256xf32>, vector<256x128xf32>, vector<64x128xf32> -> vector<64x128xf32>
    %160 = vector.shape_cast %159 : vector<64x128xf32> to vector<8x8x128xf32>
    %c0_159 = arith.constant 0 : index
    %c0_160 = arith.constant 0 : index
    %c0_161 = arith.constant 0 : index
    %c0_162 = arith.constant 0 : index
    %161 = vector.load %arg9[%c0_159, %c0_160, %c0_161, %c0_162] : memref<1x8x8x128xf32, #tpu.memory_space<vmem>>, vector<1x8x8x128xf32>
    %162 = vector.shape_cast %161 : vector<1x8x8x128xf32> to vector<8x8x128xf32>
    %163 = vector.shape_cast %160 : vector<8x8x128xf32> to vector<1x8x8x128xf32>
    tpu.vector_store %arg9[%c0_159, %c0_160, %c0_161, %c0_162], %163 {strides = array<i32>} : memref<1x8x8x128xf32, #tpu.memory_space<vmem>>, vector<1x8x8x128xf32>,
    return
  }
  func.func @transform_0(%arg0: i32) -> (i32, i32, i32, i32) {
    %c0_i32 = arith.constant 0 : i32
    %c0_i32_0 = arith.constant 0 : i32
    %c0_i32_1 = arith.constant 0 : i32
    %c0_i32_2 = arith.constant 0 : i32
    return %arg0, %c0_i32, %c0_i32_0, %c0_i32_1 : i32, i32, i32, i32
  }
  func.func @transform_1(%arg0: i32) -> (i32, i32, i32) {
    %c0_i32 = arith.constant 0 : i32
    %c0_i32_0 = arith.constant 0 : i32
    %c0_i32_1 = arith.constant 0 : i32
    %c0_i32_2 = arith.constant 0 : i32
    return %c0_i32, %c0_i32_0, %c0_i32_1 : i32, i32, i32
  }
  func.func @transform_2(%arg0: i32) -> (i32, i32) {
    %c0_i32 = arith.constant 0 : i32
    %c0_i32_0 = arith.constant 0 : i32
    %c0_i32_1 = arith.constant 0 : i32
    return %c0_i32, %c0_i32_0 : i32, i32
  }
  func.func @transform_3(%arg0: i32) -> (i32, i32, i32) {
    %c0_i32 = arith.constant 0 : i32
    %c0_i32_0 = arith.constant 0 : i32
    %c0_i32_1 = arith.constant 0 : i32
    %c0_i32_2 = arith.constant 0 : i32
    return %c0_i32, %c0_i32_0, %c0_i32_1 : i32, i32, i32
  }
  func.func @transform_4(%arg0: i32) -> (i32, i32) {
    %c0_i32 = arith.constant 0 : i32
    %c0_i32_0 = arith.constant 0 : i32
    %c0_i32_1 = arith.constant 0 : i32
    return %c0_i32, %c0_i32_0 : i32, i32
  }
  func.func @transform_5(%arg0: i32) -> (i32, i32) {
    %c0_i32 = arith.constant 0 : i32
    %c0_i32_0 = arith.constant 0 : i32
    %c0_i32_1 = arith.constant 0 : i32
    return %c0_i32, %c0_i32_0 : i32, i32
  }
  func.func @transform_6(%arg0: i32) -> (i32, i32) {
    %c0_i32 = arith.constant 0 : i32
    %c0_i32_0 = arith.constant 0 : i32
    %c0_i32_1 = arith.constant 0 : i32
    return %c0_i32, %c0_i32_0 : i32, i32
  }
  func.func @transform_7(%arg0: i32) -> (i32, i32) {
    %c0_i32 = arith.constant 0 : i32
    %c0_i32_0 = arith.constant 0 : i32
    %c0_i32_1 = arith.constant 0 : i32
    return %c0_i32, %c0_i32_0 : i32, i32
  }
  func.func @transform_8(%arg0: i32) -> (i32, i32, i32, i32) {
    %c0_i32 = arith.constant 0 : i32
    %c0_i32_0 = arith.constant 0 : i32
    %c0_i32_1 = arith.constant 0 : i32
    %c0_i32_2 = arith.constant 0 : i32
    return %arg0, %c0_i32, %c0_i32_0, %c0_i32_1 : i32, i32, i32, i32
  }
}

</mosaic_0001>

<bundles_post_ra>
// kernel: residual_block_forward.1
= control target key start
LH: loop header
LB: loop body
LE: loop exit
PB: predicated region body
PF: predicated region fallthrough
CT: control target
= control target key end

     0   :  { %s10981_s27 = smov 0   ;;  %s13375_s0 = inlined_call_operand.vmem [shape: f32[2,18,18,128], index: 0, kind: input, shape index: {}]   ;;  %s13376_s1 = inlined_call_operand.vmem [shape: f32[9,128,128], index: 1, kind: input, shape index: {}]   ;;  %s13377_s2 = inlined_call_operand.vmem [shape: f32[1,128], index: 2, kind: input, shape index: {}]   ;;  %s13378_s3 = inlined_call_operand.vmem [shape: f32[9,128,128], index: 3, kind: input, shape index: {}]   ;;  %s13379_s4 = inlined_call_operand.vmem [shape: f32[1,128], index: 4, kind: input, shape index: {}]   ;;  %s13380_s5 = inlined_call_operand.vmem [shape: f32[128,128], index: 5, kind: input, shape index: {}]   ;;  %s13381_s6 = inlined_call_operand.vmem [shape: f32[1,128], index: 6, kind: input, shape index: {}]   ;;  %s13382_s7 = inlined_call_operand.vmem [shape: f32[64,256], index: 7, kind: input, shape index: {}]   ;;  %s13383_s8 = inlined_call_operand.vmem [shape: f32[2,8,8,128], index: 8, kind: output, shape index: {}]  }
   0x1 LB: > { %s6686_s28 = sadd.s32 4294967295, %s10933_s27   ;;  %p6690_p0 = scmp.ge.s32.totalorder %s10933_s27, 1  ;;  %s10933_s27 = sphi %s10981_s27, %s18_s27  }
   0x2   : > { %p262_p1 = scmp.lt.s32.totalorder %s10933_s27, 3 }
   0x4   : > { %p263_p2 = pnand %p6690_p0, %p262_p1 }
   0x6   : > { %266 = sbr.rel (%p263_p2) target bundleno = 1875 (0x753), region = 52 }
   0xd   : > { %v6694_v0 = vld [vmem:[%s13376_s1 + $0x80] sm:$0xff]  ;;  %v6695_v1 = vld [vmem:[%s13376_s1 + $0x88] sm:$0xff]  ;;  %v6696_v2 = vld [vmem:[%s13376_s1 + $0x90] sm:$0xff]  ;;  %p296_p3 = scmp.lt.s32.totalorder %s6686_s28, 1 }
   0xe   : > { %v9668_v3 = vpack.c.bf16 %v6695_v1, %v6694_v0  ;;  %v6697_v4 = vld [vmem:[%s13376_s1 + $0x98] sm:$0xff]  ;;  %v6698_v6 = vld [vmem:[%s13376_s1 + $0xa0] sm:$0xff]  ;;  %v6699_v7 = vld [vmem:[%s13376_s1 + $0xa8] sm:$0xff] }
   0xf   : > { %v9672_v5 = vpack.c.bf16 %v6697_v4, %v6696_v2  ;;  %s13699_s28 = smov (!%p296_p3, %s6686_s28), 1  ;;  %v9676_v8 = vpack.c.bf16 %v6699_v7, %v6698_v6  ;;  %v6700_v9 = vld [vmem:[%s13376_s1 + $0xb0] sm:$0xff]  ;;  %v6701_v10 = vld [vmem:[%s13376_s1 + $0xb8] sm:$0xff]  ;;  %v6702_v14 = vld [vmem:[%s13376_s1 + $0xc0] sm:$0xff] }
  0x10   : > { %9669 = vmatprep.subr.bf16.mxu0 %v9668_v3  ;;  %s10916_s19 = smul.u32 432, %s13699_s28  ;;  %v9680_v13 = vpack.c.bf16 %v6701_v10, %v6700_v9  ;;  %v6703_v15 = vld [vmem:[%s13376_s1 + $0xc8] sm:$0xff]  ;;  %v6704_v17 = vld [vmem:[%s13376_s1 + $0xd0] sm:$0xff]  ;;  %v6705_v18 = vld [vmem:[%s13376_s1 + $0xd8] sm:$0xff]  ;;  %s7179_s30 = sshll.u32 %s13699_s28, 6 }
  0x11   : > { %9671 = vmatpush3.bf16.msra.mxu0 %v9668_v3  ;;  %v9684_v16 = vpack.c.bf16 %v6703_v15, %v6702_v14  ;;  %v9688_v19 = vpack.c.bf16 %v6705_v18, %v6704_v17  ;;  %v6706_v20 = vld [vmem:[%s13376_s1 + $0xe0] sm:$0xff]  ;;  %v6707_v21 = vld [vmem:[%s13376_s1 + $0xe8] sm:$0xff]  ;;  %v6708_v23 = vld [vmem:[%s13376_s1 + $0xf0] sm:$0xff]  ;;  %s13362_s11 = scalar_lea.vmem %s13383_s8, %s7179_s30 }
  0x12   : > { %9673 = vmatprep.subr.bf16.mxu0 %v9672_v5  ;;  %s11019_s26 = scalar_lea.vmem %s13375_s0, %s10916_s19  ;;  %v9692_v22 = vpack.c.bf16 %v6707_v21, %v6706_v20  ;;  %v6709_v24 = vld [vmem:[%s13376_s1 + $0xf8] sm:$0xff]  ;;  %v370_v26 = vld [vmem:[%s13376_s1] sm:$0xff]  ;;  %v371_v27 = vld [vmem:[%s13376_s1 + $0x8] sm:$0xff] }
  0x13   : > { %v386_v11 = vld [vmem:[%s11019_s26 + $0x1] sm:$0xff]  ;;  %v9696_v25 = vpack.c.bf16 %v6709_v24, %v6708_v23  ;;  %v387_v28 = vld [vmem:[%s11019_s26 + $0x9] sm:$0xff]  ;;  %v388_v29 = vld [vmem:[%s11019_s26 + $0x19] sm:$0xff]  ;;  %v9700_v30 = vpack.c.bf16 %v371_v27, %v370_v26 }
  0x14   : > { %v418_v12 = vmax.f32 %v386_v11, 0.0  ;;  %v372_v31 = vld [vmem:[%s13376_s1 + $0x10] sm:$0xff]  ;;  %v373_v32 = vld [vmem:[%s13376_s1 + $0x18] sm:$0xff]  ;;  %v419_v33 = vmax.f32 %v387_v28, 0.0  ;;  %v420_v34 = vmax.f32 %v388_v29, 0.0  ;;  %v389_v35 = vld [vmem:[%s11019_s26 + $0x21] sm:$0xff] }
  0x15   : > { %9675 = vmatpush3.bf16.msra.mxu0 %v9672_v5  ;;  %v390_v36 = vld [vmem:[%s11019_s26 + $0x31] sm:$0xff]  ;;  %v9704_v37 = vpack.c.bf16 %v373_v32, %v372_v31  ;;  %v374_v38 = vld [vmem:[%s13376_s1 + $0x20] sm:$0xff]  ;;  %v375_v39 = vld [vmem:[%s13376_s1 + $0x28] sm:$0xff]  ;;  %v421_v40 = vmax.f32 %v389_v35, 0.0 }
  0x16   : > { %9677 = vmatprep.subr.bf16.mxu0 %v9676_v8  ;;  %8180 = vmatprep.mubr.f32.mxu0 %v418_v12  ;;  %v422_v41 = vmax.f32 %v390_v36, 0.0  ;;  %v391_v42 = vld [vmem:[%s11019_s26 + $0x39] sm:$0xff]  ;;  %v392_v43 = vld [vmem:[%s11019_s26 + $0x49] sm:$0xff]  ;;  %v9708_v44 = vpack.c.bf16 %v375_v39, %v374_v38  ;;  %v393_v49 = vld [vmem:[%s11019_s26 + $0x51] sm:$0xff] }
  0x17   : > { %v376_v45 = vld [vmem:[%s13376_s1 + $0x30] sm:$0xff]  ;;  %v377_v46 = vld [vmem:[%s13376_s1 + $0x38] sm:$0xff]  ;;  %v423_v47 = vmax.f32 %v391_v42, 0.0  ;;  %v424_v48 = vmax.f32 %v392_v43, 0.0  ;;  %v394_v50 = vld [vmem:[%s11019_s26 + $0x61] sm:$0xff]  ;;  %v425_v54 = vmax.f32 %v393_v49, 0.0 }
  0x18   : > { %v9712_v51 = vpack.c.bf16 %v377_v46, %v376_v45  ;;  %v378_v52 = vld [vmem:[%s13376_s1 + $0x40] sm:$0xff]  ;;  %v379_v53 = vld [vmem:[%s13376_s1 + $0x48] sm:$0xff]  ;;  %v426_v55 = vmax.f32 %v394_v50, 0.0  ;;  %v380_v59 = vld [vmem:[%s13376_s1 + $0x50] sm:$0xff] }
  0x19   : > { %9679 = vmatpush3.bf16.msra.mxu0 %v9676_v8  ;;  %v395_v56 = vld [vmem:[%s11019_s26 + $0x69] sm:$0xff]  ;;  %v396_v57 = vld [vmem:[%s11019_s26 + $0x79] sm:$0xff]  ;;  %v9716_v58 = vpack.c.bf16 %v379_v53, %v378_v52  ;;  %v397_v63 = vld [vmem:[%s11019_s26 + $0x81] sm:$0xff] }
  0x1a   : > { %9681 = vmatprep.subr.bf16.mxu0 %v9680_v13  ;;  %v381_v60 = vld [vmem:[%s13376_s1 + $0x58] sm:$0xff]  ;;  %v427_v61 = vmax.f32 %v395_v56, 0.0  ;;  %v428_v62 = vmax.f32 %v396_v57, 0.0  ;;  %v382_v2 = vld [vmem:[%s13376_s1 + $0x60] sm:$0xff]  ;;  %v383_v3 = vld [vmem:[%s13376_s1 + $0x68] sm:$0xff]  ;;  %v429_v4 = vmax.f32 %v397_v63, 0.0 }
  0x1b   : > { %v398_v0 = vld [vmem:[%s11019_s26 + $0x91] sm:$0xff]  ;;  %v9720_v1 = vpack.c.bf16 %v381_v60, %v380_v59  ;;  %v399_v6 = vld [vmem:[%s11019_s26 + $0x99] sm:$0xff]  ;;  %v400_v7 = vld [vmem:[%s11019_s26 + $0xa9] sm:$0xff]  ;;  %v9724_v8 = vpack.c.bf16 %v383_v3, %v382_v2 }
  0x1c   : > { %v430_v5 = vmax.f32 %v398_v0, 0.0  ;;  %v384_v9 = vld [vmem:[%s13376_s1 + $0x70] sm:$0xff]  ;;  %v385_v10 = vld [vmem:[%s13376_s1 + $0x78] sm:$0xff]  ;;  %v431_v11 = vmax.f32 %v399_v6, 0.0  ;;  %v432_v12 = vmax.f32 %v400_v7, 0.0  ;;  %v402_v14 = vld [vmem:[%s11019_s26 + $0xc1] sm:$0xff] }
  0x1d   : > { %9683 = vmatpush3.bf16.msra.mxu0 %v9680_v13  ;;  %v401_v13 = vld [vmem:[%s11019_s26 + $0xb1] sm:$0xff]  ;;  %v9728_v15 = vpack.c.bf16 %v385_v10, %v384_v9  ;;  %v6711_v17 = vld [vmem:[%s13376_s1 + $0x108] sm:$0xff]  ;;  %v404_v21 = vld [vmem:[%s11019_s26 + $0xd9] sm:$0xff] }
  0x1e   : > { %9685 = vmatprep.subr.bf16.mxu0 %v9684_v16  ;;  %v433_v18 = vmax.f32 %v401_v13, 0.0  ;;  %v403_v20 = vld [vmem:[%s11019_s26 + $0xc9] sm:$0xff]  ;;  %v436_v24 = vmax.f32 %v404_v21, 0.0  ;;  %v406_v26 = vld [vmem:[%s11019_s26 + $0xf1] sm:$0xff]  ;;  %v407_v29 = vld [vmem:[%s11019_s26 + $0xf9] sm:$0xff] }
  0x1f   : > { %v435_v23 = vmax.f32 %v403_v20, 0.0  ;;  %v438_v28 = vmax.f32 %v406_v26, 0.0  ;;  %v439_v31 = vmax.f32 %v407_v29, 0.0  ;;  %v412_v38 = vld [vmem:[%s11019_s26 + $0x139] sm:$0xff]  ;;  %v414_v42 = vld [vmem:[%s11019_s26 + $0x151] sm:$0xff]  ;;  %v416_v46 = vld [vmem:[%s11019_s26 + $0x169] sm:$0xff] }
  0x20   : > { %v415_v45 = vld [vmem:[%s11019_s26 + $0x159] sm:$0xff]  ;;  %v417_v49 = vld [vmem:[%s11019_s26 + $0x171] sm:$0xff]  ;;  %v307_v53 = vld [vmem:[%s11019_s26 + $0x8] sm:$0xff] }
  0x21   : > { %9687 = vmatpush3.bf16.msra.mxu0 %v9684_v16  ;;  %v6710_v16 = vld [vmem:[%s13376_s1 + $0x100] sm:$0xff]  ;;  %v6713_v56 = vld [vmem:[%s13376_s1 + $0x118] sm:$0xff]  ;;  %v339_v57 = vmax.f32 %v307_v53, 0.0  ;;  %v11150_v60 = vld [vmem:[%s11019_s26 + $0x30] sm:$0xff] }
  0x22   : > { %9689 = vmatprep.subr.bf16.mxu0 %v9688_v19  ;;  %v306_v50 = vld [vmem:[%s11019_s26] sm:$0xff]  ;;  %v6715_v63 = vld [vmem:[%s13376_s1 + $0x128] sm:$0xff]  ;;  %v11163_v2 = vld [vmem:[%s11019_s26 + $0x38] sm:$0xff] }
  0x23   : > { %v338_v52 = vmax.f32 %v306_v50, 0.0  ;;  %v11147_v59 = vld [vmem:[%s11019_s26 + $0x20] sm:$0xff]  ;;  %v11167_v3 = vld [vmem:[%s11019_s26 + $0x48] sm:$0xff]  ;;  %v6717_v6 = vld [vmem:[%s13376_s1 + $0x138] sm:$0xff]  ;;  %v13429_v7 = vmax.f32 %v11163_v2, 0.0 }
  0x24   : > { %v13433_v0 = vmax.f32 %v11147_v59, 0.0  ;;  %v11182_v9 = vld [vmem:[%s11019_s26 + $0x50] sm:$0xff]  ;;  %v11185_v10 = vld [vmem:[%s11019_s26 + $0x60] sm:$0xff]  ;;  %v6719_v13 = vld [vmem:[%s13376_s1 + $0x148] sm:$0xff] }
  0x25   : > { %9691 = vmatpush3.bf16.msra.mxu0 %v9688_v19  ;;  %v434_v19 = vmax.f32 %v402_v14, 0.0  ;;  %v13425_v14 = vmax.f32 %v11182_v9, 0.0  ;;  %v6721_v20 = vld [vmem:[%s13376_s1 + $0x158] sm:$0xff]  ;;  %v6722_v26 = vld [vmem:[%s13376_s1 + $0x160] sm:$0xff]  ;;  %v11289_v50 = vld [vmem:[%s11019_s26 + $0xf0] sm:$0xff] }
  0x26   : > { %9693 = vmatprep.subr.bf16.mxu0 %v9692_v22  ;;  %v11299_v53 = vld [vmem:[%s11019_s26 + $0xf8] sm:$0xff] }
  0x29   : > { %9695 = vmatpush3.bf16.msra.mxu0 %v9692_v22  ;;  %v11118_v22 = vpack.c.bf16 %v6711_v17, %v6710_v16  ;;  %v11200_v16 = vld [vmem:[%s11019_s26 + $0x68] sm:$0xff]  ;;  %v11203_v17 = vld [vmem:[%s11019_s26 + $0x78] sm:$0xff] }
  0x2a   : > { %9697 = vmatprep.subr.bf16.mxu0 %v9696_v25  ;;  %v13419_v21 = vmax.f32 %v11200_v16, 0.0 }
  0x2d   : > { %9699 = vmatpush3.bf16.msra.mxu0 %v9696_v25  ;;  %v405_v25 = vld [vmem:[%s11019_s26 + $0xe1] sm:$0xff] }
  0x2e   : > { %9701 = vmatprep.subr.bf16.mxu0 %v9700_v30  ;;  %v437_v27 = vmax.f32 %v405_v25, 0.0 }
  0x30   : > { %8181 = vmatmul.mubr.f32.vlgmr.msra.gmra.mrb[0].mxu0 %v419_v33  ;;  %v409_v33 = vld [vmem:[%s11019_s26 + $0x111] sm:$0xff] }
  0x31   : > { %8183 = vmatprep.mubr.f32.mxu0 %v420_v34  ;;  %9703 = vmatpush3.bf16.msra.mxu0 %v9700_v30  ;;  %v408_v30 = vld [vmem:[%s11019_s26 + $0x109] sm:$0xff]  ;;  %v410_v34 = vld [vmem:[%s11019_s26 + $0x121] sm:$0xff]  ;;  %v441_v35 = vmax.f32 %v409_v33, 0.0 }
  0x32   : > { %9705 = vmatprep.subr.bf16.mxu0 %v9704_v37  ;;  %v440_v32 = vmax.f32 %v408_v30, 0.0  ;;  %v442_v36 = vmax.f32 %v410_v34, 0.0  ;;  %v11236_v30 = vld [vmem:[%s11019_s26 + $0x98] sm:$0xff]  ;;  %v6724_v33 = vld [vmem:[%s13376_s1 + $0x170] sm:$0xff] }
  0x33   : > { %v6725_v34 = vld [vmem:[%s13376_s1 + $0x178] sm:$0xff] }
  0x34   : > { %8184 = vmatmul.mubr.f32.gmra.mrb[2].mxu0 %v421_v40  ;;  %v444_v40 = vmax.f32 %v412_v38, 0.0  ;;  %v11257_v38 = vld [vmem:[%s11019_s26 + $0xc0] sm:$0xff] }
  0x35   : > { %8186 = vmatprep.mubr.f32.mxu0 %v422_v41  ;;  %9707 = vmatpush3.bf16.msra.mxu0 %v9704_v37  ;;  %v411_v37 = vld [vmem:[%s11019_s26 + $0x129] sm:$0xff]  ;;  %v413_v41 = vld [vmem:[%s11019_s26 + $0x141] sm:$0xff] }
  0x36   : > { %9709 = vmatprep.subr.bf16.mxu0 %v9708_v44  ;;  %v443_v39 = vmax.f32 %v411_v37, 0.0  ;;  %v445_v43 = vmax.f32 %v413_v41, 0.0  ;;  %v11254_v37 = vld [vmem:[%s11019_s26 + $0xb0] sm:$0xff]  ;;  %v6759_v41 = vld [vmem:[%s13376_s1 + $0x188] sm:$0xff] }
  0x38   : > { %8187 = vmatmul.mubr.f32.gmra.mrb[4].mxu0 %v423_v47  ;;  %v447_v47 = vmax.f32 %v415_v45, 0.0  ;;  %v11275_v45 = vld [vmem:[%s11019_s26 + $0xd8] sm:$0xff] }
  0x39   : > { %8189 = vmatprep.mubr.f32.mxu0 %v424_v48  ;;  %9711 = vmatpush3.bf16.msra.mxu0 %v9708_v44  ;;  %v446_v44 = vmax.f32 %v414_v42, 0.0  ;;  %v448_v48 = vmax.f32 %v416_v46, 0.0  ;;  %v13405_v42 = vmax.f32 %v11254_v37, 0.0 }
  0x3a   : > { %9713 = vmatprep.subr.bf16.mxu0 %v9712_v51 }
  0x3c   : > { %8190 = vmatmul.mubr.f32.gmra.mrb[6].mxu0 %v425_v54  ;;  %v11137_v54 = vld [vmem:[%s11019_s26 + $0x18] sm:$0xff] }
  0x3d   : > { %8192 = vmatprep.mubr.f32.mxu0 %v426_v55  ;;  %9715 = vmatpush3.bf16.msra.mxu0 %v9712_v51  ;;  %v449_v51 = vmax.f32 %v417_v49, 0.0  ;;  %v6712_v55 = vld [vmem:[%s13376_s1 + $0x110] sm:$0xff]  ;;  %v11286_v49 = vld [vmem:[%s11019_s26 + $0xe0] sm:$0xff] }
  0x3e   : > { %9717 = vmatprep.subr.bf16.mxu0 %v9716_v58 }
  0x40   : > { %8193 = vmatmul.mubr.f32.gmra.mrb[8].mxu0 %v427_v61  ;;  %v9736_v61 = vpack.c.bf16 %v6713_v56, %v6712_v55  ;;  %v11302_v55 = vld [vmem:[%s11019_s26 + $0x108] sm:$0xff]  ;;  %v13394_v56 = vmax.f32 %v11299_v53, 0.0 }
  0x41   : > { %8195 = vmatprep.mubr.f32.mxu0 %v428_v62  ;;  %9719 = vmatpush3.bf16.msra.mxu0 %v9716_v58  ;;  %v13435_v58 = vmax.f32 %v11137_v54, 0.0  ;;  %v6714_v62 = vld [vmem:[%s13376_s1 + $0x120] sm:$0xff] }
  0x42   : > { %9721 = vmatprep.subr.bf16.mxu0 %v9720_v1 }
  0x44   : > { %8196 = vmatmul.mubr.f32.gmra.mrb[10].mxu0 %v429_v4  ;;  %v9740_v4 = vpack.c.bf16 %v6715_v63, %v6714_v62  ;;  %v11314_v62 = vld [vmem:[%s11019_s26 + $0x120] sm:$0xff] }
  0x45   : > { %8198 = vmatprep.mubr.f32.mxu0 %v430_v5  ;;  %9723 = vmatpush3.bf16.msra.mxu0 %v9720_v1  ;;  %v13431_v1 = vmax.f32 %v11150_v60, 0.0  ;;  %v6716_v5 = vld [vmem:[%s13376_s1 + $0x130] sm:$0xff] }
  0x46   : > { %9725 = vmatprep.subr.bf16.mxu0 %v9724_v8 }
  0x48   : > { %8199 = vmatmul.mubr.f32.gmra.mrb[12].mxu0 %v431_v11  ;;  %v9744_v11 = vpack.c.bf16 %v6717_v6, %v6716_v5  ;;  %v11323_v5 = vld [vmem:[%s11019_s26 + $0x128] sm:$0xff]  ;;  %v11326_v6 = vld [vmem:[%s11019_s26 + $0x138] sm:$0xff] }
  0x49   : > { %8201 = vmatprep.mubr.f32.mxu0 %v432_v12  ;;  %9727 = vmatpush3.bf16.msra.mxu0 %v9724_v8  ;;  %v13427_v8 = vmax.f32 %v11167_v3, 0.0  ;;  %v6718_v12 = vld [vmem:[%s13376_s1 + $0x140] sm:$0xff] }
  0x4a   : > { %9729 = vmatprep.subr.bf16.mxu0 %v9728_v15 }
  0x4c   : > { %8202 = vmatmul.mubr.f32.gmra.mrb[14].mxu0 %v433_v18  ;;  %v9748_v18 = vpack.c.bf16 %v6719_v13, %v6718_v12  ;;  %v13386_v12 = vmax.f32 %v11326_v6, 0.0  ;;  %v11335_v13 = vld [vmem:[%s11019_s26 + $0x140] sm:$0xff] }
  0x4d   : > { %8204 = vmatprep.mubr.f32.mxu0 %v434_v19  ;;  %9731 = vmatpush3.bf16.msra.mxu0 %v9728_v15  ;;  %v13423_v15 = vmax.f32 %v11185_v10, 0.0  ;;  %v6720_v19 = vld [vmem:[%s13376_s1 + $0x150] sm:$0xff] }
  0x4e   : > { %9733 = vmatprep.subr.bf16.mxu0 %v11118_v22  ;;  %v9752_v25 = vpack.c.bf16 %v6721_v20, %v6720_v19  ;;  %v13384_v19 = vmax.f32 %v11335_v13, 0.0 }
  0x50   : > { %8205 = vmatmul.mubr.f32.gmra.mrb[16].mxu0 %v435_v23  ;;  %v11218_v23 = vld [vmem:[%s11019_s26 + $0x80] sm:$0xff] }
  0x51   : > { %8207 = vmatprep.mubr.f32.mxu0 %v436_v24  ;;  %v11221_v24 = vld [vmem:[%s11019_s26 + $0x90] sm:$0xff] }
  0x52   : > { %v13412_v29 = vmax.f32 %v11221_v24, 0.0 }
  0x54   : > { %8208 = vmatmul.mubr.f32.gmra.mrb[18].mxu0 %v437_v27  ;;  %v6723_v27 = vld [vmem:[%s13376_s1 + $0x168] sm:$0xff] }
  0x55   : > { %8210 = vmatprep.mubr.f32.mxu0 %v438_v28  ;;  %v13414_v28 = vmax.f32 %v11218_v23, 0.0 }
  0x58   : > { %8211 = vmatmul.mubr.f32.gmra.mrb[20].mxu0 %v439_v31  ;;  %v11239_v31 = vld [vmem:[%s11019_s26 + $0xa8] sm:$0xff] }
  0x59   : > { %8213 = vmatprep.mubr.f32.mxu0 %v440_v32  ;;  %v9756_v32 = vpack.c.bf16 %v6723_v27, %v6722_v26  ;;  %v11350_v26 = vld [vmem:[%s11019_s26 + $0x168] sm:$0xff] }
  0x5c   : > { %8214 = vmatmul.mubr.f32.gmra.mrb[22].mxu0 %v441_v35  ;;  %v13409_v35 = vmax.f32 %v11236_v30, 0.0 }
  0x5d   : > { %8216 = vmatprep.mubr.f32.mxu0 %v442_v36  ;;  %v13408_v36 = vmax.f32 %v11239_v31, 0.0 }
  0x60   : > { %8217 = vmatmul.mubr.f32.gmra.mrb[24].mxu0 %v443_v39  ;;  %v9760_v39 = vpack.c.bf16 %v6725_v34, %v6724_v33  ;;  %v11359_v33 = vld [vmem:[%s11019_s26 + $0x170] sm:$0xff]  ;;  %v917_v34 = vld [vmem:[%s11019_s26 + $0x2] sm:$0xff] }
  0x61   : > { %8219 = vmatprep.mubr.f32.mxu0 %v444_v40  ;;  %v6758_v40 = vld [vmem:[%s13376_s1 + $0x180] sm:$0xff] }
  0x62   : > { %v11277_v46 = vpack.c.bf16 %v6759_v41, %v6758_v40  ;;  %v949_v40 = vmax.f32 %v917_v34, 0.0  ;;  %v918_v41 = vld [vmem:[%s11019_s26 + $0xa] sm:$0xff] }
  0x64   : > { %8220 = vmatmul.mubr.f32.gmra.mrb[26].mxu0 %v445_v43  ;;  %v13404_v43 = vmax.f32 %v11257_v38, 0.0 }
  0x65   : > { %8222 = vmatprep.mubr.f32.mxu0 %v446_v44  ;;  %v11272_v44 = vld [vmem:[%s11019_s26 + $0xc8] sm:$0xff] }
  0x68   : > { %8223 = vmatmul.mubr.f32.gmra.mrb[28].mxu0 %v447_v47  ;;  %v13401_v47 = vmax.f32 %v11272_v44, 0.0 }
  0x69   : > { %8225 = vmatprep.mubr.f32.mxu0 %v448_v48  ;;  %v13400_v48 = vmax.f32 %v11275_v45, 0.0 }
  0x6c   : > { %8226 = vmatmul.mubr.f32.gmra.mrb[30].mxu0 %v449_v51  ;;  %v13397_v51 = vmax.f32 %v11286_v49, 0.0 }
  0x6d   : > { %8260 = vmatprep.mubr.f32.mxu0 %v338_v52  ;;  %v13396_v52 = vmax.f32 %v11289_v50, 0.0 }
  0x70   : > { %8261 = vmatmul.mubr.f32.vlgmr.msra.gmra.mrb[0].mxu0 %v339_v57  ;;  %v13392_v57 = vmax.f32 %v11302_v55, 0.0 }
  0x71   : > { %8263 = vmatprep.mubr.f32.mxu0 %v13435_v58  ;;  %9735 = vmatpush3.bf16.msra.mxu0 %v11118_v22  ;;  %v13416_v22 = vmax.f32 %v11203_v17, 0.0  ;;  %v11578_v58 = vld [vmem:[%s11019_s26 + $0x15a] sm:$0xff] }
  0x72   : > { %9737 = vmatprep.subr.bf16.mxu0 %v9736_v61  ;;  %13524 = vst [vmem:[#allocation7_spill] sm:$0xff] %v11578_v58 }
  0x74   : > { %8264 = vmatmul.mubr.f32.gmra.mrb[2].mxu0 %v13433_v0 }
  0x75   : > { %8266 = vmatprep.mubr.f32.mxu0 %v13431_v1  ;;  %9739 = vmatpush3.bf16.msra.mxu0 %v9736_v61  ;;  %v11311_v61 = vld [vmem:[%s11019_s26 + $0x110] sm:$0xff]  ;;  %v11566_v1 = vld [vmem:[%s11019_s26 + $0x142] sm:$0xff] }
  0x76   : > { %9741 = vmatprep.subr.bf16.mxu0 %v9740_v4  ;;  %v13391_v63 = vmax.f32 %v11311_v61, 0.0  ;;  %13522 = vst [vmem:[#allocation5_spill] sm:$0xff] %v11566_v1  ;;  %v13441_v0 = vmax.f32 %v11566_v1, 0.0  ;;  %v13528_v1 = vmax.f32 %v11150_v60, 0.0  ;;  %v6814_v60 = vld [vmem:[%s13376_s1 + $0x240] sm:$0xff] }
  0x78   : > { %8267 = vmatmul.mubr.f32.gmra.mrb[4].mxu0 %v13429_v7 }
  0x79   : > { %8269 = vmatprep.mubr.f32.mxu0 %v13427_v8  ;;  %9743 = vmatpush3.bf16.msra.mxu0 %v9740_v4  ;;  %v13390_v4 = vmax.f32 %v11314_v62, 0.0  ;;  %v11554_v8 = vld [vmem:[%s11019_s26 + $0x12a] sm:$0xff] }
  0x7a   : > { %9745 = vmatprep.subr.bf16.mxu0 %v9744_v11  ;;  %13521 = vst [vmem:[#allocation4_spill] sm:$0xff] %v11554_v8  ;;  %v13438_v7 = vmax.f32 %v11554_v8, 0.0  ;;  %v11590_v8 = vld [vmem:[%s11019_s26 + $0x172] sm:$0xff] }
  0x7c   : > { %8270 = vmatmul.mubr.f32.gmra.mrb[6].mxu0 %v13425_v14 }
  0x7d   : > { %8272 = vmatprep.mubr.f32.mxu0 %v13423_v15  ;;  %9747 = vmatpush3.bf16.msra.mxu0 %v9744_v11  ;;  %v13389_v11 = vmax.f32 %v11323_v5, 0.0  ;;  %v11542_v15 = vld [vmem:[%s11019_s26 + $0x112] sm:$0xff] }
  0x7e   : > { %9749 = vmatprep.subr.bf16.mxu0 %v9748_v18  ;;  %v13434_v14 = vmax.f32 %v11542_v15, 0.0 }
  0x80   : > { %8273 = vmatmul.mubr.f32.gmra.mrb[8].mxu0 %v13419_v21  ;;  %v11518_v21 = vld [vmem:[%s11019_s26 + $0xe2] sm:$0xff] }
  0x81   : > { %8275 = vmatprep.mubr.f32.mxu0 %v13416_v22  ;;  %9751 = vmatpush3.bf16.msra.mxu0 %v9748_v18  ;;  %v11338_v18 = vld [vmem:[%s11019_s26 + $0x150] sm:$0xff] }
  0x82   : > { %9753 = vmatprep.subr.bf16.mxu0 %v9752_v25  ;;  %v13385_v20 = vmax.f32 %v11338_v18, 0.0 }
  0x84   : > { %8276 = vmatmul.mubr.f32.gmra.mrb[10].mxu0 %v13414_v28  ;;  %v6807_v28 = vld [vmem:[%s13376_s1 + $0x208] sm:$0xff] }
  0x85   : > { %8278 = vmatprep.mubr.f32.mxu0 %v13412_v29  ;;  %9755 = vmatpush3.bf16.msra.mxu0 %v9752_v25  ;;  %v11347_v25 = vld [vmem:[%s11019_s26 + $0x158] sm:$0xff] }
  0x86   : > { %9757 = vmatprep.subr.bf16.mxu0 %v9756_v32  ;;  %v13387_v27 = vmax.f32 %v11347_v25, 0.0 }
  0x88   : > { %8279 = vmatmul.mubr.f32.gmra.mrb[12].mxu0 %v13409_v35  ;;  %v6772_v35 = vld [vmem:[%s13376_s1 + $0x1f0] sm:$0xff] }
  0x89   : > { %8281 = vmatprep.mubr.f32.mxu0 %v13408_v36  ;;  %9759 = vmatpush3.bf16.msra.mxu0 %v9756_v32  ;;  %v13388_v32 = vmax.f32 %v11350_v26, 0.0 }
  0x8a   : > { %9761 = vmatprep.subr.bf16.mxu0 %v9760_v39 }
  0x8c   : > { %8282 = vmatmul.mubr.f32.gmra.mrb[14].mxu0 %v13405_v42  ;;  %v6770_v42 = vld [vmem:[%s13376_s1 + $0x1e0] sm:$0xff] }
  0x8d   : > { %8284 = vmatprep.mubr.f32.mxu0 %v13404_v43  ;;  %9763 = vmatpush3.bf16.msra.mxu0 %v9760_v39  ;;  %v13393_v39 = vmax.f32 %v11359_v33, 0.0 }
  0x8e   : > { %9765 = vmatprep.subr.bf16.mxu0 %v11277_v46 }
  0x90   : > { %8285 = vmatmul.mubr.f32.gmra.mrb[16].mxu0 %v13401_v47  ;;  %v6768_v47 = vld [vmem:[%s13376_s1 + $0x1d0] sm:$0xff] }
  0x91   : > { %8287 = vmatprep.mubr.f32.mxu0 %v13400_v48 }
  0x94   : > { %8288 = vmatmul.mubr.f32.gmra.mrb[18].mxu0 %v13397_v51  ;;  %v6766_v51 = vld [vmem:[%s13376_s1 + $0x1c0] sm:$0xff] }
  0x95   : > { %8290 = vmatprep.mubr.f32.mxu0 %v13396_v52 }
  0x98   : > { %8291 = vmatmul.mubr.f32.gmra.mrb[20].mxu0 %v13394_v56  ;;  %v6765_v56 = vld [vmem:[%s13376_s1 + $0x1b8] sm:$0xff] }
  0x99   : > { %8293 = vmatprep.mubr.f32.mxu0 %v13392_v57  ;;  %v6763_v57 = vld [vmem:[%s13376_s1 + $0x1a8] sm:$0xff] }
  0x9c   : > { %8294 = vmatmul.mubr.f32.gmra.mrb[22].mxu0 %v13391_v63  ;;  %v6762_v63 = vld [vmem:[%s13376_s1 + $0x1a0] sm:$0xff] }
  0x9d   : > { %8296 = vmatprep.mubr.f32.mxu0 %v13390_v4 }
  0xa0   : > { %8297 = vmatmul.mubr.f32.gmra.mrb[24].mxu0 %v13389_v11  ;;  %v11384_v11 = vld [vmem:[%s11019_s26 + $0x32] sm:$0xff] }
  0xa1   : > { %8299 = vmatprep.mubr.f32.mxu0 %v13386_v12  ;;  %v6761_v12 = vld [vmem:[%s13376_s1 + $0x198] sm:$0xff] }
  0xa4   : > { %8300 = vmatmul.mubr.f32.gmra.mrb[26].mxu0 %v13384_v19  ;;  %v11369_v19 = vld [vmem:[%s11019_s26 + $0x1a] sm:$0xff] }
  0xa5   : > { %8302 = vmatprep.mubr.f32.mxu0 %v13385_v20  ;;  %v6760_v20 = vld [vmem:[%s13376_s1 + $0x190] sm:$0xff]  ;;  %v13395_v34 = vmax.f32 %v11369_v19, 0.0 }
  0xa6   : > { %v9768_v4 = vpack.c.bf16 %v6761_v12, %v6760_v20  ;;  %v11401_v12 = vld [vmem:[%s11019_s26 + $0x4a] sm:$0xff]  ;;  %v9772_v20 = vpack.c.bf16 %v6763_v57, %v6762_v63  ;;  %v11416_v57 = vld [vmem:[%s11019_s26 + $0x52] sm:$0xff]  ;;  %v11419_v63 = vld [vmem:[%s11019_s26 + $0x62] sm:$0xff] }
  0xa8   : > { %8303 = vmatmul.mubr.f32.gmra.mrb[28].mxu0 %v13387_v27  ;;  %v950_v27 = vmax.f32 %v918_v41, 0.0 }
  0xa9   : > { %8305 = vmatprep.mubr.f32.mxu0 %v13388_v32  ;;  %v11381_v32 = vld [vmem:[%s11019_s26 + $0x22] sm:$0xff] }
  0xaa   : > { %v13398_v41 = vmax.f32 %v11381_v32, 0.0 }
  0xac   : > { %8306 = vmatmul.mubr.f32.gmra.mrb[30].mxu0 %v13393_v39  ;;  %v11397_v39 = vld [vmem:[%s11019_s26 + $0x3a] sm:$0xff] }
  0xad   : > { %8340 = vmatprep.mubr.f32.mxu0 %v949_v40  ;;  %v13399_v40 = vmax.f32 %v11384_v11, 0.0 }
  0xb0   : > { %8341 = vmatmul.mubr.f32.vlgmr.msra.gmra.mrb[0].mxu0 %v950_v27  ;;  %v6764_v27 = vld [vmem:[%s13376_s1 + $0x1b0] sm:$0xff] }
  0xb1   : > { %8343 = vmatprep.mubr.f32.mxu0 %v13395_v34  ;;  %9767 = vmatpush3.bf16.msra.mxu0 %v11277_v46  ;;  %v13402_v34 = vmax.f32 %v11397_v39, 0.0  ;;  %v13403_v46 = vmax.f32 %v11401_v12, 0.0  ;;  %v9776_v52 = vpack.c.bf16 %v6765_v56, %v6764_v27  ;;  %v13407_v56 = vmax.f32 %v11419_v63, 0.0  ;;  %v11437_v27 = vld [vmem:[%s11019_s26 + $0x7a] sm:$0xff] }
  0xb2   : > { %9769 = vmatprep.subr.bf16.mxu0 %v9768_v4 }
  0xb4   : > { %8344 = vmatmul.mubr.f32.gmra.mrb[2].mxu0 %v13398_v41  ;;  %v6767_v41 = vld [vmem:[%s13376_s1 + $0x1c8] sm:$0xff] }
  0xb5   : > { %8346 = vmatprep.mubr.f32.mxu0 %v13399_v40  ;;  %9771 = vmatpush3.bf16.msra.mxu0 %v9768_v4  ;;  %v13406_v40 = vmax.f32 %v11416_v57, 0.0  ;;  %v11434_v4 = vld [vmem:[%s11019_s26 + $0x6a] sm:$0xff]  ;;  %v9780_v48 = vpack.c.bf16 %v6767_v41, %v6766_v51  ;;  %v13411_v51 = vmax.f32 %v11437_v27, 0.0  ;;  %v11452_v41 = vld [vmem:[%s11019_s26 + $0x82] sm:$0xff] }
  0xb6   : > { %9773 = vmatprep.subr.bf16.mxu0 %v9772_v20 }
  0xb8   : > { %8347 = vmatmul.mubr.f32.gmra.mrb[4].mxu0 %v13402_v34  ;;  %v6769_v34 = vld [vmem:[%s13376_s1 + $0x1d8] sm:$0xff] }
  0xb9   : > { %8349 = vmatprep.mubr.f32.mxu0 %v13403_v46  ;;  %9775 = vmatpush3.bf16.msra.mxu0 %v9772_v20  ;;  %v13410_v46 = vmax.f32 %v11434_v4, 0.0  ;;  %v11455_v20 = vld [vmem:[%s11019_s26 + $0x92] sm:$0xff]  ;;  %v9784_v43 = vpack.c.bf16 %v6769_v34, %v6768_v47  ;;  %v11473_v34 = vld [vmem:[%s11019_s26 + $0xaa] sm:$0xff] }
  0xba   : > { %9777 = vmatprep.subr.bf16.mxu0 %v9776_v52  ;;  %v13415_v47 = vmax.f32 %v11455_v20, 0.0 }
  0xbc   : > { %8350 = vmatmul.mubr.f32.gmra.mrb[6].mxu0 %v13406_v40  ;;  %v6771_v40 = vld [vmem:[%s13376_s1 + $0x1e8] sm:$0xff] }
  0xbd   : > { %8352 = vmatprep.mubr.f32.mxu0 %v13407_v56  ;;  %9779 = vmatpush3.bf16.msra.mxu0 %v9776_v52  ;;  %v13413_v56 = vmax.f32 %v11452_v41, 0.0  ;;  %v11470_v52 = vld [vmem:[%s11019_s26 + $0x9a] sm:$0xff]  ;;  %v9788_v36 = vpack.c.bf16 %v6771_v40, %v6770_v42  ;;  %v13418_v42 = vmax.f32 %v11473_v34, 0.0  ;;  %v11491_v40 = vld [vmem:[%s11019_s26 + $0xc2] sm:$0xff] }
  0xbe   : > { %9781 = vmatprep.subr.bf16.mxu0 %v9780_v48 }
  0xc0   : > { %8353 = vmatmul.mubr.f32.gmra.mrb[8].mxu0 %v13410_v46  ;;  %v6773_v46 = vld [vmem:[%s13376_s1 + $0x1f8] sm:$0xff] }
  0xc1   : > { %8355 = vmatprep.mubr.f32.mxu0 %v13411_v51  ;;  %9783 = vmatpush3.bf16.msra.mxu0 %v9780_v48  ;;  %v13417_v51 = vmax.f32 %v11470_v52, 0.0  ;;  %v11488_v48 = vld [vmem:[%s11019_s26 + $0xb2] sm:$0xff]  ;;  %v9792_v29 = vpack.c.bf16 %v6773_v46, %v6772_v35  ;;  %v13420_v35 = vmax.f32 %v11491_v40, 0.0  ;;  %v11509_v46 = vld [vmem:[%s11019_s26 + $0xda] sm:$0xff] }
  0xc2   : > { %9785 = vmatprep.subr.bf16.mxu0 %v9784_v43 }
  0xc4   : > { %8356 = vmatmul.mubr.f32.gmra.mrb[10].mxu0 %v13413_v56  ;;  %v6806_v56 = vld [vmem:[%s13376_s1 + $0x200] sm:$0xff] }
  0xc5   : > { %8358 = vmatprep.mubr.f32.mxu0 %v13415_v47  ;;  %9787 = vmatpush3.bf16.msra.mxu0 %v9784_v43  ;;  %v13421_v47 = vmax.f32 %v11488_v48, 0.0  ;;  %v11506_v43 = vld [vmem:[%s11019_s26 + $0xca] sm:$0xff]  ;;  %v9796_v22 = vpack.c.bf16 %v6807_v28, %v6806_v56  ;;  %v13426_v28 = vmax.f32 %v11518_v21, 0.0 }
  0xc6   : > { %9789 = vmatprep.subr.bf16.mxu0 %v9788_v36 }
  0xc8   : > { %8359 = vmatmul.mubr.f32.gmra.mrb[12].mxu0 %v13417_v51  ;;  %v13422_v51 = vmax.f32 %v11506_v43, 0.0 }
  0xc9   : > { %8361 = vmatprep.mubr.f32.mxu0 %v13418_v42  ;;  %9791 = vmatpush3.bf16.msra.mxu0 %v9788_v36  ;;  %v13424_v42 = vmax.f32 %v11509_v46, 0.0  ;;  %v11521_v36 = vld [vmem:[%s11019_s26 + $0xf2] sm:$0xff] }
  0xca   : > { %9793 = vmatprep.subr.bf16.mxu0 %v9792_v29  ;;  %v13428_v56 = vmax.f32 %v11521_v36, 0.0 }
  0xcc   : > { %8362 = vmatmul.mubr.f32.gmra.mrb[14].mxu0 %v13421_v47  ;;  %v11533_v47 = vld [vmem:[%s11019_s26 + $0x10a] sm:$0xff] }
  0xcd   : > { %8364 = vmatprep.mubr.f32.mxu0 %v13420_v35  ;;  %9795 = vmatpush3.bf16.msra.mxu0 %v9792_v29  ;;  %v11530_v35 = vld [vmem:[%s11019_s26 + $0xfa] sm:$0xff] }
  0xce   : > { %9797 = vmatprep.subr.bf16.mxu0 %v9796_v22  ;;  %v13430_v29 = vmax.f32 %v11530_v35, 0.0 }
  0xd0   : > { %8365 = vmatmul.mubr.f32.gmra.mrb[16].mxu0 %v13422_v51  ;;  %v13432_v51 = vmax.f32 %v11533_v47, 0.0 }
  0xd1   : > { %8367 = vmatprep.mubr.f32.mxu0 %v13424_v42  ;;  %v11545_v42 = vld [vmem:[%s11019_s26 + $0x122] sm:$0xff] }
  0xd2   : > { %13520 = vst [vmem:[#allocation3_spill] sm:$0xff] %v11545_v42 }
  0xd4   : > { %8368 = vmatmul.mubr.f32.gmra.mrb[18].mxu0 %v13426_v28  ;;  %v13437_v28 = vmax.f32 %v11545_v42, 0.0  ;;  %v11581_v42 = vld [vmem:[%s11019_s26 + $0x16a] sm:$0xff] }
  0xd5   : > { %8370 = vmatprep.mubr.f32.mxu0 %v13428_v56  ;;  %v11557_v56 = vld [vmem:[%s11019_s26 + $0x13a] sm:$0xff]  ;;  %13525 = vst [vmem:[#allocation8_spill] sm:$0xff] %v11581_v42 }
  0xd8   : > { %8371 = vmatmul.mubr.f32.gmra.mrb[20].mxu0 %v13430_v29  ;;  %v13440_v29 = vmax.f32 %v11557_v56, 0.0 }
  0xd9   : > { %8373 = vmatprep.mubr.f32.mxu0 %v13432_v51  ;;  %v11569_v51 = vld [vmem:[%s11019_s26 + $0x152] sm:$0xff] }
  0xda   : > { %13523 = vst [vmem:[#allocation6_spill] sm:$0xff] %v11569_v51 }
  0xdc   : > { %8374 = vmatmul.mubr.f32.gmra.mrb[22].mxu0 %v13434_v14  ;;  %v13442_v14 = vmax.f32 %v11569_v51, 0.0  ;;  %v13526_v51 = vmax.f32 %v11137_v54, 0.0  ;;  %v6812_v54 = vld [vmem:[%s13376_s1 + $0x230] sm:$0xff] }
  0xdd   : > { %8376 = vmatprep.mubr.f32.mxu0 %v13437_v28  ;;  %v13444_v28 = vmax.f32 %v11578_v58, 0.0  ;;  %v13527_v58 = vmax.f32 %v11147_v59, 0.0  ;;  %v13530_v59 = vmax.f32 %v11167_v3, 0.0 }
  0xe0   : > { %8377 = vmatmul.mubr.f32.gmra.mrb[24].mxu0 %v13438_v7  ;;  %v13446_v7 = vmax.f32 %v11581_v42, 0.0  ;;  %v6810_v42 = vld [vmem:[%s13376_s1 + $0x220] sm:$0xff] }
  0xe1   : > { %8379 = vmatprep.mubr.f32.mxu0 %v13440_v29  ;;  %v13449_v29 = vmax.f32 %v11590_v8, 0.0 }
  0xe4   : > { %8380 = vmatmul.mubr.f32.gmra.mrb[26].mxu0 %v13441_v0  ;;  %v6808_v0 = vld [vmem:[%s13376_s1 + $0x210] sm:$0xff] }
  0xe5   : > { %8382 = vmatprep.mubr.f32.mxu0 %v13442_v14  ;;  %v6809_v14 = vld [vmem:[%s13376_s1 + $0x218] sm:$0xff] }
  0xe8   : > { %8383 = vmatmul.mubr.f32.gmra.mrb[28].mxu0 %v13444_v28  ;;  %v9800_v28 = vpack.c.bf16 %v6809_v14, %v6808_v0  ;;  %v6813_v0 = vld [vmem:[%s13376_s1 + $0x238] sm:$0xff]  ;;  %v13529_v14 = vmax.f32 %v11163_v2, 0.0  ;;  %v13532_v2 = vmax.f32 %v11185_v10, 0.0 }
  0xe9   : > { %8385 = vmatprep.mubr.f32.mxu0 %v13446_v7  ;;  %v6811_v7 = vld [vmem:[%s13376_s1 + $0x228] sm:$0xff] }
  0xec   : > { %8386 = vmatmul.mubr.f32.gmra.mrb[30].mxu0 %v13449_v29  ;;  %v9804_v29 = vpack.c.bf16 %v6811_v7, %v6810_v42  ;;  %v13531_v7 = vmax.f32 %v11182_v9, 0.0  ;;  %v13533_v42 = vmax.f32 %v11200_v16, 0.0  ;;  %v13534_v9 = vmax.f32 %v11203_v17, 0.0 }
  0xed   : > { %8420 = vmatprep.mubr.f32.mxu0 %v13526_v51  ;;  %v6817_v51 = vld [vmem:[%s13376_s1 + $0x258] sm:$0xff]  ;;  %v13536_v16 = vmax.f32 %v11221_v24, 0.0 }
  0xf0   : > { %8421 = vmatmul.mubr.f32.vlgmr.msra.gmra.mrb[0].mxu0 %v13527_v58  ;;  %v9808_v58 = vpack.c.bf16 %v6813_v0, %v6812_v54  ;;  %v13535_v54 = vmax.f32 %v11218_v23, 0.0  ;;  %v6820_v0 = vld [vmem:[%s13376_s1 + $0x270] sm:$0xff]  ;;  %v13538_v23 = vmax.f32 %v11239_v31, 0.0 }
  0xf1   : > { %8423 = vmatprep.mubr.f32.mxu0 %v13528_v1  ;;  %9799 = vmatpush3.bf16.msra.mxu0 %v9796_v22  ;;  %v6815_v1 = vld [vmem:[%s13376_s1 + $0x248] sm:$0xff]  ;;  %v6816_v22 = vld [vmem:[%s13376_s1 + $0x250] sm:$0xff] }
  0xf2   : > { %9801 = vmatprep.subr.bf16.mxu0 %v9800_v28  ;;  %v9812_v3 = vpack.c.bf16 %v6815_v1, %v6814_v60  ;;  %v9816_v10 = vpack.c.bf16 %v6817_v51, %v6816_v22  ;;  %v6855_v60 = vld [vmem:[%s13376_s1 + $0x288] sm:$0xff]  ;;  %v13539_v1 = vmax.f32 %v11254_v37, 0.0  ;;  %v13544_v37 = vmax.f32 %v11289_v50, 0.0  ;;  %v11702_v51 = vld [vmem:[%s11019_s26 + $0x180] sm:$0xff] }
  0xf3   : > { %v13546_v22 = vmax.f32 %v11302_v55, 0.0  ;;  %v13550_v50 = vmax.f32 %v11326_v6, 0.0  ;;  %v13552_v55 = vmax.f32 %v11338_v18, 0.0  ;;  %v11710_v6 = vld [vmem:[%s11019_s26 + $0x188] sm:$0xff] }
  0xf4   : > { %8424 = vmatmul.mubr.f32.gmra.mrb[2].mxu0 %v13529_v14  ;;  %v6821_v14 = vld [vmem:[%s13376_s1 + $0x278] sm:$0xff]  ;;  %v13477_v18 = vmax.f32 %v11710_v6, 0.0 }
  0xf5   : > { %8426 = vmatprep.mubr.f32.mxu0 %v13530_v59  ;;  %9803 = vmatpush3.bf16.msra.mxu0 %v9800_v28  ;;  %v6818_v28 = vld [vmem:[%s13376_s1 + $0x260] sm:$0xff]  ;;  %v13537_v59 = vmax.f32 %v11236_v30, 0.0  ;;  %v9824_v24 = vpack.c.bf16 %v6821_v14, %v6820_v0  ;;  %v13540_v30 = vmax.f32 %v11257_v38, 0.0  ;;  %v13545_v38 = vmax.f32 %v11299_v53, 0.0  ;;  %v6859_v14 = vld [vmem:[%s13376_s1 + $0x2a8] sm:$0xff] }
  0xf6   : > { %9805 = vmatprep.subr.bf16.mxu0 %v9804_v29  ;;  %v13551_v53 = vmax.f32 %v11335_v13, 0.0  ;;  %v13555_v13 = vmax.f32 %v11359_v33, 0.0  ;;  %v6858_v0 = vld [vmem:[%s13376_s1 + $0x2a0] sm:$0xff] }
  0xf8   : > { %8427 = vmatmul.mubr.f32.gmra.mrb[4].mxu0 %v13531_v7  ;;  %v13541_v7 = vmax.f32 %v11272_v44, 0.0  ;;  %v13547_v44 = vmax.f32 %v11311_v61, 0.0  ;;  %v13553_v61 = vmax.f32 %v11347_v25, 0.0 }
  0xf9   : > { %8429 = vmatprep.mubr.f32.mxu0 %v13532_v2  ;;  %9807 = vmatpush3.bf16.msra.mxu0 %v9804_v29  ;;  %v6819_v29 = vld [vmem:[%s13376_s1 + $0x268] sm:$0xff]  ;;  %v13542_v2 = vmax.f32 %v11275_v45, 0.0  ;;  %v13548_v45 = vmax.f32 %v11314_v62, 0.0  ;;  %v13554_v62 = vmax.f32 %v11350_v26, 0.0  ;;  %v6856_v26 = vld [vmem:[%s13376_s1 + $0x290] sm:$0xff] }
  0xfa   : > { %9809 = vmatprep.subr.bf16.mxu0 %v9808_v58  ;;  %v9820_v17 = vpack.c.bf16 %v6819_v29, %v6818_v28  ;;  %v6857_v28 = vld [vmem:[%s13376_s1 + $0x298] sm:$0xff] }
  0xfc   : > { %8430 = vmatmul.mubr.f32.gmra.mrb[6].mxu0 %v13533_v42  ;;  %v6774_v42 = vld [vmem:[%s11019_s26 + $0x19] sm:$0xff] }
  0xfd   : > { %8432 = vmatprep.mubr.f32.mxu0 %v13534_v9  ;;  %9811 = vmatpush3.bf16.msra.mxu0 %v9808_v58  ;;  %v6854_v58 = vld [vmem:[%s13376_s1 + $0x280] sm:$0xff]  ;;  %v1626_v25 = vmax.f32 %v6774_v42, 0.0 }
  0xfe   : > { %9813 = vmatprep.subr.bf16.mxu0 %v9812_v3  ;;  %v9828_v31 = vpack.c.bf16 %v6855_v60, %v6854_v58  ;;  %v6775_v9 = vld [vmem:[%s11019_s26 + $0x21] sm:$0xff]  ;;  %v9836_v60 = vpack.c.bf16 %v6859_v14, %v6858_v0  ;;  %v11820_v0 = vld [vmem:[%s11019_s26 + $0xb1] sm:$0xff] }
  0xff   : > { %v1627_v33 = vmax.f32 %v6775_v9, 0.0  ;;  %v11751_v58 = vld [vmem:[%s11019_s26 + $0x61] sm:$0xff] }
 0x100   : > { %8433 = vmatmul.mubr.f32.gmra.mrb[8].mxu0 %v13535_v54  ;;  %v11732_v54 = vld [vmem:[%s11019_s26 + $0x39] sm:$0xff]  ;;  %v11823_v14 = vld [vmem:[%s11019_s26 + $0xc1] sm:$0xff] }
 0x101   : > { %8435 = vmatprep.mubr.f32.mxu0 %v13536_v16  ;;  %9815 = vmatpush3.bf16.msra.mxu0 %v9812_v3  ;;  %v13543_v3 = vmax.f32 %v11286_v49, 0.0  ;;  %v13549_v49 = vmax.f32 %v11323_v5, 0.0  ;;  %v13479_v5 = vmax.f32 %v11702_v51, 0.0  ;;  %v11735_v16 = vld [vmem:[%s11019_s26 + $0x49] sm:$0xff] }
 0x102   : > { %9817 = vmatprep.subr.bf16.mxu0 %v9816_v10 }
 0x104   : > { %8436 = vmatmul.mubr.f32.gmra.mrb[10].mxu0 %v13537_v59  ;;  %v13470_v59 = vmax.f32 %v11732_v54, 0.0 }
 0x105   : > { %8438 = vmatprep.mubr.f32.mxu0 %v13538_v23  ;;  %9819 = vmatpush3.bf16.msra.mxu0 %v9816_v10  ;;  %v11720_v10 = vld [vmem:[%s11019_s26 + $0x31] sm:$0xff]  ;;  %v13469_v23 = vmax.f32 %v11735_v16, 0.0 }
 0x106   : > { %9821 = vmatprep.subr.bf16.mxu0 %v9820_v17  ;;  %v13473_v29 = vmax.f32 %v11720_v10, 0.0 }
 0x108   : > { %8439 = vmatmul.mubr.f32.gmra.mrb[12].mxu0 %v13539_v1  ;;  %v6860_v1 = vld [vmem:[%s13376_s1 + $0x2b0] sm:$0xff] }
 0x109   : > { %8441 = vmatprep.mubr.f32.mxu0 %v13540_v30  ;;  %9823 = vmatpush3.bf16.msra.mxu0 %v9820_v17  ;;  %v9832_v17 = vpack.c.bf16 %v6857_v28, %v6856_v26  ;;  %v6861_v30 = vld [vmem:[%s13376_s1 + $0x2b8] sm:$0xff]  ;;  %v6866_v26 = vld [vmem:[%s13376_s1 + $0x2e0] sm:$0xff]  ;;  %v6867_v28 = vld [vmem:[%s13376_s1 + $0x2e8] sm:$0xff] }
 0x10a   : > { %9825 = vmatprep.subr.bf16.mxu0 %v9824_v24 }
 0x10c   : > { %8442 = vmatmul.mubr.f32.gmra.mrb[14].mxu0 %v13541_v7 }
 0x10d   : > { %8444 = vmatprep.mubr.f32.mxu0 %v13542_v2  ;;  %9827 = vmatpush3.bf16.msra.mxu0 %v9824_v24  ;;  %v11748_v24 = vld [vmem:[%s11019_s26 + $0x51] sm:$0xff]  ;;  %v11766_v2 = vld [vmem:[%s11019_s26 + $0x69] sm:$0xff] }
 0x10e   : > { %9829 = vmatprep.subr.bf16.mxu0 %v9828_v31  ;;  %v13467_v7 = vmax.f32 %v11748_v24, 0.0 }
 0x110   : > { %8445 = vmatmul.mubr.f32.gmra.mrb[16].mxu0 %v13543_v3  ;;  %v11769_v3 = vld [vmem:[%s11019_s26 + $0x79] sm:$0xff] }
 0x111   : > { %8447 = vmatprep.mubr.f32.mxu0 %v13544_v37  ;;  %v9840_v37 = vpack.c.bf16 %v6861_v30, %v6860_v1  ;;  %v6868_v1 = vld [vmem:[%s13376_s1 + $0x2f0] sm:$0xff]  ;;  %v6869_v30 = vld [vmem:[%s13376_s1 + $0x2f8] sm:$0xff] }
 0x114   : > { %8448 = vmatmul.mubr.f32.gmra.mrb[18].mxu0 %v13545_v38  ;;  %v6862_v38 = vld [vmem:[%s13376_s1 + $0x2c0] sm:$0xff] }
 0x115   : > { %8450 = vmatprep.mubr.f32.mxu0 %v13546_v22  ;;  %v6863_v22 = vld [vmem:[%s13376_s1 + $0x2c8] sm:$0xff] }
 0x118   : > { %8451 = vmatmul.mubr.f32.gmra.mrb[20].mxu0 %v13547_v44  ;;  %v13463_v44 = vmax.f32 %v11766_v2, 0.0 }
 0x119   : > { %8453 = vmatprep.mubr.f32.mxu0 %v13548_v45  ;;  %v13461_v45 = vmax.f32 %v11769_v3, 0.0 }
 0x11c   : > { %8454 = vmatmul.mubr.f32.gmra.mrb[22].mxu0 %v13549_v49  ;;  %v11784_v49 = vld [vmem:[%s11019_s26 + $0x81] sm:$0xff] }
 0x11d   : > { %8456 = vmatprep.mubr.f32.mxu0 %v13550_v50  ;;  %v11787_v50 = vld [vmem:[%s11019_s26 + $0x91] sm:$0xff] }
 0x11e   : > { %v13457_v42 = vmax.f32 %v11787_v50, 0.0 }
 0x120   : > { %8457 = vmatmul.mubr.f32.gmra.mrb[24].mxu0 %v13551_v53  ;;  %v9844_v53 = vpack.c.bf16 %v6863_v22, %v6862_v38  ;;  %v13452_v38 = vmax.f32 %v11823_v14, 0.0  ;;  %v11838_v22 = vld [vmem:[%s11019_s26 + $0xc9] sm:$0xff] }
 0x121   : > { %8459 = vmatprep.mubr.f32.mxu0 %v13552_v55  ;;  %v6864_v55 = vld [vmem:[%s13376_s1 + $0x2d0] sm:$0xff] }
 0x124   : > { %8460 = vmatmul.mubr.f32.gmra.mrb[26].mxu0 %v13553_v61  ;;  %v6865_v61 = vld [vmem:[%s13376_s1 + $0x2d8] sm:$0xff] }
 0x125   : > { %8462 = vmatprep.mubr.f32.mxu0 %v13554_v62  ;;  %v13459_v62 = vmax.f32 %v11784_v49, 0.0  ;;  %v9848_v9 = vpack.c.bf16 %v6865_v61, %v6864_v55  ;;  %v9856_v55 = vpack.c.bf16 %v6869_v30, %v6868_v1  ;;  %v6902_v61 = vld [vmem:[%s13376_s1 + $0x300] sm:$0xff]  ;;  %v11859_v30 = vld [vmem:[%s11019_s26 + $0xf1] sm:$0xff] }
 0x126   : > { %v11856_v1 = vld [vmem:[%s11019_s26 + $0xe1] sm:$0xff] }
 0x128   : > { %8463 = vmatmul.mubr.f32.gmra.mrb[28].mxu0 %v13555_v13  ;;  %v11802_v13 = vld [vmem:[%s11019_s26 + $0x99] sm:$0xff] }
 0x129   : > { %8465 = vmatprep.mubr.f32.mxu0 %v13479_v5  ;;  %v6906_v5 = vld [vmem:[%s13376_s1 + $0x320] sm:$0xff] }
 0x12c   : > { %8466 = vmatmul.mubr.f32.gmra.mrb[30].mxu0 %v13477_v18  ;;  %v13558_v18 = vmax.f32 %v11369_v19, 0.0  ;;  %v6908_v19 = vld [vmem:[%s13376_s1 + $0x330] sm:$0xff] }
 0x12d   : > { %8500 = vmatprep.mubr.f32.mxu0 %v1626_v25  ;;  %v11805_v25 = vld [vmem:[%s11019_s26 + $0xa9] sm:$0xff] }
 0x130   : > { %8501 = vmatmul.mubr.f32.vlgmr.msra.gmra.mrb[0].mxu0 %v1627_v33  ;;  %v13453_v33 = vmax.f32 %v11802_v13, 0.0 }
 0x131   : > { %8503 = vmatprep.mubr.f32.mxu0 %v13473_v29  ;;  %9831 = vmatpush3.bf16.msra.mxu0 %v9828_v31  ;;  %v13465_v31 = vmax.f32 %v11751_v58, 0.0  ;;  %v11940_v29 = vld [vmem:[%s11019_s26 + $0x189] sm:$0xff] }
 0x132   : > { %9833 = vmatprep.subr.bf16.mxu0 %v9832_v17 }
 0x134   : > { %8504 = vmatmul.mubr.f32.gmra.mrb[2].mxu0 %v13470_v59  ;;  %v11931_v59 = vld [vmem:[%s11019_s26 + $0x181] sm:$0xff] }
 0x135   : > { %8506 = vmatprep.mubr.f32.mxu0 %v13469_v23  ;;  %9835 = vmatpush3.bf16.msra.mxu0 %v9832_v17  ;;  %v13450_v17 = vmax.f32 %v11805_v25, 0.0  ;;  %v11928_v23 = vld [vmem:[%s11019_s26 + $0x171] sm:$0xff]  ;;  %13557 = vst [vmem:[#allocation10_spill] sm:$0xff] %v11931_v59 }
 0x136   : > { %9837 = vmatprep.subr.bf16.mxu0 %v9836_v60  ;;  %13556 = vst [vmem:[#allocation9_spill] sm:$0xff] %v11928_v23 }
 0x138   : > { %8507 = vmatmul.mubr.f32.gmra.mrb[4].mxu0 %v13467_v7 }
 0x139   : > { %8509 = vmatprep.mubr.f32.mxu0 %v13465_v31  ;;  %9839 = vmatpush3.bf16.msra.mxu0 %v9836_v60  ;;  %v9852_v60 = vpack.c.bf16 %v6867_v28, %v6866_v26  ;;  %v6903_v26 = vld [vmem:[%s13376_s1 + $0x308] sm:$0xff]  ;;  %v13455_v28 = vmax.f32 %v11838_v22, 0.0  ;;  %v11916_v31 = vld [vmem:[%s11019_s26 + $0x159] sm:$0xff] }
 0x13a   : > { %9841 = vmatprep.subr.bf16.mxu0 %v9840_v37  ;;  %v13475_v7 = vmax.f32 %v11916_v31, 0.0 }
 0x13c   : > { %8510 = vmatmul.mubr.f32.gmra.mrb[6].mxu0 %v13463_v44 }
 0x13d   : > { %8512 = vmatprep.mubr.f32.mxu0 %v13461_v45  ;;  %9843 = vmatpush3.bf16.msra.mxu0 %v9840_v37  ;;  %v13451_v37 = vmax.f32 %v11820_v0, 0.0  ;;  %v11904_v45 = vld [vmem:[%s11019_s26 + $0x141] sm:$0xff] }
 0x13e   : > { %9845 = vmatprep.subr.bf16.mxu0 %v9844_v53  ;;  %v13472_v44 = vmax.f32 %v11904_v45, 0.0 }
 0x140   : > { %8513 = vmatmul.mubr.f32.gmra.mrb[8].mxu0 %v13459_v62 }
 0x141   : > { %8515 = vmatprep.mubr.f32.mxu0 %v13457_v42  ;;  %9847 = vmatpush3.bf16.msra.mxu0 %v9844_v53  ;;  %v11841_v53 = vld [vmem:[%s11019_s26 + $0xd9] sm:$0xff]  ;;  %v11892_v42 = vld [vmem:[%s11019_s26 + $0x129] sm:$0xff] }
 0x142   : > { %9849 = vmatprep.subr.bf16.mxu0 %v9848_v9  ;;  %v13468_v62 = vmax.f32 %v11892_v42, 0.0 }
 0x144   : > { %8516 = vmatmul.mubr.f32.gmra.mrb[10].mxu0 %v13453_v33  ;;  %v11868_v33 = vld [vmem:[%s11019_s26 + $0xf9] sm:$0xff] }
 0x145   : > { %8518 = vmatprep.mubr.f32.mxu0 %v13450_v17  ;;  %9851 = vmatpush3.bf16.msra.mxu0 %v9848_v9  ;;  %v13454_v9 = vmax.f32 %v11841_v53, 0.0  ;;  %v9860_v17 = vpack.c.bf16 %v6903_v26, %v6902_v61  ;;  %v13460_v61 = vmax.f32 %v11868_v33, 0.0 }
 0x146   : > { %9853 = vmatprep.subr.bf16.mxu0 %v9852_v60 }
 0x148   : > { %8519 = vmatmul.mubr.f32.gmra.mrb[12].mxu0 %v13451_v37  ;;  %v13456_v37 = vmax.f32 %v11856_v1, 0.0 }
 0x149   : > { %8521 = vmatprep.mubr.f32.mxu0 %v13452_v38  ;;  %9855 = vmatpush3.bf16.msra.mxu0 %v9852_v60  ;;  %v13458_v38 = vmax.f32 %v11859_v30, 0.0  ;;  %v11871_v60 = vld [vmem:[%s11019_s26 + $0x109] sm:$0xff] }
 0x14a   : > { %9857 = vmatprep.subr.bf16.mxu0 %v9856_v55  ;;  %v13462_v26 = vmax.f32 %v11871_v60, 0.0 }
 0x14c   : > { %8522 = vmatmul.mubr.f32.gmra.mrb[14].mxu0 %v13455_v28  ;;  %v11883_v28 = vld [vmem:[%s11019_s26 + $0x121] sm:$0xff] }
 0x14d   : > { %8524 = vmatprep.mubr.f32.mxu0 %v13454_v9  ;;  %9859 = vmatpush3.bf16.msra.mxu0 %v9856_v55  ;;  %v11880_v9 = vld [vmem:[%s11019_s26 + $0x111] sm:$0xff] }
 0x14e   : > { %9861 = vmatprep.subr.bf16.mxu0 %v9860_v17  ;;  %v13464_v55 = vmax.f32 %v11880_v9, 0.0 }
 0x150   : > { %8525 = vmatmul.mubr.f32.gmra.mrb[16].mxu0 %v13456_v37  ;;  %v13466_v37 = vmax.f32 %v11883_v28, 0.0 }
 0x151   : > { %8527 = vmatprep.mubr.f32.mxu0 %v13458_v38  ;;  %v11895_v38 = vld [vmem:[%s11019_s26 + $0x139] sm:$0xff] }
 0x154   : > { %8528 = vmatmul.mubr.f32.gmra.mrb[18].mxu0 %v13460_v61  ;;  %v13471_v61 = vmax.f32 %v11895_v38, 0.0 }
 0x155   : > { %8530 = vmatprep.mubr.f32.mxu0 %v13462_v26  ;;  %v11907_v26 = vld [vmem:[%s11019_s26 + $0x151] sm:$0xff] }
 0x158   : > { %8531 = vmatmul.mubr.f32.gmra.mrb[20].mxu0 %v13464_v55  ;;  %v13474_v55 = vmax.f32 %v11907_v26, 0.0 }
 0x159   : > { %8533 = vmatprep.mubr.f32.mxu0 %v13466_v37  ;;  %v11919_v37 = vld [vmem:[%s11019_s26 + $0x169] sm:$0xff] }
 0x15c   : > { %8534 = vmatmul.mubr.f32.gmra.mrb[22].mxu0 %v13468_v62  ;;  %v13476_v62 = vmax.f32 %v11919_v37, 0.0 }
 0x15d   : > { %8536 = vmatprep.mubr.f32.mxu0 %v13471_v61  ;;  %v13478_v61 = vmax.f32 %v11928_v23, 0.0  ;;  %v13560_v23 = vmax.f32 %v11384_v11, 0.0 }
 0x160   : > { %8537 = vmatmul.mubr.f32.gmra.mrb[24].mxu0 %v13472_v44  ;;  %v13480_v44 = vmax.f32 %v11931_v59, 0.0  ;;  %v13559_v59 = vmax.f32 %v11381_v32, 0.0  ;;  %v13562_v32 = vmax.f32 %v11401_v12, 0.0 }
 0x161   : > { %8539 = vmatprep.mubr.f32.mxu0 %v13474_v55  ;;  %v13483_v55 = vmax.f32 %v11940_v29, 0.0 }
 0x164   : > { %8540 = vmatmul.mubr.f32.gmra.mrb[26].mxu0 %v13475_v7  ;;  %v6904_v7 = vld [vmem:[%s13376_s1 + $0x310] sm:$0xff] }
 0x165   : > { %8542 = vmatprep.mubr.f32.mxu0 %v13476_v62  ;;  %v6905_v62 = vld [vmem:[%s13376_s1 + $0x318] sm:$0xff] }
 0x168   : > { %8543 = vmatmul.mubr.f32.gmra.mrb[28].mxu0 %v13478_v61  ;;  %v9864_v61 = vpack.c.bf16 %v6905_v62, %v6904_v7  ;;  %v13561_v7 = vmax.f32 %v11397_v39, 0.0  ;;  %v13564_v39 = vmax.f32 %v11419_v63, 0.0  ;;  %v6913_v62 = vld [vmem:[%s13376_s1 + $0x358] sm:$0xff] }
 0x169   : > { %8545 = vmatprep.mubr.f32.mxu0 %v13480_v44  ;;  %v6907_v44 = vld [vmem:[%s13376_s1 + $0x328] sm:$0xff] }
 0x16c   : > { %8546 = vmatmul.mubr.f32.gmra.mrb[30].mxu0 %v13483_v55  ;;  %v9868_v55 = vpack.c.bf16 %v6907_v44, %v6906_v5  ;;  %v6910_v5 = vld [vmem:[%s13376_s1 + $0x340] sm:$0xff]  ;;  %v6912_v44 = vld [vmem:[%s13376_s1 + $0x350] sm:$0xff] }
 0x16d   : > { %8580 = vmatprep.mubr.f32.mxu0 %v13558_v18  ;;  %v6909_v18 = vld [vmem:[%s13376_s1 + $0x338] sm:$0xff]  ;;  %v9880_v63 = vpack.c.bf16 %v6913_v62, %v6912_v44  ;;  %v13578_v44 = vmax.f32 %v11533_v47, 0.0 }
 0x16e   : > { %v9872_v11 = vpack.c.bf16 %v6909_v18, %v6908_v19  ;;  %v13567_v19 = vmax.f32 %v11452_v41, 0.0  ;;  %v6916_v18 = vld [vmem:[%s13376_s1 + $0x370] sm:$0xff]  ;;  %v13570_v41 = vmax.f32 %v11473_v34, 0.0 }
 0x170   : > { %8581 = vmatmul.mubr.f32.vlgmr.msra.gmra.mrb[0].mxu0 %v13559_v59  ;;  %v6911_v59 = vld [vmem:[%s13376_s1 + $0x348] sm:$0xff] }
 0x171   : > { %8583 = vmatprep.mubr.f32.mxu0 %v13560_v23  ;;  %9863 = vmatpush3.bf16.msra.mxu0 %v9860_v17  ;;  %v13563_v23 = vmax.f32 %v11416_v57, 0.0  ;;  %v9876_v12 = vpack.c.bf16 %v6911_v59, %v6910_v5  ;;  %v13565_v17 = vmax.f32 %v11434_v4, 0.0  ;;  %v13566_v57 = vmax.f32 %v11437_v27, 0.0  ;;  %v6951_v5 = vld [vmem:[%s13376_s1 + $0x388] sm:$0xff] }
 0x172   : > { %9865 = vmatprep.subr.bf16.mxu0 %v9864_v61  ;;  %v13568_v4 = vmax.f32 %v11455_v20, 0.0  ;;  %v13571_v59 = vmax.f32 %v11488_v48, 0.0  ;;  %v13576_v48 = vmax.f32 %v11521_v36, 0.0  ;;  %v13584_v36 = vmax.f32 %v11557_v56, 0.0  ;;  %v12060_v56 = vld [vmem:[%s11019_s26 + $0x18a] sm:$0xff] }
 0x174   : > { %8584 = vmatmul.mubr.f32.gmra.mrb[2].mxu0 %v13561_v7  ;;  %v6917_v7 = vld [vmem:[%s13376_s1 + $0x378] sm:$0xff] }
 0x175   : > { %8586 = vmatprep.mubr.f32.mxu0 %v13562_v32  ;;  %9867 = vmatpush3.bf16.msra.mxu0 %v9864_v61  ;;  %v6914_v61 = vld [vmem:[%s13376_s1 + $0x360] sm:$0xff]  ;;  %v13569_v32 = vmax.f32 %v11470_v52, 0.0  ;;  %v9888_v20 = vpack.c.bf16 %v6917_v7, %v6916_v18  ;;  %v13572_v52 = vmax.f32 %v11491_v40, 0.0  ;;  %v13577_v40 = vmax.f32 %v11530_v35, 0.0  ;;  %v6870_v18 = vld [vmem:[%s11019_s26 + $0x30] sm:$0xff] }
 0x176   : > { %9869 = vmatprep.subr.bf16.mxu0 %v9868_v55  ;;  %v13593_v7 = vmax.f32 %v11590_v8, 0.0 }
 0x178   : > { %8587 = vmatmul.mubr.f32.gmra.mrb[4].mxu0 %v13563_v23  ;;  %v13573_v23 = vmax.f32 %v11506_v43, 0.0  ;;  %v13579_v43 = vmax.f32 %v11542_v15, 0.0  ;;  %v13589_v15 = vld [vmem:[#allocation7_spill] sm:$0xff] }
 0x179   : > { %8589 = vmatprep.mubr.f32.mxu0 %v13564_v39  ;;  %9871 = vmatpush3.bf16.msra.mxu0 %v9868_v55  ;;  %v6915_v55 = vld [vmem:[%s13376_s1 + $0x368] sm:$0xff]  ;;  %v13574_v39 = vmax.f32 %v11509_v46, 0.0  ;;  %v13580_v46 = vld [vmem:[#allocation3_spill] sm:$0xff] }
 0x17a   : > { %9873 = vmatprep.subr.bf16.mxu0 %v9872_v11  ;;  %v9884_v27 = vpack.c.bf16 %v6915_v55, %v6914_v61  ;;  %v13581_v62 = vmax.f32 %v13580_v46, 0.0  ;;  %v12052_v61 = vld [vmem:[%s11019_s26 + $0x182] sm:$0xff]  ;;  %v13590_v55 = vmax.f32 %v13589_v15, 0.0 }
 0x17b   : > { %v6875_v46 = vld [vmem:[%s11019_s26 + $0x68] sm:$0xff]  ;;  %v6958_v15 = vld [vmem:[%s13376_s1 + $0x3c0] sm:$0xff] }
 0x17c   : > { %8590 = vmatmul.mubr.f32.gmra.mrb[6].mxu0 %v13565_v17  ;;  %v13582_v17 = vld [vmem:[#allocation4_spill] sm:$0xff] }
 0x17d   : > { %8592 = vmatprep.mubr.f32.mxu0 %v13566_v57  ;;  %9875 = vmatpush3.bf16.msra.mxu0 %v9872_v11  ;;  %v6950_v11 = vld [vmem:[%s13376_s1 + $0x380] sm:$0xff]  ;;  %v13585_v57 = vld [vmem:[#allocation5_spill] sm:$0xff] }
 0x17e   : > { %9877 = vmatprep.subr.bf16.mxu0 %v9876_v12  ;;  %v9892_v34 = vpack.c.bf16 %v6951_v5, %v6950_v11  ;;  %v13586_v35 = vmax.f32 %v13585_v57, 0.0  ;;  %v6872_v11 = vld [vmem:[%s11019_s26 + $0x48] sm:$0xff]  ;;  %v6952_v5 = vld [vmem:[%s13376_s1 + $0x390] sm:$0xff]  ;;  %v2308_v57 = vmax.f32 %v6875_v46, 0.0 }
 0x180   : > { %8593 = vmatmul.mubr.f32.gmra.mrb[8].mxu0 %v13567_v19  ;;  %v13591_v19 = vld [vmem:[#allocation8_spill] sm:$0xff] }
 0x181   : > { %8595 = vmatprep.mubr.f32.mxu0 %v13568_v4  ;;  %9879 = vmatpush3.bf16.msra.mxu0 %v9876_v12  ;;  %v13575_v12 = vmax.f32 %v11518_v21, 0.0  ;;  %v13583_v21 = vmax.f32 %v13582_v17, 0.0  ;;  %v13592_v4 = vmax.f32 %v13591_v19, 0.0 }
 0x182   : > { %9881 = vmatprep.subr.bf16.mxu0 %v9880_v63 }
 0x184   : > { %8596 = vmatmul.mubr.f32.gmra.mrb[10].mxu0 %v13569_v32  ;;  %v1995_v32 = vmax.f32 %v12060_v56, 0.0 }
 0x185   : > { %8598 = vmatprep.mubr.f32.mxu0 %v13570_v41  ;;  %9883 = vmatpush3.bf16.msra.mxu0 %v9880_v63  ;;  %v13587_v63 = vld [vmem:[#allocation6_spill] sm:$0xff]  ;;  %v2303_v41 = vmax.f32 %v6870_v18, 0.0 }
 0x186   : > { %9885 = vmatprep.subr.bf16.mxu0 %v9884_v27  ;;  %v13588_v47 = vmax.f32 %v13587_v63, 0.0  ;;  %v6877_v63 = vld [vmem:[%s11019_s26 + $0x80] sm:$0xff]  ;;  %v6879_v18 = vld [vmem:[%s11019_s26 + $0x98] sm:$0xff] }
 0x187   : > { %v2310_v19 = vmax.f32 %v6877_v63, 0.0 }
 0x188   : > { %8599 = vmatmul.mubr.f32.gmra.mrb[12].mxu0 %v13571_v59  ;;  %v6953_v59 = vld [vmem:[%s13376_s1 + $0x398] sm:$0xff] }
 0x189   : > { %8601 = vmatprep.mubr.f32.mxu0 %v13572_v52  ;;  %9887 = vmatpush3.bf16.msra.mxu0 %v9884_v27  ;;  %v1994_v27 = vmax.f32 %v12052_v61, 0.0  ;;  %v2305_v52 = vmax.f32 %v6872_v11, 0.0  ;;  %v6961_v11 = vld [vmem:[%s13376_s1 + $0x3d8] sm:$0xff]  ;;  %v7029_v61 = vld [vmem:[%s13378_s3 + $0xf0] sm:$0xff] }
 0x18a   : > { %9889 = vmatprep.subr.bf16.mxu0 %v9888_v20 }
 0x18c   : > { %8602 = vmatmul.mubr.f32.gmra.mrb[14].mxu0 %v13573_v23  ;;  %v6873_v23 = vld [vmem:[%s11019_s26 + $0x50] sm:$0xff] }
 0x18d   : > { %8604 = vmatprep.mubr.f32.mxu0 %v13574_v39  ;;  %9891 = vmatpush3.bf16.msra.mxu0 %v9888_v20  ;;  %v6871_v20 = vld [vmem:[%s11019_s26 + $0x38] sm:$0xff]  ;;  %v6874_v39 = vld [vmem:[%s11019_s26 + $0x60] sm:$0xff] }
 0x18e   : > { %9893 = vmatprep.subr.bf16.mxu0 %v9892_v34  ;;  %v2304_v8 = vmax.f32 %v6871_v20, 0.0  ;;  %v6960_v20 = vld [vmem:[%s13376_s1 + $0x3d0] sm:$0xff] }
 0x190   : > { %8605 = vmatmul.mubr.f32.gmra.mrb[16].mxu0 %v13575_v12  ;;  %v9896_v12 = vpack.c.bf16 %v6953_v59, %v6952_v5  ;;  %v2312_v5 = vmax.f32 %v6879_v18, 0.0 }
 0x191   : > { %8607 = vmatprep.mubr.f32.mxu0 %v13576_v48  ;;  %v6954_v48 = vld [vmem:[%s13376_s1 + $0x3a0] sm:$0xff] }
 0x194   : > { %8608 = vmatmul.mubr.f32.gmra.mrb[18].mxu0 %v13577_v40  ;;  %v6955_v40 = vld [vmem:[%s13376_s1 + $0x3a8] sm:$0xff] }
 0x195   : > { %8610 = vmatprep.mubr.f32.mxu0 %v13578_v44  ;;  %v2306_v44 = vmax.f32 %v6873_v23, 0.0  ;;  %v9900_v17 = vpack.c.bf16 %v6955_v40, %v6954_v48  ;;  %v9912_v23 = vpack.c.bf16 %v6961_v11, %v6960_v20  ;;  %v6889_v20 = vld [vmem:[%s11019_s26 + $0x110] sm:$0xff]  ;;  %v6890_v11 = vld [vmem:[%s11019_s26 + $0x120] sm:$0xff] }
 0x198   : > { %8611 = vmatmul.mubr.f32.gmra.mrb[20].mxu0 %v13579_v43  ;;  %v2307_v43 = vmax.f32 %v6874_v39, 0.0  ;;  %v6962_v39 = vld [vmem:[%s13376_s1 + $0x3e0] sm:$0xff] }
 0x199   : > { %8613 = vmatprep.mubr.f32.mxu0 %v13581_v62  ;;  %v6876_v62 = vld [vmem:[%s11019_s26 + $0x78] sm:$0xff] }
 0x19c   : > { %8614 = vmatmul.mubr.f32.gmra.mrb[22].mxu0 %v13583_v21  ;;  %v6956_v21 = vld [vmem:[%s13376_s1 + $0x3b0] sm:$0xff] }
 0x19d   : > { %8616 = vmatprep.mubr.f32.mxu0 %v13584_v36  ;;  %v6957_v36 = vld [vmem:[%s13376_s1 + $0x3b8] sm:$0xff] }
 0x1a0   : > { %8617 = vmatmul.mubr.f32.gmra.mrb[24].mxu0 %v13586_v35  ;;  %v2309_v35 = vmax.f32 %v6876_v62, 0.0  ;;  %v6964_v62 = vld [vmem:[%s13376_s1 + $0x3f0] sm:$0xff] }
 0x1a1   : > { %8619 = vmatprep.mubr.f32.mxu0 %v13588_v47  ;;  %v9904_v47 = vpack.c.bf16 %v6957_v36, %v6956_v21 }
 0x1a4   : > { %8620 = vmatmul.mubr.f32.gmra.mrb[26].mxu0 %v13590_v55  ;;  %v6959_v55 = vld [vmem:[%s13376_s1 + $0x3c8] sm:$0xff] }
 0x1a5   : > { %8622 = vmatprep.mubr.f32.mxu0 %v13592_v4 }
 0x1a8   : > { %8623 = vmatmul.mubr.f32.gmra.mrb[28].mxu0 %v13593_v7  ;;  %v6880_v7 = vld [vmem:[%s11019_s26 + $0xa8] sm:$0xff] }
 0x1a9   : > { %8625 = vmatprep.mubr.f32.mxu0 %v1994_v27  ;;  %v2313_v59 = vmax.f32 %v6880_v7, 0.0 }
 0x1ac   : > { %8626 = vmatmul.mubr.f32.gmra.mrb[30].mxu0 %v1995_v32 }
 0x1ad   : > { %8660 = vmatprep.mubr.f32.mxu0 %v2303_v41  ;;  %v9908_v41 = vpack.c.bf16 %v6959_v55, %v6958_v15 }
 0x1b0   : > { %8661 = vmatmul.mubr.f32.vlgmr.msra.gmra.mrb[0].mxu0 %v2304_v8  ;;  %v6881_v8 = vld [vmem:[%s11019_s26 + $0xb0] sm:$0xff] }
 0x1b1   : > { %8663 = vmatprep.mubr.f32.mxu0 %v2305_v52  ;;  %9895 = vmatpush3.bf16.msra.mxu0 %v9892_v34  ;;  %v6878_v34 = vld [vmem:[%s11019_s26 + $0x90] sm:$0xff]  ;;  %v6882_v52 = vld [vmem:[%s11019_s26 + $0xc0] sm:$0xff]  ;;  %v2314_v48 = vmax.f32 %v6881_v8, 0.0  ;;  %v6891_v8 = vld [vmem:[%s11019_s26 + $0x128] sm:$0xff] }
 0x1b2   : > { %9897 = vmatprep.subr.bf16.mxu0 %v9896_v12  ;;  %v2311_v4 = vmax.f32 %v6878_v34, 0.0  ;;  %v2315_v40 = vmax.f32 %v6882_v52, 0.0  ;;  %v6998_v34 = vld [vmem:[%s13376_s1 + $0x400] sm:$0xff]  ;;  %v6892_v52 = vld [vmem:[%s11019_s26 + $0x138] sm:$0xff] }
 0x1b4   : > { %8664 = vmatmul.mubr.f32.gmra.mrb[2].mxu0 %v2306_v44  ;;  %v6883_v44 = vld [vmem:[%s11019_s26 + $0xc8] sm:$0xff] }
 0x1b5   : > { %8666 = vmatprep.mubr.f32.mxu0 %v2307_v43  ;;  %9899 = vmatpush3.bf16.msra.mxu0 %v9896_v12  ;;  %v6963_v12 = vld [vmem:[%s13376_s1 + $0x3e8] sm:$0xff]  ;;  %v6884_v43 = vld [vmem:[%s11019_s26 + $0xd8] sm:$0xff]  ;;  %v2316_v21 = vmax.f32 %v6883_v44, 0.0 }
 0x1b6   : > { %9901 = vmatprep.subr.bf16.mxu0 %v9900_v17  ;;  %v9916_v46 = vpack.c.bf16 %v6963_v12, %v6962_v39  ;;  %v2317_v36 = vmax.f32 %v6884_v43, 0.0  ;;  %v2325_v39 = vmax.f32 %v6892_v52, 0.0  ;;  %v6893_v12 = vld [vmem:[%s11019_s26 + $0x140] sm:$0xff]  ;;  %v6895_v43 = vld [vmem:[%s11019_s26 + $0x158] sm:$0xff]  ;;  %v7020_v52 = vld [vmem:[%s13378_s3 + $0xa8] sm:$0xff] }
 0x1b8   : > { %8667 = vmatmul.mubr.f32.gmra.mrb[4].mxu0 %v2308_v57  ;;  %v6885_v57 = vld [vmem:[%s11019_s26 + $0xe0] sm:$0xff] }
 0x1b9   : > { %8669 = vmatprep.mubr.f32.mxu0 %v2309_v35  ;;  %9903 = vmatpush3.bf16.msra.mxu0 %v9900_v17  ;;  %v6965_v17 = vld [vmem:[%s13376_s1 + $0x3f8] sm:$0xff]  ;;  %v6886_v35 = vld [vmem:[%s11019_s26 + $0xf0] sm:$0xff]  ;;  %v2318_v15 = vmax.f32 %v6885_v57, 0.0 }
 0x1ba   : > { %9905 = vmatprep.subr.bf16.mxu0 %v9904_v47  ;;  %v9920_v63 = vpack.c.bf16 %v6965_v17, %v6964_v62  ;;  %v2319_v55 = vmax.f32 %v6886_v35, 0.0  ;;  %v2328_v62 = vmax.f32 %v6895_v43, 0.0  ;;  %v6900_v57 = vld [vmem:[%s11019_s26 + $0x198] sm:$0xff]  ;;  %v13594_v35 = vmax.f32 %v11702_v51, 0.0  ;;  %v7015_v51 = vld [vmem:[%s13378_s3 + $0x80] sm:$0xff] }
 0x1bb   : > { %v13600_v43 = vmax.f32 %v11751_v58, 0.0  ;;  %v7024_v58 = vld [vmem:[%s13378_s3 + $0xc8] sm:$0xff] }
 0x1bc   : > { %8670 = vmatmul.mubr.f32.gmra.mrb[6].mxu0 %v2310_v19  ;;  %v6887_v19 = vld [vmem:[%s11019_s26 + $0xf8] sm:$0xff] }
 0x1bd   : > { %8672 = vmatprep.mubr.f32.mxu0 %v2311_v4  ;;  %9907 = vmatpush3.bf16.msra.mxu0 %v9904_v47  ;;  %v6999_v47 = vld [vmem:[%s13376_s1 + $0x408] sm:$0xff]  ;;  %v2320_v7 = vmax.f32 %v6887_v19, 0.0  ;;  %v7001_v19 = vld [vmem:[%s13376_s1 + $0x418] sm:$0xff] }
 0x1be   : > { %9909 = vmatprep.subr.bf16.mxu0 %v9908_v41  ;;  %v6888_v4 = vld [vmem:[%s11019_s26 + $0x108] sm:$0xff]  ;;  %v9924_v18 = vpack.c.bf16 %v6999_v47, %v6998_v34  ;;  %v6901_v34 = vld [vmem:[%s11019_s26 + $0x1a0] sm:$0xff]  ;;  %v13595_v47 = vmax.f32 %v11710_v6, 0.0 }
 0x1bf   : > { %v7016_v6 = vld [vmem:[%s13378_s3 + $0x88] sm:$0xff] }
 0x1c0   : > { %8673 = vmatmul.mubr.f32.gmra.mrb[8].mxu0 %v2312_v5  ;;  %v2322_v5 = vmax.f32 %v6889_v20, 0.0  ;;  %v7018_v20 = vld [vmem:[%s13378_s3 + $0x98] sm:$0xff] }
 0x1c1   : > { %8675 = vmatprep.mubr.f32.mxu0 %v2313_v59  ;;  %9911 = vmatpush3.bf16.msra.mxu0 %v9908_v41  ;;  %v2321_v41 = vmax.f32 %v6888_v4, 0.0  ;;  %v2323_v59 = vmax.f32 %v6890_v11, 0.0  ;;  %v7017_v4 = vld [vmem:[%s13378_s3 + $0x90] sm:$0xff] }
 0x1c2   : > { %9913 = vmatprep.subr.bf16.mxu0 %v9912_v23 }
 0x1c4   : > { %8676 = vmatmul.mubr.f32.gmra.mrb[10].mxu0 %v2314_v48  ;;  %v6894_v48 = vld [vmem:[%s11019_s26 + $0x150] sm:$0xff] }
 0x1c5   : > { %8678 = vmatprep.mubr.f32.mxu0 %v2315_v40  ;;  %9915 = vmatpush3.bf16.msra.mxu0 %v9912_v23  ;;  %v2324_v23 = vmax.f32 %v6891_v8, 0.0  ;;  %v2326_v40 = vmax.f32 %v6893_v12, 0.0  ;;  %v2327_v44 = vmax.f32 %v6894_v48, 0.0  ;;  %v7003_v8 = vld [vmem:[%s13376_s1 + $0x428] sm:$0xff]  ;;  %v7004_v48 = vld [vmem:[%s13376_s1 + $0x430] sm:$0xff] }
 0x1c6   : > { %9917 = vmatprep.subr.bf16.mxu0 %v9916_v46 }
 0x1c8   : > { %8679 = vmatmul.mubr.f32.gmra.mrb[12].mxu0 %v2316_v21  ;;  %v6897_v21 = vld [vmem:[%s11019_s26 + $0x170] sm:$0xff] }
 0x1c9   : > { %8681 = vmatprep.mubr.f32.mxu0 %v2317_v36  ;;  %9919 = vmatpush3.bf16.msra.mxu0 %v9916_v46  ;;  %v6896_v46 = vld [vmem:[%s11019_s26 + $0x168] sm:$0xff]  ;;  %v2330_v36 = vmax.f32 %v6897_v21, 0.0 }
 0x1ca   : > { %9921 = vmatprep.subr.bf16.mxu0 %v9920_v63  ;;  %v2329_v17 = vmax.f32 %v6896_v46, 0.0  ;;  %v7007_v21 = vld [vmem:[%s13376_s1 + $0x448] sm:$0xff] }
 0x1cc   : > { %8682 = vmatmul.mubr.f32.gmra.mrb[14].mxu0 %v2318_v15  ;;  %v2334_v15 = vmax.f32 %v6901_v34, 0.0 }
 0x1cd   : > { %8684 = vmatprep.mubr.f32.mxu0 %v2319_v55  ;;  %9923 = vmatpush3.bf16.msra.mxu0 %v9920_v63  ;;  %v2333_v63 = vmax.f32 %v6900_v57, 0.0  ;;  %v7000_v55 = vld [vmem:[%s13376_s1 + $0x410] sm:$0xff]  ;;  %v13602_v57 = vmax.f32 %v11769_v3, 0.0  ;;  %v7026_v3 = vld [vmem:[%s13378_s3 + $0xd8] sm:$0xff] }
 0x1ce   : > { %9925 = vmatprep.subr.bf16.mxu0 %v9924_v18  ;;  %v9928_v11 = vpack.c.bf16 %v7001_v19, %v7000_v55  ;;  %v13604_v55 = vmax.f32 %v11787_v50, 0.0  ;;  %v13606_v50 = vmax.f32 %v11805_v25, 0.0 }
 0x1d0   : > { %8685 = vmatmul.mubr.f32.gmra.mrb[16].mxu0 %v2320_v7  ;;  %v13596_v7 = vmax.f32 %v11720_v10, 0.0  ;;  %v7019_v10 = vld [vmem:[%s13378_s3 + $0xa0] sm:$0xff] }
 0x1d1   : > { %8687 = vmatprep.mubr.f32.mxu0 %v2321_v41  ;;  %v9956_v41 = vpack.c.bf16 %v7016_v6, %v7015_v51  ;;  %v7010_v6 = vld [vmem:[%s13376_s1 + $0x460] sm:$0xff] }
 0x1d3   : > { %9957 = vmatprep.subr.bf16.mxu1 %v9956_v41 }
 0x1d4   : > { %8688 = vmatmul.mubr.f32.gmra.mrb[18].mxu0 %v2322_v5  ;;  %v7002_v5 = vld [vmem:[%s13376_s1 + $0x420] sm:$0xff]  ;;  %9959 = vmatpush3.bf16.msra.mxu1 %v9956_v41  ;;  %v7012_v41 = vld [vmem:[%s13376_s1 + $0x470] sm:$0xff] }
 0x1d5   : > { %8690 = vmatprep.mubr.f32.mxu0 %v2323_v59  ;;  %v9960_v59 = vpack.c.bf16 %v7018_v20, %v7017_v4  ;;  %v9932_v12 = vpack.c.bf16 %v7003_v8, %v7002_v5  ;;  %v7011_v4 = vld [vmem:[%s13376_s1 + $0x468] sm:$0xff]  ;;  %v7013_v20 = vld [vmem:[%s13376_s1 + $0x478] sm:$0xff]  ;;  %v13609_v5 = vmax.f32 %v11838_v22, 0.0  ;;  %v13611_v8 = vmax.f32 %v11856_v1, 0.0 }
 0x1d6   : > { %v9952_v25 = vpack.c.bf16 %v7013_v20, %v7012_v41  ;;  %v13614_v22 = vmax.f32 %v11871_v60, 0.0  ;;  %v13617_v1 = vmax.f32 %v11892_v42, 0.0  ;;  %v13620_v60 = vmax.f32 %v11907_v26, 0.0  ;;  %v13623_v42 = vld [vmem:[#allocation9_spill] sm:$0xff] }
 0x1d7   : > { %9961 = vmatprep.subr.bf16.mxu1 %v9960_v59  ;;  %v13627_v26 = vmax.f32 %v11940_v29, 0.0 }
 0x1d8   : > { %8691 = vmatmul.mubr.f32.gmra.mrb[20].mxu0 %v2324_v23  ;;  %v13597_v23 = vmax.f32 %v11732_v54, 0.0  ;;  %v7021_v54 = vld [vmem:[%s13378_s3 + $0xb0] sm:$0xff]  ;;  %9963 = vmatpush3.bf16.msra.mxu1 %v9960_v59  ;;  %v13610_v59 = vmax.f32 %v11841_v53, 0.0  ;;  %v13615_v53 = vmax.f32 %v11880_v9, 0.0  ;;  %v13621_v9 = vmax.f32 %v11916_v31, 0.0 }
 0x1d9   : > { %8693 = vmatprep.mubr.f32.mxu0 %v2325_v39  ;;  %v13598_v39 = vmax.f32 %v11735_v16, 0.0  ;;  %v7022_v16 = vld [vmem:[%s13378_s3 + $0xb8] sm:$0xff] }
 0x1dc   : > { %8694 = vmatmul.mubr.f32.gmra.mrb[22].mxu0 %v2326_v40  ;;  %v9964_v40 = vpack.c.bf16 %v7020_v52, %v7019_v10  ;;  %v13616_v10 = vmax.f32 %v11883_v28, 0.0  ;;  %v13622_v28 = vmax.f32 %v11919_v37, 0.0  ;;  %v6948_v52 = vld [vmem:[%s11019_s26 + $0x199] sm:$0xff] }
 0x1dd   : > { %8696 = vmatprep.mubr.f32.mxu0 %v2327_v44  ;;  %v7005_v44 = vld [vmem:[%s13376_s1 + $0x438] sm:$0xff] }
 0x1de   : > { %v9936_v46 = vpack.c.bf16 %v7005_v44, %v7004_v48  ;;  %9965 = vmatprep.subr.bf16.mxu1 %v9964_v40  ;;  %v6966_v48 = vld [vmem:[%s11019_s26 + $0x32] sm:$0xff]  ;;  %v6968_v44 = vld [vmem:[%s11019_s26 + $0x4a] sm:$0xff] }
 0x1df   : > { %9967 = vmatpush3.bf16.msra.mxu1 %v9964_v40  ;;  %v2979_v37 = vmax.f32 %v6966_v48, 0.0  ;;  %v6967_v40 = vld [vmem:[%s11019_s26 + $0x3a] sm:$0xff]  ;;  %v6997_v48 = vld [vmem:[%s11019_s26 + $0x1a2] sm:$0xff] }
 0x1e0   : > { %8697 = vmatmul.mubr.f32.gmra.mrb[24].mxu0 %v2328_v62  ;;  %v7006_v62 = vld [vmem:[%s13376_s1 + $0x440] sm:$0xff] }
 0x1e1   : > { %8699 = vmatprep.mubr.f32.mxu0 %v2329_v17  ;;  %v9968_v17 = vpack.c.bf16 %v7022_v16, %v7021_v54  ;;  %v2980_v54 = vmax.f32 %v6967_v40, 0.0  ;;  %v2981_v16 = vmax.f32 %v6968_v44, 0.0  ;;  %v3493_v44 = vld [vmem:[%s13378_s3] sm:$0xff] }
 0x1e3   : > { %9969 = vmatprep.subr.bf16.mxu1 %v9968_v17 }
 0x1e4   : > { %8700 = vmatmul.mubr.f32.gmra.mrb[26].mxu0 %v2330_v36  ;;  %v13601_v36 = vmax.f32 %v11766_v2, 0.0  ;;  %v7025_v2 = vld [vmem:[%s13378_s3 + $0xd0] sm:$0xff]  ;;  %9971 = vmatpush3.bf16.msra.mxu1 %v9968_v17  ;;  %v6972_v17 = vld [vmem:[%s11019_s26 + $0x7a] sm:$0xff] }
 0x1e5   : > { %8702 = vmatprep.mubr.f32.mxu0 %v13594_v35  ;;  %v9940_v35 = vpack.c.bf16 %v7007_v21, %v7006_v62  ;;  %v9976_v51 = vpack.c.bf16 %v7026_v3, %v7025_v2  ;;  %v6971_v62 = vld [vmem:[%s11019_s26 + $0x6a] sm:$0xff]  ;;  %v6977_v3 = vld [vmem:[%s11019_s26 + $0xb2] sm:$0xff] }
 0x1e6   : > { %v2984_v21 = vmax.f32 %v6971_v62, 0.0  ;;  %v3498_v62 = vld [vmem:[%s13378_s3 + $0x28] sm:$0xff] }
 0x1e8   : > { %8703 = vmatmul.mubr.f32.gmra.mrb[28].mxu0 %v13595_v47  ;;  %v7009_v47 = vld [vmem:[%s13376_s1 + $0x458] sm:$0xff] }
 0x1e9   : > { %8705 = vmatprep.mubr.f32.mxu0 %v2333_v63  ;;  %v7008_v63 = vld [vmem:[%s13376_s1 + $0x450] sm:$0xff] }
 0x1ea   : > { %v9944_v19 = vpack.c.bf16 %v7009_v47, %v7008_v63  ;;  %v6975_v63 = vld [vmem:[%s11019_s26 + $0x9a] sm:$0xff] }
 0x1eb   : > { %v2988_v47 = vmax.f32 %v6975_v63, 0.0  ;;  %v3503_v63 = vld [vmem:[%s13378_s3 + $0x50] sm:$0xff] }
 0x1ec   : > { %8706 = vmatmul.mubr.f32.gmra.mrb[30].mxu0 %v2334_v15  ;;  %v13603_v15 = vmax.f32 %v11784_v49, 0.0  ;;  %v13605_v49 = vmax.f32 %v11802_v13, 0.0  ;;  %v13608_v13 = vmax.f32 %v11823_v14, 0.0  ;;  %v13613_v14 = vmax.f32 %v11868_v33, 0.0 }
 0x1ed   : > { %8740 = vmatprep.mubr.f32.mxu0 %v13596_v7  ;;  %v9948_v7 = vpack.c.bf16 %v7011_v4, %v7010_v6  ;;  %v13619_v33 = vmax.f32 %v11904_v45, 0.0  ;;  %v2671_v45 = vmax.f32 %v6948_v52, 0.0  ;;  %v6980_v6 = vld [vmem:[%s11019_s26 + $0xda] sm:$0xff]  ;;  %v6992_v52 = vld [vmem:[%s11019_s26 + $0x16a] sm:$0xff] }
 0x1f0   : > { %8741 = vmatmul.mubr.f32.vlgmr.msra.gmra.mrb[0].mxu0 %v13597_v23  ;;  %v13624_v23 = vmax.f32 %v13623_v42, 0.0 }
 0x1f1   : > { %8743 = vmatprep.mubr.f32.mxu0 %v13598_v39  ;;  %9927 = vmatpush3.bf16.msra.mxu0 %v9924_v18  ;;  %v13599_v18 = vmax.f32 %v11748_v24, 0.0  ;;  %v7023_v24 = vld [vmem:[%s13378_s3 + $0xc0] sm:$0xff] }
 0x1f2   : > { %9929 = vmatprep.subr.bf16.mxu0 %v9928_v11  ;;  %v9972_v34 = vpack.c.bf16 %v7024_v58, %v7023_v24  ;;  %v2985_v24 = vmax.f32 %v6972_v17, 0.0  ;;  %v6973_v58 = vld [vmem:[%s11019_s26 + $0x82] sm:$0xff] }
 0x1f4   : > { %8744 = vmatmul.mubr.f32.gmra.mrb[2].mxu0 %v13599_v18  ;;  %9973 = vmatprep.subr.bf16.mxu1 %v9972_v34  ;;  %v6969_v18 = vld [vmem:[%s11019_s26 + $0x52] sm:$0xff] }
 0x1f5   : > { %8746 = vmatprep.mubr.f32.mxu0 %v13600_v43  ;;  %9931 = vmatpush3.bf16.msra.mxu0 %v9928_v11  ;;  %v13607_v11 = vmax.f32 %v11820_v0, 0.0  ;;  %v13612_v0 = vmax.f32 %v11859_v30, 0.0  ;;  %v13618_v30 = vmax.f32 %v11895_v38, 0.0  ;;  %v13625_v38 = vld [vmem:[#allocation10_spill] sm:$0xff]  ;;  %v6970_v43 = vld [vmem:[%s11019_s26 + $0x62] sm:$0xff] }
 0x1f6   : > { %9933 = vmatprep.subr.bf16.mxu0 %v9932_v12  ;;  %9975 = vmatpush3.bf16.msra.mxu1 %v9972_v34  ;;  %v13626_v39 = vmax.f32 %v13625_v38, 0.0  ;;  %v2983_v29 = vmax.f32 %v6970_v43, 0.0  ;;  %v6976_v34 = vld [vmem:[%s11019_s26 + $0xaa] sm:$0xff]  ;;  %v6993_v38 = vld [vmem:[%s11019_s26 + $0x172] sm:$0xff] }
 0x1f7   : > { %9977 = vmatprep.subr.bf16.mxu1 %v9976_v51  ;;  %v2989_v2 = vmax.f32 %v6976_v34, 0.0  ;;  %v3496_v43 = vld [vmem:[%s13378_s3 + $0x18] sm:$0xff] }
 0x1f8   : > { %8747 = vmatmul.mubr.f32.gmra.mrb[4].mxu0 %v13601_v36  ;;  %v6974_v36 = vld [vmem:[%s11019_s26 + $0x92] sm:$0xff] }
 0x1f9   : > { %8749 = vmatprep.mubr.f32.mxu0 %v13602_v57  ;;  %9935 = vmatpush3.bf16.msra.mxu0 %v9932_v12  ;;  %v6949_v12 = vld [vmem:[%s11019_s26 + $0x1a1] sm:$0xff]  ;;  %v2986_v57 = vmax.f32 %v6973_v58, 0.0  ;;  %v3504_v34 = vld [vmem:[%s13378_s3 + $0x58] sm:$0xff] }
 0x1fa   : > { %9937 = vmatprep.subr.bf16.mxu0 %v9936_v46  ;;  %9979 = vmatpush3.bf16.msra.mxu1 %v9976_v51  ;;  %v2672_v31 = vmax.f32 %v6949_v12, 0.0  ;;  %v6979_v51 = vld [vmem:[%s11019_s26 + $0xca] sm:$0xff] }
 0x1fb   : > { %v2992_v4 = vmax.f32 %v6979_v51, 0.0 }
 0x1fc   : > { %8750 = vmatmul.mubr.f32.gmra.mrb[6].mxu0 %v13603_v15  ;;  %v6978_v15 = vld [vmem:[%s11019_s26 + $0xc2] sm:$0xff] }
 0x1fd   : > { %8752 = vmatprep.mubr.f32.mxu0 %v13604_v55  ;;  %9939 = vmatpush3.bf16.msra.mxu0 %v9936_v46  ;;  %v2982_v46 = vmax.f32 %v6969_v18, 0.0  ;;  %v2990_v55 = vmax.f32 %v6977_v3, 0.0  ;;  %v3495_v18 = vld [vmem:[%s13378_s3 + $0x10] sm:$0xff]  ;;  %v3506_v3 = vld [vmem:[%s13378_s3 + $0x68] sm:$0xff] }
 0x1fe   : > { %9941 = vmatprep.subr.bf16.mxu0 %v9940_v35 }
 0x200   : > { %8753 = vmatmul.mubr.f32.gmra.mrb[8].mxu0 %v13605_v49  ;;  %v2993_v49 = vmax.f32 %v6980_v6, 0.0  ;;  %v7031_v6 = vld [vmem:[%s13378_s3 + $0x100] sm:$0xff] }
 0x201   : > { %8755 = vmatprep.mubr.f32.mxu0 %v13606_v50  ;;  %9943 = vmatpush3.bf16.msra.mxu0 %v9940_v35  ;;  %v2987_v35 = vmax.f32 %v6974_v36, 0.0  ;;  %v6981_v50 = vld [vmem:[%s11019_s26 + $0xe2] sm:$0xff] }
 0x202   : > { %9945 = vmatprep.subr.bf16.mxu0 %v9944_v19  ;;  %v2994_v41 = vmax.f32 %v6981_v50, 0.0  ;;  %v3501_v36 = vld [vmem:[%s13378_s3 + $0x40] sm:$0xff] }
 0x203   : > { %v12397_v50 = vld [vmem:[%s13377_s2] ss:$0 sm:$0xff] }
 0x204   : > { %8756 = vmatmul.mubr.f32.gmra.mrb[10].mxu0 %v13607_v11  ;;  %v6983_v11 = vld [vmem:[%s11019_s26 + $0xfa] sm:$0xff] }
 0x205   : > { %8758 = vmatprep.mubr.f32.mxu0 %v13608_v13  ;;  %9947 = vmatpush3.bf16.msra.mxu0 %v9944_v19  ;;  %v2991_v19 = vmax.f32 %v6978_v15, 0.0  ;;  %v6984_v13 = vld [vmem:[%s11019_s26 + $0x10a] sm:$0xff] }
 0x206   : > { %9949 = vmatprep.subr.bf16.mxu0 %v9948_v7 }
 0x208   : > { %8759 = vmatmul.mubr.f32.gmra.mrb[12].mxu0 %v13609_v5  ;;  %v2997_v5 = vmax.f32 %v6984_v13, 0.0 }
 0x209   : > { %8761 = vmatprep.mubr.f32.mxu0 %v13610_v59  ;;  %9951 = vmatpush3.bf16.msra.mxu0 %v9948_v7  ;;  %v6982_v7 = vld [vmem:[%s11019_s26 + $0xf2] sm:$0xff] }
 0x20a   : > { %9953 = vmatprep.subr.bf16.mxu0 %v9952_v25  ;;  %v2995_v20 = vmax.f32 %v6982_v7, 0.0  ;;  %v6985_v59 = vld [vmem:[%s11019_s26 + $0x112] sm:$0xff] }
 0x20c   : > { %8762 = vmatmul.mubr.f32.gmra.mrb[14].mxu0 %v13611_v8  ;;  %v6986_v8 = vld [vmem:[%s11019_s26 + $0x122] sm:$0xff] }
 0x20d   : > { %8764 = vmatprep.mubr.f32.mxu0 %v13612_v0  ;;  %9955 = vmatpush3.bf16.msra.mxu0 %v9952_v25  ;;  %v2996_v25 = vmax.f32 %v6983_v11, 0.0  ;;  %v2998_v0 = vmax.f32 %v6985_v59, 0.0 }
 0x210   : > { %8765 = vmatmul.mubr.f32.gmra.mrb[16].mxu0 %v13613_v14  ;;  %v2999_v14 = vmax.f32 %v6986_v8, 0.0 }
 0x211   : > { %8767 = vmatprep.mubr.f32.mxu0 %v13614_v22  ;;  %v6987_v22 = vld [vmem:[%s11019_s26 + $0x12a] sm:$0xff] }
 0x214   : > { %8768 = vmatmul.mubr.f32.gmra.mrb[18].mxu0 %v13615_v53  ;;  %v6988_v53 = vld [vmem:[%s11019_s26 + $0x13a] sm:$0xff] }
 0x215   : > { %8770 = vmatprep.mubr.f32.mxu0 %v13616_v10  ;;  %v3000_v10 = vmax.f32 %v6987_v22, 0.0 }
 0x218   : > { %8771 = vmatmul.mubr.f32.gmra.mrb[20].mxu0 %v13617_v1  ;;  %v3001_v1 = vmax.f32 %v6988_v53, 0.0 }
 0x219   : > { %8773 = vmatprep.mubr.f32.mxu0 %v13618_v30  ;;  %v6989_v30 = vld [vmem:[%s11019_s26 + $0x142] sm:$0xff] }
 0x21c   : > { %8774 = vmatmul.mubr.f32.gmra.mrb[22].mxu0 %v13619_v33  ;;  %v6990_v33 = vld [vmem:[%s11019_s26 + $0x152] sm:$0xff] }
 0x21d   : > { %8776 = vmatprep.mubr.f32.mxu0 %v13620_v60  ;;  %v3002_v60 = vmax.f32 %v6989_v30, 0.0 }
 0x220   : > { %8777 = vmatmul.mubr.f32.gmra.mrb[24].mxu0 %v13621_v9  ;;  %v3003_v9 = vmax.f32 %v6990_v33, 0.0 }
 0x221   : > { %8779 = vmatprep.mubr.f32.mxu0 %v13622_v28  ;;  %v6991_v28 = vld [vmem:[%s11019_s26 + $0x15a] sm:$0xff] }
 0x222   : > { %v3004_v42 = vmax.f32 %v6991_v28, 0.0 }
 0x224   : > { %8780 = vmatmul.mubr.f32.gmra.mrb[26].mxu0 %v13624_v23  ;;  %v3005_v23 = vmax.f32 %v6992_v52, 0.0 }
 0x225   : > { %8782 = vmatprep.mubr.f32.mxu0 %v13626_v39  ;;  %v3006_v39 = vmax.f32 %v6993_v38, 0.0 }
 0x228   : > { %8783 = vmatmul.mubr.f32.gmra.mrb[28].mxu0 %v13627_v26  ;;  %v3010_v26 = vmax.f32 %v6997_v48, 0.0 }
 0x229   : > { %8785 = vmatprep.mubr.f32.mxu0 %v2671_v45  ;;  %v6996_v45 = vld [vmem:[%s11019_s26 + $0x19a] sm:$0xff] }
 0x22a   : > { %v3009_v12 = vmax.f32 %v6996_v45, 0.0 }
 0x22c   : > { %8786 = vmatmul.mubr.f32.gmra.mrb[30].mxu0 %v2672_v31  ;;  %v7027_v31 = vld [vmem:[%s13378_s3 + $0xe0] sm:$0xff] }
 0x22d   : > { %8820 = vmatprep.mubr.f32.mxu0 %v2979_v37  ;;  %v7028_v37 = vld [vmem:[%s13378_s3 + $0xe8] sm:$0xff] }
 0x22e   : > { %v9980_v40 = vpack.c.bf16 %v7028_v37, %v7027_v31 }
 0x230   : > { %8821 = vmatmul.mubr.f32.vlgmr.msra.gmra.mrb[0].mxu0 %v2980_v54  ;;  %9981 = vmatprep.subr.bf16.mxu1 %v9980_v40  ;;  %v3494_v54 = vld [vmem:[%s13378_s3 + $0x8] sm:$0xff] }
 0x231   : > { %8823 = vmatprep.mubr.f32.mxu0 %v2981_v16  ;;  %9983 = vmatpush3.bf16.msra.mxu1 %v9980_v40  ;;  %v9988_v16 = vpack.c.bf16 %v3494_v54, %v3493_v44 }
 0x234   : > { %8824 = vmatmul.mubr.f32.gmra.mrb[2].mxu0 %v2982_v46  ;;  %v9992_v46 = vpack.c.bf16 %v3496_v43, %v3495_v18 }
 0x235   : > { %8826 = vmatprep.mubr.f32.mxu0 %v2983_v29  ;;  %v3497_v29 = vld [vmem:[%s13378_s3 + $0x20] sm:$0xff] }
 0x236   : > { %v9996_v17 = vpack.c.bf16 %v3498_v62, %v3497_v29 }
 0x238   : > { %8827 = vmatmul.mubr.f32.gmra.mrb[4].mxu0 %v2984_v21  ;;  %v3499_v21 = vld [vmem:[%s13378_s3 + $0x30] sm:$0xff] }
 0x239   : > { %8829 = vmatprep.mubr.f32.mxu0 %v2985_v24  ;;  %v3500_v24 = vld [vmem:[%s13378_s3 + $0x38] sm:$0xff] }
 0x23a   : > { %v10000_v58 = vpack.c.bf16 %v3500_v24, %v3499_v21 }
 0x23c   : > { %8830 = vmatmul.mubr.f32.gmra.mrb[6].mxu0 %v2986_v57  ;;  %v3502_v57 = vld [vmem:[%s13378_s3 + $0x48] sm:$0xff] }
 0x23d   : > { %8832 = vmatprep.mubr.f32.mxu0 %v2987_v35  ;;  %v10004_v35 = vpack.c.bf16 %v3502_v57, %v3501_v36 }
 0x240   : > { %8833 = vmatmul.mubr.f32.gmra.mrb[8].mxu0 %v2988_v47  ;;  %v10008_v47 = vpack.c.bf16 %v3504_v34, %v3503_v63 }
 0x241   : > { %8835 = vmatprep.mubr.f32.mxu0 %v2989_v2  ;;  %v3505_v2 = vld [vmem:[%s13378_s3 + $0x60] sm:$0xff] }
 0x242   : > { %v10012_v15 = vpack.c.bf16 %v3506_v3, %v3505_v2 }
 0x244   : > { %8836 = vmatmul.mubr.f32.gmra.mrb[10].mxu0 %v2990_v55  ;;  %v3507_v55 = vld [vmem:[%s13378_s3 + $0x70] sm:$0xff] }
 0x245   : > { %8838 = vmatprep.mubr.f32.mxu0 %v2991_v19  ;;  %v3508_v19 = vld [vmem:[%s13378_s3 + $0x78] sm:$0xff] }
 0x246   : > { %v10016_v51 = vpack.c.bf16 %v3508_v19, %v3507_v55 }
 0x248   : > { %8839 = vmatmul.mubr.f32.gmra.mrb[12].mxu0 %v2992_v4  ;;  %v7032_v4 = vld [vmem:[%s13378_s3 + $0x108] sm:$0xff] }
 0x249   : > { %8841 = vmatprep.mubr.f32.mxu0 %v2993_v49  ;;  %v12391_v49 = vpack.c.bf16 %v7032_v4, %v7031_v6 }
 0x24c   : > { %8842 = vmatmul.mubr.f32.gmra.mrb[14].mxu0 %v2994_v41 }
 0x24d   : > { %8844 = vmatprep.mubr.f32.mxu0 %v2995_v20 }
 0x250   : > { %8845 = vmatmul.mubr.f32.gmra.mrb[16].mxu0 %v2996_v25 }
 0x251   : > { %8847 = vmatprep.mubr.f32.mxu0 %v2997_v5 }
 0x254   : > { %8848 = vmatmul.mubr.f32.gmra.mrb[18].mxu0 %v2998_v0 }
 0x255   : > { %8850 = vmatprep.mubr.f32.mxu0 %v2999_v14 }
 0x258   : > { %8851 = vmatmul.mubr.f32.gmra.mrb[20].mxu0 %v3000_v10 }
 0x259   : > { %8853 = vmatprep.mubr.f32.mxu0 %v3001_v1 }
 0x25c   : > { %8854 = vmatmul.mubr.f32.gmra.mrb[22].mxu0 %v3002_v60 }
 0x25d   : > { %8856 = vmatprep.mubr.f32.mxu0 %v3003_v9 }
 0x260   : > { %8857 = vmatmul.mubr.f32.gmra.mrb[24].mxu0 %v3004_v42 }
 0x261   : > { %8859 = vmatprep.mubr.f32.mxu0 %v3005_v23 }
 0x264   : > { %8860 = vmatmul.mubr.f32.gmra.mrb[26].mxu0 %v3006_v39 }
 0x265   : > { %8862 = vmatprep.mubr.f32.mxu0 %v1994_v27  ;;  %v7030_v27 = vld [vmem:[%s13378_s3 + $0xf8] sm:$0xff] }
 0x266   : > { %v9984_v56 = vpack.c.bf16 %v7030_v27, %v7029_v61 }
 0x268   : > { %8863 = vmatmul.mubr.f32.gmra.mrb[28].mxu0 %v1995_v32  ;;  %9985 = vmatprep.subr.bf16.mxu1 %v9984_v56  ;;  %v10935_v32 = vmov 0.0  }
 0x269   : > { %8865 = vmatprep.mubr.f32.mxu0 %v3009_v12  ;;  %9987 = vmatpush3.bf16.msra.mxu1 %v9984_v56  ;;  %3324 = vst [vmem:[#allocation2] sm:$0xff] %v10935_v32  ;;  %3325 = vst [vmem:[#allocation2 + $0x8] sm:$0xff] %v10935_v32 }
 0x26a   : > { %3326 = vst [vmem:[#allocation2 + $0x10] sm:$0xff] %v10935_v32  ;;  %3327 = vst [vmem:[#allocation2 + $0x18] sm:$0xff] %v10935_v32  ;;  %8900 = vmatprep.mubr.f32.mxu1 %v10935_v32  ;;  %9989 = vmatprep.subr.bf16.mxu1 %v9988_v16 }
 0x26b   : > { %3328 = vst [vmem:[#allocation2 + $0x20] sm:$0xff] %v10935_v32  ;;  %3331 = vst [vmem:[#allocation2 + $0x38] sm:$0xff] %v10935_v32 }
 0x26c   : > { %8866 = vmatmul.mubr.f32.gmra.mrb[30].mxu0 %v3010_v26  ;;  %3332 = vst [vmem:[#allocation2 + $0x40] sm:$0xff] %v10935_v32  ;;  %3335 = vst [vmem:[#allocation2 + $0x58] sm:$0xff] %v10935_v32  ;;  %8901 = vmatmul.mubr.f32.vlgmr.msra.gmra.mrb[0].mxu1 %v10935_v32 }
 0x26d   : > { %3336 = vst [vmem:[#allocation2 + $0x60] sm:$0xff] %v10935_v32  ;;  %3339 = vst [vmem:[#allocation2 + $0x78] sm:$0xff] %v10935_v32  ;;  %9991 = vmatpush3.bf16.msra.mxu1 %v9988_v16 }
 0x26e   : > { %3340 = vst [vmem:[#allocation2 + $0x80] sm:$0xff] %v10935_v32  ;;  %3343 = vst [vmem:[#allocation2 + $0x98] sm:$0xff] %v10935_v32  ;;  %9993 = vmatprep.subr.bf16.mxu1 %v9992_v46 }
 0x26f   : > { %3344 = vst [vmem:[#allocation2 + $0xa0] sm:$0xff] %v10935_v32  ;;  %3347 = vst [vmem:[#allocation2 + $0xb8] sm:$0xff] %v10935_v32 }
 0x270   : > { %3348 = vst [vmem:[#allocation2 + $0xc0] sm:$0xff] %v10935_v32  ;;  %3351 = vst [vmem:[#allocation2 + $0xd8] sm:$0xff] %v10935_v32 }
 0x271   : > { %3352 = vst [vmem:[#allocation2 + $0xe0] sm:$0xff] %v10935_v32  ;;  %3355 = vst [vmem:[#allocation2 + $0xf8] sm:$0xff] %v10935_v32  ;;  %9995 = vmatpush3.bf16.msra.mxu1 %v9992_v46 }
 0x272   : > { %3356 = vst [vmem:[#allocation2 + $0x100] sm:$0xff] %v10935_v32  ;;  %3359 = vst [vmem:[#allocation2 + $0x118] sm:$0xff] %v10935_v32  ;;  %9997 = vmatprep.subr.bf16.mxu1 %v9996_v17 }
 0x273   : > { %3360 = vst [vmem:[#allocation2 + $0x120] sm:$0xff] %v10935_v32  ;;  %3363 = vst [vmem:[#allocation2 + $0x138] sm:$0xff] %v10935_v32 }
 0x274   : > { %3364 = vst [vmem:[#allocation2 + $0x140] sm:$0xff] %v10935_v32  ;;  %3367 = vst [vmem:[#allocation2 + $0x158] sm:$0xff] %v10935_v32 }
 0x275   : > { %3368 = vst [vmem:[#allocation2 + $0x160] sm:$0xff] %v10935_v32  ;;  %3371 = vst [vmem:[#allocation2 + $0x178] sm:$0xff] %v10935_v32  ;;  %9999 = vmatpush3.bf16.msra.mxu1 %v9996_v17 }
 0x276   : > { %3372 = vst [vmem:[#allocation2 + $0x180] sm:$0xff] %v10935_v32  ;;  %3375 = vst [vmem:[#allocation2 + $0x198] sm:$0xff] %v10935_v32  ;;  %10001 = vmatprep.subr.bf16.mxu1 %v10000_v58 }
 0x277   : > { %3376 = vst [vmem:[#allocation2 + $0x1a0] sm:$0xff] %v10935_v32  ;;  %3379 = vst [vmem:[#allocation2 + $0x1b8] sm:$0xff] %v10935_v32 }
 0x278   : > { %3380 = vst [vmem:[#allocation2 + $0x1c0] sm:$0xff] %v10935_v32  ;;  %3383 = vst [vmem:[#allocation2 + $0x1d8] sm:$0xff] %v10935_v32 }
 0x279   : > { %3384 = vst [vmem:[#allocation2 + $0x1e0] sm:$0xff] %v10935_v32  ;;  %3387 = vst [vmem:[#allocation2 + $0x1f8] sm:$0xff] %v10935_v32  ;;  %10003 = vmatpush3.bf16.msra.mxu1 %v10000_v58 }
 0x27a   : > { %3388 = vst [vmem:[#allocation2 + $0x200] sm:$0xff] %v10935_v32  ;;  %3391 = vst [vmem:[#allocation2 + $0x218] sm:$0xff] %v10935_v32  ;;  %10005 = vmatprep.subr.bf16.mxu1 %v10004_v35 }
 0x27b   : > { %3392 = vst [vmem:[#allocation2 + $0x220] sm:$0xff] %v10935_v32  ;;  %3393 = vst [vmem:[#allocation2 + $0x228] sm:$0xff] %v10935_v32 }
 0x27c   : > { %3394 = vst [vmem:[#allocation2 + $0x230] sm:$0xff] %v10935_v32  ;;  %3395 = vst [vmem:[#allocation2 + $0x238] sm:$0xff] %v10935_v32 }
 0x27d   : > { %10007 = vmatpush3.bf16.msra.mxu1 %v10004_v35 }
 0x27e   : > { %10009 = vmatprep.subr.bf16.mxu1 %v10008_v47 }
 0x281   : > { %10011 = vmatpush3.bf16.msra.mxu1 %v10008_v47 }
 0x282   : > { %10013 = vmatprep.subr.bf16.mxu1 %v10012_v15 }
 0x285   : > { %10015 = vmatpush3.bf16.msra.mxu1 %v10012_v15 }
 0x286   : > { %10017 = vmatprep.subr.bf16.mxu1 %v10016_v51 }
 0x289   : > { %10019 = vmatpush3.bf16.msra.mxu1 %v10016_v51 }
 0x28a   : > { %10021 = vmatprep.subr.bf16.mxu1 %v12391_v49 }
 0x303   : > { %v8822_v7 = vpop.f32.mrb[0].mxu0 }
 0x304   : > { %v3293_v41 = vadd.f32 %v8822_v7, %v12397_v50  ;;  %v3094_v20 = vpop.f32.mrb[1].mxu0 }
 0x305   : > { %v3292_v11 = vadd.f32 %v12397_v50, %v3094_v20 }
 0x306   : > { %v3397_v13 = vmax.f32 %v3293_v41, 0.0 }
 0x307   : > { %v3396_v25 = vmax.f32 %v3292_v11, 0.0  ;;  %v8825_v5 = vpop.f32.mrb[2].mxu0 }
 0x308   : > { %3430 = vst [vmem:[#allocation2 + $0x30] sm:$0xff] %v3397_v13  ;;  %v3295_v59 = vadd.f32 %v8825_v5, %v12397_v50  ;;  %v3104_v8 = vpop.f32.mrb[3].mxu0 }
 0x309   : > { %3429 = vst [vmem:[#allocation2 + $0x28] sm:$0xff] %v3396_v25  ;;  %v3294_v0 = vadd.f32 %v12397_v50, %v3104_v8  ;;  %8903 = vmatprep.mubr.f32.mxu1 %v3396_v25 }
 0x30a   : > { %v3399_v14 = vmax.f32 %v3295_v59, 0.0  ;;  %8904 = vmatmul.mubr.f32.gmra.mrb[2].mxu1 %v3397_v13 }
 0x30b   : > { %v3398_v22 = vmax.f32 %v3294_v0, 0.0  ;;  %v8828_v53 = vpop.f32.mrb[4].mxu0 }
 0x30c   : > { %3432 = vst [vmem:[#allocation2 + $0x50] sm:$0xff] %v3399_v14  ;;  %v3297_v10 = vadd.f32 %v8828_v53, %v12397_v50  ;;  %v3114_v1 = vpop.f32.mrb[5].mxu0 }
 0x30d   : > { %3431 = vst [vmem:[#allocation2 + $0x48] sm:$0xff] %v3398_v22  ;;  %v3296_v30 = vadd.f32 %v12397_v50, %v3114_v1  ;;  %8906 = vmatprep.mubr.f32.mxu1 %v3398_v22 }
 0x30e   : > { %v3401_v33 = vmax.f32 %v3297_v10, 0.0  ;;  %8907 = vmatmul.mubr.f32.gmra.mrb[4].mxu1 %v3399_v14 }
 0x30f   : > { %v3400_v60 = vmax.f32 %v3296_v30, 0.0  ;;  %v8831_v9 = vpop.f32.mrb[6].mxu0 }
 0x310   : > { %3434 = vst [vmem:[#allocation2 + $0x70] sm:$0xff] %v3401_v33  ;;  %v3299_v28 = vadd.f32 %v8831_v9, %v12397_v50  ;;  %v3124_v52 = vpop.f32.mrb[7].mxu0 }
 0x311   : > { %3433 = vst [vmem:[#allocation2 + $0x68] sm:$0xff] %v3400_v60  ;;  %v3298_v42 = vadd.f32 %v12397_v50, %v3124_v52  ;;  %8909 = vmatprep.mubr.f32.mxu1 %v3400_v60 }
 0x312   : > { %v3403_v23 = vmax.f32 %v3299_v28, 0.0  ;;  %8910 = vmatmul.mubr.f32.gmra.mrb[6].mxu1 %v3401_v33 }
 0x313   : > { %v3402_v38 = vmax.f32 %v3298_v42, 0.0  ;;  %v8834_v39 = vpop.f32.mrb[8].mxu0 }
 0x314   : > { %3436 = vst [vmem:[#allocation2 + $0x90] sm:$0xff] %v3403_v23  ;;  %v3301_v45 = vadd.f32 %v8834_v39, %v12397_v50  ;;  %v3134_v12 = vpop.f32.mrb[9].mxu0 }
 0x315   : > { %3435 = vst [vmem:[#allocation2 + $0x88] sm:$0xff] %v3402_v38  ;;  %v3300_v48 = vadd.f32 %v12397_v50, %v3134_v12  ;;  %8912 = vmatprep.mubr.f32.mxu1 %v3402_v38 }
 0x316   : > { %v3405_v26 = vmax.f32 %v3301_v45, 0.0  ;;  %8913 = vmatmul.mubr.f32.gmra.mrb[8].mxu1 %v3403_v23 }
 0x317   : > { %v3404_v31 = vmax.f32 %v3300_v48, 0.0  ;;  %v8837_v37 = vpop.f32.mrb[10].mxu0 }
 0x318   : > { %3438 = vst [vmem:[#allocation2 + $0xb0] sm:$0xff] %v3405_v26  ;;  %v3303_v40 = vadd.f32 %v8837_v37, %v12397_v50  ;;  %v3144_v61 = vpop.f32.mrb[11].mxu0 }
 0x319   : > { %3437 = vst [vmem:[#allocation2 + $0xa8] sm:$0xff] %v3404_v31  ;;  %v3302_v27 = vadd.f32 %v12397_v50, %v3144_v61  ;;  %8915 = vmatprep.mubr.f32.mxu1 %v3404_v31 }
 0x31a   : > { %v12411_v56 = vmax.f32 %v3303_v40, 0.0  ;;  %8916 = vmatmul.mubr.f32.gmra.mrb[10].mxu1 %v3405_v26  ;;  %v3461_v40 = vld [vmem:[#allocation2 + $0x7] sm:$0xff] }
 0x31b   : > { %v12413_v32 = vmax.f32 %v3302_v27, 0.0  ;;  %v8840_v44 = vpop.f32.mrb[12].mxu0  ;;  %v7033_v27 = vld [vmem:[%s13378_s3 + $0x110] sm:$0xff] }
 0x31c   : > { %3440 = vst [vmem:[#allocation2 + $0xd0] sm:$0xff] %v12411_v56  ;;  %v3305_v54 = vadd.f32 %v8840_v44, %v12397_v50  ;;  %v3154_v16 = vpop.f32.mrb[13].mxu0  ;;  %v7034_v44 = vld [vmem:[%s13378_s3 + $0x118] sm:$0xff] }
 0x31d   : > { %3439 = vst [vmem:[#allocation2 + $0xc8] sm:$0xff] %v12413_v32  ;;  %v3304_v18 = vadd.f32 %v12397_v50, %v3154_v16  ;;  %8918 = vmatprep.mubr.f32.mxu1 %v12413_v32 }
 0x31e   : > { %v12420_v43 = vmax.f32 %v3305_v54, 0.0  ;;  %8919 = vmatmul.mubr.f32.gmra.mrb[12].mxu1 %v12411_v56 }
 0x31f   : > { %v12423_v46 = vmax.f32 %v3304_v18, 0.0  ;;  %v8843_v29 = vpop.f32.mrb[14].mxu0  ;;  %v3462_v18 = vld [vmem:[#allocation2 + $0xf] sm:$0xff] }
 0x320   : > { %3442 = vst [vmem:[#allocation2 + $0xf0] sm:$0xff] %v12420_v43  ;;  %v3307_v62 = vadd.f32 %v8843_v29, %v12397_v50  ;;  %v3164_v17 = vpop.f32.mrb[15].mxu0  ;;  %v7035_v29 = vld [vmem:[%s13378_s3 + $0x120] sm:$0xff] }
 0x321   : > { %3441 = vst [vmem:[#allocation2 + $0xe8] sm:$0xff] %v12423_v46  ;;  %v3306_v21 = vadd.f32 %v12397_v50, %v3164_v17  ;;  %8921 = vmatprep.mubr.f32.mxu1 %v12423_v46  ;;  %v12533_v17 = vld [vmem:[#allocation2 + $0x27] sm:$0xff] }
 0x322   : > { %v12430_v24 = vmax.f32 %v3307_v62, 0.0  ;;  %8922 = vmatmul.mubr.f32.gmra.mrb[14].mxu1 %v12420_v43  ;;  %v7036_v62 = vld [vmem:[%s13378_s3 + $0x128] sm:$0xff] }
 0x323   : > { %v12433_v58 = vmax.f32 %v3306_v21, 0.0  ;;  %v8846_v36 = vpop.f32.mrb[16].mxu0  ;;  %v10028_v21 = vpack.c.bf16 %v7036_v62, %v7035_v29 }
 0x324   : > { %3444 = vst [vmem:[#allocation2 + $0x110] sm:$0xff] %v12430_v24  ;;  %v3309_v57 = vadd.f32 %v8846_v36, %v12397_v50  ;;  %v3174_v35 = vpop.f32.mrb[17].mxu0  ;;  %v12537_v36 = vld [vmem:[#allocation2 + $0x2f] sm:$0xff] }
 0x325   : > { %3443 = vst [vmem:[#allocation2 + $0x108] sm:$0xff] %v12433_v58  ;;  %v3308_v63 = vadd.f32 %v12397_v50, %v3174_v35  ;;  %8924 = vmatprep.mubr.f32.mxu1 %v12433_v58  ;;  %v7038_v35 = vld [vmem:[%s13378_s3 + $0x138] sm:$0xff] }
 0x326   : > { %v12440_v34 = vmax.f32 %v3309_v57, 0.0  ;;  %8925 = vmatmul.mubr.f32.gmra.mrb[16].mxu1 %v12430_v24  ;;  %v7037_v57 = vld [vmem:[%s13378_s3 + $0x130] sm:$0xff] }
 0x327   : > { %v12443_v47 = vmax.f32 %v3308_v63, 0.0  ;;  %v8849_v2 = vpop.f32.mrb[18].mxu0  ;;  %v12546_v63 = vld [vmem:[#allocation2 + $0x47] sm:$0xff] }
 0x328   : > { %3446 = vst [vmem:[#allocation2 + $0x130] sm:$0xff] %v12440_v34  ;;  %v3311_v3 = vadd.f32 %v8849_v2, %v12397_v50  ;;  %v3184_v15 = vpop.f32.mrb[19].mxu0  ;;  %v12549_v2 = vld [vmem:[#allocation2 + $0x4f] sm:$0xff] }
 0x329   : > { %3445 = vst [vmem:[#allocation2 + $0x128] sm:$0xff] %v12443_v47  ;;  %v3310_v55 = vadd.f32 %v12397_v50, %v3184_v15  ;;  %8927 = vmatprep.mubr.f32.mxu1 %v12443_v47  ;;  %v7040_v15 = vld [vmem:[%s13378_s3 + $0x148] sm:$0xff] }
 0x32a   : > { %v12450_v19 = vmax.f32 %v3311_v3, 0.0  ;;  %8928 = vmatmul.mubr.f32.gmra.mrb[18].mxu1 %v12440_v34  ;;  %v7039_v3 = vld [vmem:[%s13378_s3 + $0x140] sm:$0xff] }
 0x32b   : > { %v12453_v51 = vmax.f32 %v3310_v55, 0.0  ;;  %v8852_v6 = vpop.f32.mrb[20].mxu0  ;;  %v12558_v55 = vld [vmem:[#allocation2 + $0x67] sm:$0xff] }
 0x32c   : > { %3448 = vst [vmem:[#allocation2 + $0x150] sm:$0xff] %v12450_v19  ;;  %v3313_v4 = vadd.f32 %v8852_v6, %v12397_v50  ;;  %v3194_v7 = vpop.f32.mrb[21].mxu0  ;;  %v10036_v6 = vpack.c.bf16 %v7040_v15, %v7039_v3 }
 0x32d   : > { %3447 = vst [vmem:[#allocation2 + $0x148] sm:$0xff] %v12453_v51  ;;  %v3312_v41 = vadd.f32 %v12397_v50, %v3194_v7  ;;  %8930 = vmatprep.mubr.f32.mxu1 %v12453_v51  ;;  %v7041_v7 = vld [vmem:[%s13378_s3 + $0x150] sm:$0xff] }
 0x32e   : > { %v12460_v20 = vmax.f32 %v3313_v4, 0.0  ;;  %8931 = vmatmul.mubr.f32.gmra.mrb[20].mxu1 %v12450_v19  ;;  %v12561_v4 = vld [vmem:[#allocation2 + $0x6f] sm:$0xff] }
 0x32f   : > { %v12463_v11 = vmax.f32 %v3312_v41, 0.0  ;;  %v8855_v13 = vpop.f32.mrb[22].mxu0  ;;  %v7042_v41 = vld [vmem:[%s13378_s3 + $0x158] sm:$0xff] }
 0x330   : > { %3450 = vst [vmem:[#allocation2 + $0x170] sm:$0xff] %v12460_v20  ;;  %v3315_v25 = vadd.f32 %v8855_v13, %v12397_v50  ;;  %v3204_v5 = vpop.f32.mrb[23].mxu0  ;;  %v12570_v13 = vld [vmem:[#allocation2 + $0x87] sm:$0xff] }
 0x331   : > { %3449 = vst [vmem:[#allocation2 + $0x168] sm:$0xff] %v12463_v11  ;;  %v3314_v59 = vadd.f32 %v12397_v50, %v3204_v5  ;;  %8933 = vmatprep.mubr.f32.mxu1 %v12463_v11  ;;  %v12573_v5 = vld [vmem:[#allocation2 + $0x8f] sm:$0xff] }
 0x332   : > { %v12470_v8 = vmax.f32 %v3315_v25, 0.0  ;;  %8934 = vmatmul.mubr.f32.gmra.mrb[22].mxu1 %v12460_v20  ;;  %v10040_v25 = vpack.c.bf16 %v7042_v41, %v7041_v7  ;;  %v4008_v41 = vld [vmem:[#allocation2 + $0x9] sm:$0xff] }
 0x333   : > { %v12473_v0 = vmax.f32 %v3314_v59, 0.0  ;;  %v8858_v14 = vpop.f32.mrb[24].mxu0  ;;  %v7043_v59 = vld [vmem:[%s13378_s3 + $0x160] sm:$0xff] }
 0x334   : > { %3452 = vst [vmem:[#allocation2 + $0x190] sm:$0xff] %v12470_v8  ;;  %v3317_v22 = vadd.f32 %v8858_v14, %v12397_v50  ;;  %v3214_v53 = vpop.f32.mrb[25].mxu0  ;;  %v7044_v14 = vld [vmem:[%s13378_s3 + $0x168] sm:$0xff] }
 0x335   : > { %3451 = vst [vmem:[#allocation2 + $0x188] sm:$0xff] %v12473_v0  ;;  %v3316_v10 = vadd.f32 %v12397_v50, %v3214_v53  ;;  %8936 = vmatprep.mubr.f32.mxu1 %v12473_v0  ;;  %v10044_v53 = vpack.c.bf16 %v7044_v14, %v7043_v59  ;;  %v12627_v29 = vld [vmem:[#allocation2 + $0x14f] sm:$0xff]  ;;  %v7050_v14 = vld [vmem:[%s13378_s3 + $0x198] sm:$0xff] }
 0x336   : > { %v12480_v1 = vmax.f32 %v3317_v22, 0.0  ;;  %8937 = vmatmul.mubr.f32.gmra.mrb[24].mxu1 %v12470_v8  ;;  %v12582_v22 = vld [vmem:[#allocation2 + $0xa7] sm:$0xff]  ;;  %v7049_v59 = vld [vmem:[%s13378_s3 + $0x190] sm:$0xff] }
 0x337   : > { %v12483_v30 = vmax.f32 %v3316_v10, 0.0  ;;  %v8861_v33 = vpop.f32.mrb[26].mxu0  ;;  %v12585_v10 = vld [vmem:[#allocation2 + $0xaf] sm:$0xff] }
 0x338   : > { %3454 = vst [vmem:[#allocation2 + $0x1b0] sm:$0xff] %v12480_v1  ;;  %v3319_v60 = vadd.f32 %v8861_v33, %v12397_v50  ;;  %v3224_v9 = vpop.f32.mrb[27].mxu0  ;;  %v7045_v33 = vld [vmem:[%s13378_s3 + $0x170] sm:$0xff]  ;;  %v12630_v62 = vld [vmem:[#allocation2 + $0x167] sm:$0xff] }
 0x339   : > { %3453 = vst [vmem:[#allocation2 + $0x1a8] sm:$0xff] %v12483_v30  ;;  %v3318_v28 = vadd.f32 %v12397_v50, %v3224_v9  ;;  %8939 = vmatprep.mubr.f32.mxu1 %v12483_v30  ;;  %v12594_v9 = vld [vmem:[#allocation2 + $0xc7] sm:$0xff] }
 0x33a   : > { %v12490_v52 = vmax.f32 %v3319_v60, 0.0  ;;  %8940 = vmatmul.mubr.f32.gmra.mrb[26].mxu1 %v12480_v1  ;;  %v7046_v60 = vld [vmem:[%s13378_s3 + $0x178] sm:$0xff] }
 0x33b   : > { %v12493_v42 = vmax.f32 %v3318_v28, 0.0  ;;  %v8864_v23 = vpop.f32.mrb[28].mxu0  ;;  %v10048_v28 = vpack.c.bf16 %v7046_v60, %v7045_v33  ;;  %v10056_v33 = vpack.c.bf16 %v7050_v14, %v7049_v59  ;;  %v7051_v60 = vld [vmem:[%s13378_s3 + $0x1a0] sm:$0xff]  ;;  %v7054_v59 = vld [vmem:[%s13378_s3 + $0x1b8] sm:$0xff]  ;;  %v12684_v14 = vld [vmem:[#allocation2 + $0x49] sm:$0xff] }
 0x33c   : > { %3456 = vst [vmem:[#allocation2 + $0x1d0] sm:$0xff] %v12490_v52  ;;  %v3321_v38 = vadd.f32 %v8864_v23, %v12397_v50  ;;  %v3234_v39 = vpop.f32.mrb[29].mxu0  ;;  %v12597_v23 = vld [vmem:[#allocation2 + $0xcf] sm:$0xff]  ;;  %13630 = vst [vmem:[#allocation5_spill] sm:$0xff] %v12684_v14 }
 0x33d   : > { %3455 = vst [vmem:[#allocation2 + $0x1c8] sm:$0xff] %v12493_v42  ;;  %v3320_v45 = vadd.f32 %v12397_v50, %v3234_v39  ;;  %8942 = vmatprep.mubr.f32.mxu1 %v12493_v42  ;;  %v7048_v39 = vld [vmem:[%s13378_s3 + $0x188] sm:$0xff] }
 0x33e   : > { %v12500_v12 = vmax.f32 %v3321_v38, 0.0  ;;  %8943 = vmatmul.mubr.f32.gmra.mrb[28].mxu1 %v12490_v52  ;;  %v7047_v38 = vld [vmem:[%s13378_s3 + $0x180] sm:$0xff] }
 0x33f   : > { %v12503_v48 = vmax.f32 %v3320_v45, 0.0  ;;  %v8867_v26 = vpop.f32.mrb[30].mxu0  ;;  %v12606_v45 = vld [vmem:[#allocation2 + $0xe7] sm:$0xff] }
 0x340   : > { %3458 = vst [vmem:[#allocation2 + $0x1f0] sm:$0xff] %v12500_v12  ;;  %v12507_v31 = vadd.f32 %v8867_v26, %v12397_v50  ;;  %v3244_v37 = vpop.f32.mrb[31].mxu0  ;;  %v10052_v26 = vpack.c.bf16 %v7048_v39, %v7047_v38  ;;  %v12645_v3 = vld [vmem:[#allocation2 + $0x1af] sm:$0xff] }
 0x341   : > { %3457 = vst [vmem:[#allocation2 + $0x1e8] sm:$0xff] %v12503_v48  ;;  %v12511_v61 = vadd.f32 %v12397_v50, %v3244_v37  ;;  %8945 = vmatprep.mubr.f32.mxu1 %v12503_v48  ;;  %v10024_v50 = vpack.c.bf16 %v7034_v44, %v7033_v27  ;;  %v12609_v37 = vld [vmem:[#allocation2 + $0xef] sm:$0xff]  ;;  %v12618_v44 = vld [vmem:[#allocation2 + $0x127] sm:$0xff] }
 0x342   : > { %v13484_v54 = vmax.f32 %v12507_v31, 0.0  ;;  %8946 = vmatmul.mubr.f32.gmra.mrb[30].mxu1 %v12500_v12  ;;  %v12615_v27 = vld [vmem:[#allocation2 + $0x10f] sm:$0xff] }
 0x343   : > { %v13485_v16 = vmax.f32 %v12511_v61, 0.0  ;;  %8980 = vmatprep.mubr.f32.mxu1 %v3461_v40  ;;  %v12612_v40 = vld [vmem:[#allocation2 + $0x107] sm:$0xff] }
 0x344   : > { %3460 = vst [vmem:[#allocation2 + $0x210] sm:$0xff] %v13484_v54  ;;  %v12648_v15 = vld [vmem:[#allocation2 + $0x1c7] sm:$0xff]  ;;  %v12675_v54 = vld [vmem:[#allocation2 + $0x31] sm:$0xff] }
 0x345   : > { %3459 = vst [vmem:[#allocation2 + $0x208] sm:$0xff] %v13485_v16  ;;  %v12672_v38 = vld [vmem:[#allocation2 + $0x29] sm:$0xff] }
 0x346   : > { %8981 = vmatmul.mubr.f32.vlgmr.msra.gmra.mrb[0].mxu1 %v3462_v18  ;;  %v12621_v18 = vld [vmem:[#allocation2 + $0x12f] sm:$0xff] }
 0x347   : > { %8983 = vmatprep.mubr.f32.mxu1 %v12533_v17  ;;  %10023 = vmatpush3.bf16.msra.mxu1 %v12391_v49  ;;  %v10032_v49 = vpack.c.bf16 %v7038_v35, %v7037_v57  ;;  %v12636_v57 = vld [vmem:[#allocation2 + $0x187] sm:$0xff]  ;;  %v12639_v35 = vld [vmem:[#allocation2 + $0x18f] sm:$0xff] }
 0x348   : > { %10025 = vmatprep.subr.bf16.mxu1 %v10024_v50  ;;  %v12654_v7 = vld [vmem:[#allocation2 + $0x1e7] sm:$0xff] }
 0x349   : > { %13628 = vst [vmem:[#allocation3_spill] sm:$0xff] %v12654_v7  ;;  %v12696_v16 = vld [vmem:[#allocation2 + $0x69] sm:$0xff] }
 0x34a   : > { %8984 = vmatmul.mubr.f32.gmra.mrb[2].mxu1 %v12537_v36  ;;  %13632 = vst [vmem:[#allocation7_spill] sm:$0xff] %v12696_v16 }
 0x34b   : > { %8986 = vmatprep.mubr.f32.mxu1 %v12546_v63  ;;  %10027 = vmatpush3.bf16.msra.mxu1 %v10024_v50  ;;  %v12624_v50 = vld [vmem:[#allocation2 + $0x147] sm:$0xff] }
 0x34c   : > { %10029 = vmatprep.subr.bf16.mxu1 %v10028_v21 }
 0x34e   : > { %8987 = vmatmul.mubr.f32.gmra.mrb[4].mxu1 %v12549_v2 }
 0x34f   : > { %8989 = vmatprep.mubr.f32.mxu1 %v12558_v55  ;;  %10031 = vmatpush3.bf16.msra.mxu1 %v10028_v21  ;;  %v12633_v21 = vld [vmem:[#allocation2 + $0x16f] sm:$0xff] }
 0x350   : > { %10033 = vmatprep.subr.bf16.mxu1 %v10032_v49 }
 0x352   : > { %8990 = vmatmul.mubr.f32.gmra.mrb[6].mxu1 %v12561_v4 }
 0x353   : > { %8992 = vmatprep.mubr.f32.mxu1 %v12570_v13  ;;  %10035 = vmatpush3.bf16.msra.mxu1 %v10032_v49  ;;  %v12642_v49 = vld [vmem:[#allocation2 + $0x1a7] sm:$0xff] }
 0x354   : > { %10037 = vmatprep.subr.bf16.mxu1 %v10036_v6 }
 0x356   : > { %8993 = vmatmul.mubr.f32.gmra.mrb[8].mxu1 %v12573_v5 }
 0x357   : > { %8995 = vmatprep.mubr.f32.mxu1 %v12582_v22  ;;  %10039 = vmatpush3.bf16.msra.mxu1 %v10036_v6  ;;  %v12651_v6 = vld [vmem:[#allocation2 + $0x1cf] sm:$0xff] }
 0x358   : > { %10041 = vmatprep.subr.bf16.mxu1 %v10040_v25 }
 0x35a   : > { %8996 = vmatmul.mubr.f32.gmra.mrb[10].mxu1 %v12585_v10 }
 0x35b   : > { %8998 = vmatprep.mubr.f32.mxu1 %v12594_v9  ;;  %10043 = vmatpush3.bf16.msra.mxu1 %v10040_v25  ;;  %v12657_v25 = vld [vmem:[#allocation2 + $0x1ef] sm:$0xff] }
 0x35c   : > { %10045 = vmatprep.subr.bf16.mxu1 %v10044_v53  ;;  %13629 = vst [vmem:[#allocation4_spill] sm:$0xff] %v12657_v25 }
 0x35e   : > { %8999 = vmatmul.mubr.f32.gmra.mrb[12].mxu1 %v12597_v23 }
 0x35f   : > { %9001 = vmatprep.mubr.f32.mxu1 %v12606_v45  ;;  %10047 = vmatpush3.bf16.msra.mxu1 %v10044_v53  ;;  %v4009_v53 = vld [vmem:[#allocation2 + $0x11] sm:$0xff] }
 0x360   : > { %10049 = vmatprep.subr.bf16.mxu1 %v10048_v28 }
 0x362   : > { %9002 = vmatmul.mubr.f32.gmra.mrb[14].mxu1 %v12609_v37 }
 0x363   : > { %9004 = vmatprep.mubr.f32.mxu1 %v12612_v40  ;;  %10051 = vmatpush3.bf16.msra.mxu1 %v10048_v28  ;;  %v7052_v28 = vld [vmem:[%s13378_s3 + $0x1a8] sm:$0xff] }
 0x364   : > { %10053 = vmatprep.subr.bf16.mxu1 %v10052_v26  ;;  %v10060_v39 = vpack.c.bf16 %v7052_v28, %v7051_v60  ;;  %v7055_v60 = vld [vmem:[%s13378_s3 + $0x1c0] sm:$0xff]  ;;  %v7056_v28 = vld [vmem:[%s13378_s3 + $0x1c8] sm:$0xff] }
 0x366   : > { %9005 = vmatmul.mubr.f32.gmra.mrb[16].mxu1 %v12615_v27 }
 0x367   : > { %9007 = vmatprep.mubr.f32.mxu1 %v12618_v44 }
 0x36a   : > { %9008 = vmatmul.mubr.f32.gmra.mrb[18].mxu1 %v12621_v18 }
 0x36b   : > { %9010 = vmatprep.mubr.f32.mxu1 %v12624_v50 }
 0x36e   : > { %9011 = vmatmul.mubr.f32.gmra.mrb[20].mxu1 %v12627_v29 }
 0x36f   : > { %9013 = vmatprep.mubr.f32.mxu1 %v12630_v62 }
 0x372   : > { %9014 = vmatmul.mubr.f32.gmra.mrb[22].mxu1 %v12633_v21 }
 0x373   : > { %9016 = vmatprep.mubr.f32.mxu1 %v12636_v57 }
 0x376   : > { %9017 = vmatmul.mubr.f32.gmra.mrb[24].mxu1 %v12639_v35 }
 0x377   : > { %9019 = vmatprep.mubr.f32.mxu1 %v12642_v49 }
 0x37a   : > { %9020 = vmatmul.mubr.f32.gmra.mrb[26].mxu1 %v12645_v3 }
 0x37b   : > { %9022 = vmatprep.mubr.f32.mxu1 %v12648_v15 }
 0x37e   : > { %9023 = vmatmul.mubr.f32.gmra.mrb[28].mxu1 %v12651_v6 }
 0x37f   : > { %9025 = vmatprep.mubr.f32.mxu1 %v12654_v7 }
 0x382   : > { %9026 = vmatmul.mubr.f32.gmra.mrb[30].mxu1 %v12657_v25 }
 0x383   : > { %9060 = vmatprep.mubr.f32.mxu1 %v4008_v41  ;;  %v7053_v41 = vld [vmem:[%s13378_s3 + $0x1b0] sm:$0xff] }
 0x386   : > { %9061 = vmatmul.mubr.f32.vlgmr.msra.gmra.mrb[0].mxu1 %v4009_v53  ;;  %v12687_v53 = vld [vmem:[#allocation2 + $0x51] sm:$0xff] }
 0x387   : > { %9063 = vmatprep.mubr.f32.mxu1 %v12672_v38  ;;  %10055 = vmatpush3.bf16.msra.mxu1 %v10052_v26  ;;  %v10064_v26 = vpack.c.bf16 %v7054_v59, %v7053_v41  ;;  %13631 = vst [vmem:[#allocation6_spill] sm:$0xff] %v12687_v53  ;;  %v12699_v41 = vld [vmem:[#allocation2 + $0x71] sm:$0xff] }
 0x388   : > { %10057 = vmatprep.subr.bf16.mxu1 %v10056_v33  ;;  %13633 = vst [vmem:[#allocation8_spill] sm:$0xff] %v12699_v41  ;;  %v7057_v59 = vld [vmem:[%s13378_s3 + $0x1d0] sm:$0xff] }
 0x38a   : > { %9064 = vmatmul.mubr.f32.gmra.mrb[2].mxu1 %v12675_v54 }
 0x38b   : > { %9066 = vmatprep.mubr.f32.mxu1 %v12684_v14  ;;  %10059 = vmatpush3.bf16.msra.mxu1 %v10056_v33  ;;  %v10068_v33 = vpack.c.bf16 %v7056_v28, %v7055_v60  ;;  %v7058_v14 = vld [vmem:[%s13378_s3 + $0x1d8] sm:$0xff]  ;;  %v7059_v28 = vld [vmem:[%s13378_s3 + $0x1e0] sm:$0xff] }
 0x38c   : > { %10061 = vmatprep.subr.bf16.mxu1 %v10060_v39  ;;  %v12711_v60 = vld [vmem:[#allocation2 + $0x91] sm:$0xff] }
 0x38d   : > { %13635 = vst [vmem:[#allocation10_spill] sm:$0xff] %v12711_v60 }
 0x38e   : > { %9067 = vmatmul.mubr.f32.gmra.mrb[4].mxu1 %v12687_v53  ;;  %v12708_v53 = vld [vmem:[#allocation2 + $0x89] sm:$0xff] }
 0x38f   : > { %9069 = vmatprep.mubr.f32.mxu1 %v12696_v16  ;;  %10063 = vmatpush3.bf16.msra.mxu1 %v10060_v39  ;;  %13634 = vst [vmem:[#allocation9_spill] sm:$0xff] %v12708_v53  ;;  %v10072_v39 = vpack.c.bf16 %v7058_v14, %v7057_v59  ;;  %v7060_v16 = vld [vmem:[%s13378_s3 + $0x1e8] sm:$0xff]  ;;  %v12723_v14 = vld [vmem:[#allocation2 + $0xb1] sm:$0xff] }
 0x390   : > { %10065 = vmatprep.subr.bf16.mxu1 %v10064_v26  ;;  %13637 = vst [vmem:[#allocation12_spill] sm:$0xff] %v12723_v14  ;;  %v7061_v59 = vld [vmem:[%s13378_s3 + $0x1f0] sm:$0xff] }
 0x392   : > { %9070 = vmatmul.mubr.f32.gmra.mrb[6].mxu1 %v12699_v41  ;;  %v12720_v41 = vld [vmem:[#allocation2 + $0xa9] sm:$0xff] }
 0x393   : > { %9072 = vmatprep.mubr.f32.mxu1 %v12708_v53  ;;  %10067 = vmatpush3.bf16.msra.mxu1 %v10064_v26  ;;  %13636 = vst [vmem:[#allocation11_spill] sm:$0xff] %v12720_v41  ;;  %v10076_v26 = vpack.c.bf16 %v7060_v16, %v7059_v28  ;;  %v7062_v53 = vld [vmem:[%s13378_s3 + $0x1f8] sm:$0xff]  ;;  %v7063_v28 = vld [vmem:[%s13378_s3 + $0x200] sm:$0xff] }
 0x394   : > { %10069 = vmatprep.subr.bf16.mxu1 %v10068_v33  ;;  %v12735_v16 = vld [vmem:[#allocation2 + $0xd1] sm:$0xff] }
 0x395   : > { %13639 = vst [vmem:[#allocation14_spill] sm:$0xff] %v12735_v16 }
 0x396   : > { %9073 = vmatmul.mubr.f32.gmra.mrb[8].mxu1 %v12711_v60  ;;  %v12732_v60 = vld [vmem:[#allocation2 + $0xc9] sm:$0xff] }
 0x397   : > { %9075 = vmatprep.mubr.f32.mxu1 %v12720_v41  ;;  %10071 = vmatpush3.bf16.msra.mxu1 %v10068_v33  ;;  %13638 = vst [vmem:[#allocation13_spill] sm:$0xff] %v12732_v60  ;;  %v10080_v33 = vpack.c.bf16 %v7062_v53, %v7061_v59  ;;  %v7064_v41 = vld [vmem:[%s13378_s3 + $0x208] sm:$0xff]  ;;  %v12747_v53 = vld [vmem:[#allocation2 + $0xf1] sm:$0xff] }
 0x398   : > { %10073 = vmatprep.subr.bf16.mxu1 %v10072_v39  ;;  %v12750_v59 = vld [vmem:[#allocation2 + $0x109] sm:$0xff] }
 0x399   : > { %13640 = vst [vmem:[#allocation15_spill] sm:$0xff] %v12750_v59 }
 0x39a   : > { %9076 = vmatmul.mubr.f32.gmra.mrb[10].mxu1 %v12723_v14  ;;  %v12744_v14 = vld [vmem:[#allocation2 + $0xe9] sm:$0xff] }
 0x39b   : > { %9078 = vmatprep.mubr.f32.mxu1 %v12732_v60  ;;  %10075 = vmatpush3.bf16.msra.mxu1 %v10072_v39  ;;  %v10084_v39 = vpack.c.bf16 %v7064_v41, %v7063_v28  ;;  %v12753_v60 = vld [vmem:[#allocation2 + $0x111] sm:$0xff]  ;;  %v12762_v41 = vld [vmem:[#allocation2 + $0x149] sm:$0xff] }
 0x39c   : > { %10077 = vmatprep.subr.bf16.mxu1 %v10076_v26  ;;  %13641 = vst [vmem:[#allocation16_spill] sm:$0xff] %v12753_v60  ;;  %13644 = vst [vmem:[#allocation19_spill] sm:$0xff] %v12762_v41  ;;  %v12765_v28 = vld [vmem:[#allocation2 + $0x151] sm:$0xff] }
 0x39d   : > { %13645 = vst [vmem:[#allocation20_spill] sm:$0xff] %v12765_v28 }
 0x39e   : > { %9079 = vmatmul.mubr.f32.gmra.mrb[12].mxu1 %v12735_v16  ;;  %v12756_v16 = vld [vmem:[#allocation2 + $0x129] sm:$0xff] }
 0x39f   : > { %9081 = vmatprep.mubr.f32.mxu1 %v12744_v14  ;;  %10079 = vmatpush3.bf16.msra.mxu1 %v10076_v26  ;;  %13642 = vst [vmem:[#allocation17_spill] sm:$0xff] %v12756_v16  ;;  %v12759_v26 = vld [vmem:[#allocation2 + $0x131] sm:$0xff] }
 0x3a0   : > { %10081 = vmatprep.subr.bf16.mxu1 %v10080_v33  ;;  %13643 = vst [vmem:[#allocation18_spill] sm:$0xff] %v12759_v26 }
 0x3a2   : > { %9082 = vmatmul.mubr.f32.gmra.mrb[14].mxu1 %v12747_v53 }
 0x3a3   : > { %9084 = vmatprep.mubr.f32.mxu1 %v12750_v59  ;;  %10083 = vmatpush3.bf16.msra.mxu1 %v10080_v33  ;;  %v12768_v33 = vld [vmem:[#allocation2 + $0x169] sm:$0xff] }
 0x3a4   : > { %10085 = vmatprep.subr.bf16.mxu1 %v10084_v39  ;;  %13646 = vst [vmem:[#allocation21_spill] sm:$0xff] %v12768_v33 }
 0x3a6   : > { %9085 = vmatmul.mubr.f32.gmra.mrb[16].mxu1 %v12753_v60  ;;  %v12771_v60 = vld [vmem:[#allocation2 + $0x171] sm:$0xff] }
 0x3a7   : > { %9087 = vmatprep.mubr.f32.mxu1 %v12756_v16  ;;  %13647 = vst [vmem:[#allocation22_spill] sm:$0xff] %v12771_v60  ;;  %v12774_v16 = vld [vmem:[#allocation2 + $0x189] sm:$0xff] }
 0x3a8   : > { %13648 = vst [vmem:[#allocation23_spill] sm:$0xff] %v12774_v16 }
 0x3aa   : > { %9088 = vmatmul.mubr.f32.gmra.mrb[18].mxu1 %v12759_v26  ;;  %v12777_v26 = vld [vmem:[#allocation2 + $0x191] sm:$0xff] }
 0x3ab   : > { %9090 = vmatprep.mubr.f32.mxu1 %v12762_v41  ;;  %13649 = vst [vmem:[#allocation24_spill] sm:$0xff] %v12777_v26  ;;  %v12780_v41 = vld [vmem:[#allocation2 + $0x1a9] sm:$0xff] }
 0x3ac   : > { %13650 = vst [vmem:[#allocation25_spill] sm:$0xff] %v12780_v41 }
 0x3ae   : > { %9091 = vmatmul.mubr.f32.gmra.mrb[20].mxu1 %v12765_v28  ;;  %v12783_v28 = vld [vmem:[#allocation2 + $0x1b1] sm:$0xff] }
 0x3af   : > { %9093 = vmatprep.mubr.f32.mxu1 %v12768_v33  ;;  %13651 = vst [vmem:[#allocation26_spill] sm:$0xff] %v12783_v28  ;;  %v12786_v33 = vld [vmem:[#allocation2 + $0x1c9] sm:$0xff] }
 0x3b0   : > { %13652 = vst [vmem:[#allocation27_spill] sm:$0xff] %v12786_v33 }
 0x3b2   : > { %9094 = vmatmul.mubr.f32.gmra.mrb[22].mxu1 %v12771_v60  ;;  %v12789_v60 = vld [vmem:[#allocation2 + $0x1d1] sm:$0xff] }
 0x3b3   : > { %9096 = vmatprep.mubr.f32.mxu1 %v12774_v16  ;;  %13653 = vst [vmem:[#allocation28_spill] sm:$0xff] %v12789_v60  ;;  %v12792_v16 = vld [vmem:[#allocation2 + $0x1e9] sm:$0xff] }
 0x3b4   : > { %13654 = vst [vmem:[#allocation29_spill] sm:$0xff] %v12792_v16 }
 0x3b6   : > { %9097 = vmatmul.mubr.f32.gmra.mrb[24].mxu1 %v12777_v26  ;;  %v12795_v26 = vld [vmem:[#allocation2 + $0x1f1] sm:$0xff] }
 0x3b7   : > { %9099 = vmatprep.mubr.f32.mxu1 %v12780_v41  ;;  %v7065_v41 = vld [vmem:[%s13378_s3 + $0x210] sm:$0xff] }
 0x3ba   : > { %9100 = vmatmul.mubr.f32.gmra.mrb[26].mxu1 %v12783_v28  ;;  %v7066_v28 = vld [vmem:[%s13378_s3 + $0x218] sm:$0xff] }
 0x3bb   : > { %9102 = vmatprep.mubr.f32.mxu1 %v12786_v33  ;;  %v10088_v33 = vpack.c.bf16 %v7066_v28, %v7065_v41  ;;  %v7070_v41 = vld [vmem:[%s13378_s3 + $0x238] sm:$0xff]  ;;  %v7073_v28 = vld [vmem:[%s13378_s3 + $0x250] sm:$0xff] }
 0x3be   : > { %9103 = vmatmul.mubr.f32.gmra.mrb[28].mxu1 %v12789_v60  ;;  %v7067_v60 = vld [vmem:[%s13378_s3 + $0x220] sm:$0xff] }
 0x3bf   : > { %9105 = vmatprep.mubr.f32.mxu1 %v12792_v16  ;;  %v7068_v16 = vld [vmem:[%s13378_s3 + $0x228] sm:$0xff] }
 0x3c0   : > { %v10092_v59 = vpack.c.bf16 %v7068_v16, %v7067_v60  ;;  %v7072_v60 = vld [vmem:[%s13378_s3 + $0x248] sm:$0xff] }
 0x3c2   : > { %9106 = vmatmul.mubr.f32.gmra.mrb[30].mxu1 %v12795_v26 }
 0x3c3   : > { %9140 = vmatprep.mubr.f32.mxu1 %v12533_v17  ;;  %v7069_v17 = vld [vmem:[%s13378_s3 + $0x230] sm:$0xff] }
 0x3c6   : > { %9141 = vmatmul.mubr.f32.vlgmr.msra.gmra.mrb[0].mxu1 %v12537_v36  ;;  %v10096_v36 = vpack.c.bf16 %v7070_v41, %v7069_v17  ;;  %v7076_v41 = vld [vmem:[%s13378_s3 + $0x268] sm:$0xff] }
 0x3c7   : > { %9143 = vmatprep.mubr.f32.mxu1 %v12546_v63  ;;  %10087 = vmatpush3.bf16.msra.mxu1 %v10084_v39  ;;  %v7071_v39 = vld [vmem:[%s13378_s3 + $0x240] sm:$0xff] }
 0x3c8   : > { %10089 = vmatprep.subr.bf16.mxu1 %v10088_v33  ;;  %v10100_v16 = vpack.c.bf16 %v7072_v60, %v7071_v39  ;;  %v7078_v60 = vld [vmem:[%s13378_s3 + $0x278] sm:$0xff] }
 0x3ca   : > { %9144 = vmatmul.mubr.f32.gmra.mrb[2].mxu1 %v12549_v2 }
 0x3cb   : > { %9146 = vmatprep.mubr.f32.mxu1 %v12558_v55  ;;  %10091 = vmatpush3.bf16.msra.mxu1 %v10088_v33  ;;  %v7074_v33 = vld [vmem:[%s13378_s3 + $0x258] sm:$0xff] }
 0x3cc   : > { %10093 = vmatprep.subr.bf16.mxu1 %v10092_v59  ;;  %v10104_v17 = vpack.c.bf16 %v7074_v33, %v7073_v28  ;;  %v7080_v33 = vld [vmem:[%s13378_s3 + $0x288] sm:$0xff] }
 0x3ce   : > { %9147 = vmatmul.mubr.f32.gmra.mrb[4].mxu1 %v12561_v4 }
 0x3cf   : > { %9149 = vmatprep.mubr.f32.mxu1 %v12570_v13  ;;  %10095 = vmatpush3.bf16.msra.mxu1 %v10092_v59  ;;  %v7075_v59 = vld [vmem:[%s13378_s3 + $0x260] sm:$0xff] }
 0x3d0   : > { %10097 = vmatprep.subr.bf16.mxu1 %v10096_v36  ;;  %v10108_v39 = vpack.c.bf16 %v7076_v41, %v7075_v59  ;;  %v12879_v41 = vld [vmem:[#allocation2 + $0x20f] sm:$0xff] }
 0x3d1   : > { %13656 = vst [vmem:[#allocation31_spill] sm:$0xff] %v12879_v41 }
 0x3d2   : > { %9150 = vmatmul.mubr.f32.gmra.mrb[6].mxu1 %v12573_v5 }
 0x3d3   : > { %9152 = vmatprep.mubr.f32.mxu1 %v12582_v22  ;;  %10099 = vmatpush3.bf16.msra.mxu1 %v10096_v36  ;;  %v7077_v36 = vld [vmem:[%s13378_s3 + $0x270] sm:$0xff] }
 0x3d4   : > { %10101 = vmatprep.subr.bf16.mxu1 %v10100_v16  ;;  %v10112_v28 = vpack.c.bf16 %v7078_v60, %v7077_v36  ;;  %v7082_v36 = vld [vmem:[%s13378_s3 + $0x298] sm:$0xff]  ;;  %v4620_v60 = vld [vmem:[#allocation2 + $0x28] sm:$0xff] }
 0x3d6   : > { %9153 = vmatmul.mubr.f32.gmra.mrb[8].mxu1 %v12585_v10 }
 0x3d7   : > { %9155 = vmatprep.mubr.f32.mxu1 %v12594_v9  ;;  %10103 = vmatpush3.bf16.msra.mxu1 %v10100_v16  ;;  %v7079_v16 = vld [vmem:[%s13378_s3 + $0x280] sm:$0xff] }
 0x3d8   : > { %10105 = vmatprep.subr.bf16.mxu1 %v10104_v17  ;;  %v10116_v59 = vpack.c.bf16 %v7080_v33, %v7079_v16  ;;  %v4621_v16 = vld [vmem:[#allocation2 + $0x30] sm:$0xff]  ;;  %v7083_v33 = vld [vmem:[%s13378_s3 + $0x2a0] sm:$0xff] }
 0x3da   : > { %9156 = vmatmul.mubr.f32.gmra.mrb[10].mxu1 %v12597_v23 }
 0x3db   : > { %9158 = vmatprep.mubr.f32.mxu1 %v12606_v45  ;;  %10107 = vmatpush3.bf16.msra.mxu1 %v10104_v17  ;;  %v12876_v17 = vld [vmem:[#allocation2 + $0x207] sm:$0xff] }
 0x3dc   : > { %10109 = vmatprep.subr.bf16.mxu1 %v10108_v39  ;;  %13655 = vst [vmem:[#allocation30_spill] sm:$0xff] %v12876_v17 }
 0x3de   : > { %9159 = vmatmul.mubr.f32.gmra.mrb[12].mxu1 %v12609_v37 }
 0x3df   : > { %9161 = vmatprep.mubr.f32.mxu1 %v12612_v40  ;;  %10111 = vmatpush3.bf16.msra.mxu1 %v10108_v39  ;;  %v7081_v39 = vld [vmem:[%s13378_s3 + $0x290] sm:$0xff] }
 0x3e0   : > { %10113 = vmatprep.subr.bf16.mxu1 %v10112_v28 }
 0x3e2   : > { %9162 = vmatmul.mubr.f32.gmra.mrb[14].mxu1 %v12615_v27 }
 0x3e3   : > { %9164 = vmatprep.mubr.f32.mxu1 %v12618_v44  ;;  %10115 = vmatpush3.bf16.msra.mxu1 %v10112_v28  ;;  %v10120_v28 = vpack.c.bf16 %v7082_v36, %v7081_v39  ;;  %v7085_v39 = vld [vmem:[%s13378_s3 + $0x2b0] sm:$0xff]  ;;  %v7086_v36 = vld [vmem:[%s13378_s3 + $0x2b8] sm:$0xff] }
 0x3e4   : > { %10117 = vmatprep.subr.bf16.mxu1 %v10116_v59 }
 0x3e6   : > { %9165 = vmatmul.mubr.f32.gmra.mrb[16].mxu1 %v12621_v18 }
 0x3e7   : > { %9167 = vmatprep.mubr.f32.mxu1 %v12624_v50 }
 0x3ea   : > { %9168 = vmatmul.mubr.f32.gmra.mrb[18].mxu1 %v12627_v29 }
 0x3eb   : > { %9170 = vmatprep.mubr.f32.mxu1 %v12630_v62 }
 0x3ee   : > { %9171 = vmatmul.mubr.f32.gmra.mrb[20].mxu1 %v12633_v21 }
 0x3ef   : > { %9173 = vmatprep.mubr.f32.mxu1 %v12636_v57 }
 0x3f2   : > { %9174 = vmatmul.mubr.f32.gmra.mrb[22].mxu1 %v12639_v35 }
 0x3f3   : > { %9176 = vmatprep.mubr.f32.mxu1 %v12642_v49 }
 0x3f6   : > { %9177 = vmatmul.mubr.f32.gmra.mrb[24].mxu1 %v12645_v3 }
 0x3f7   : > { %9179 = vmatprep.mubr.f32.mxu1 %v12648_v15 }
 0x3fa   : > { %9180 = vmatmul.mubr.f32.gmra.mrb[26].mxu1 %v12651_v6 }
 0x3fb   : > { %9182 = vmatprep.mubr.f32.mxu1 %v12654_v7  ;;  %v12897_v7 = vld [vmem:[#allocation2 + $0x50] sm:$0xff] }
 0x3fc   : > { %13657 = vst [vmem:[#allocation32_spill] sm:$0xff] %v12897_v7 }
 0x3fe   : > { %9183 = vmatmul.mubr.f32.gmra.mrb[28].mxu1 %v12657_v25  ;;  %v12894_v25 = vld [vmem:[#allocation2 + $0x48] sm:$0xff] }
 0x3ff   : > { %9185 = vmatprep.mubr.f32.mxu1 %v12876_v17  ;;  %v7084_v17 = vld [vmem:[%s13378_s3 + $0x2a8] sm:$0xff] }
 0x402   : > { %9186 = vmatmul.mubr.f32.gmra.mrb[30].mxu1 %v12879_v41  ;;  %v10124_v41 = vpack.c.bf16 %v7084_v17, %v7083_v33  ;;  %v12909_v17 = vld [vmem:[#allocation2 + $0x70] sm:$0xff]  ;;  %v7088_v33 = vld [vmem:[%s13378_s3 + $0x2c8] sm:$0xff] }
 0x403   : > { %9220 = vmatprep.mubr.f32.mxu1 %v4620_v60  ;;  %v12906_v60 = vld [vmem:[#allocation2 + $0x68] sm:$0xff]  ;;  %13659 = vst [vmem:[#allocation34_spill] sm:$0xff] %v12909_v17 }
 0x404   : > { %13658 = vst [vmem:[#allocation33_spill] sm:$0xff] %v12906_v60 }
 0x406   : > { %9221 = vmatmul.mubr.f32.vlgmr.msra.gmra.mrb[0].mxu1 %v4621_v16  ;;  %v7087_v16 = vld [vmem:[%s13378_s3 + $0x2c0] sm:$0xff] }
 0x407   : > { %9223 = vmatprep.mubr.f32.mxu1 %v12894_v25  ;;  %10119 = vmatpush3.bf16.msra.mxu1 %v10116_v59  ;;  %v10128_v59 = vpack.c.bf16 %v7086_v36, %v7085_v39  ;;  %v12921_v39 = vld [vmem:[#allocation2 + $0x90] sm:$0xff] }
 0x408   : > { %10121 = vmatprep.subr.bf16.mxu1 %v10120_v28  ;;  %v7089_v36 = vld [vmem:[%s13378_s3 + $0x2d0] sm:$0xff] }
 0x40a   : > { %9224 = vmatmul.mubr.f32.gmra.mrb[2].mxu1 %v12897_v7  ;;  %v12918_v7 = vld [vmem:[#allocation2 + $0x88] sm:$0xff] }
 0x40b   : > { %9226 = vmatprep.mubr.f32.mxu1 %v12906_v60  ;;  %10123 = vmatpush3.bf16.msra.mxu1 %v10120_v28  ;;  %13660 = vst [vmem:[#allocation35_spill] sm:$0xff] %v12918_v7  ;;  %v10132_v28 = vpack.c.bf16 %v7088_v33, %v7087_v16  ;;  %v7090_v60 = vld [vmem:[%s13378_s3 + $0x2d8] sm:$0xff]  ;;  %v12933_v16 = vld [vmem:[#allocation2 + $0xb0] sm:$0xff]  ;;  %v7091_v33 = vld [vmem:[%s13378_s3 + $0x2e0] sm:$0xff] }
 0x40c   : > { %10125 = vmatprep.subr.bf16.mxu1 %v10124_v41 }
 0x40e   : > { %9227 = vmatmul.mubr.f32.gmra.mrb[4].mxu1 %v12909_v17  ;;  %v12930_v17 = vld [vmem:[#allocation2 + $0xa8] sm:$0xff] }
 0x40f   : > { %9229 = vmatprep.mubr.f32.mxu1 %v12918_v7  ;;  %10127 = vmatpush3.bf16.msra.mxu1 %v10124_v41  ;;  %13661 = vst [vmem:[#allocation36_spill] sm:$0xff] %v12930_v17  ;;  %v10136_v41 = vpack.c.bf16 %v7090_v60, %v7089_v36  ;;  %v7092_v7 = vld [vmem:[%s13378_s3 + $0x2e8] sm:$0xff]  ;;  %v7093_v60 = vld [vmem:[%s13378_s3 + $0x2f0] sm:$0xff] }
 0x410   : > { %10129 = vmatprep.subr.bf16.mxu1 %v10128_v59 }
 0x412   : > { %9230 = vmatmul.mubr.f32.gmra.mrb[6].mxu1 %v12921_v39 }
 0x413   : > { %9232 = vmatprep.mubr.f32.mxu1 %v12930_v17  ;;  %10131 = vmatpush3.bf16.msra.mxu1 %v10128_v59  ;;  %v10140_v17 = vpack.c.bf16 %v7092_v7, %v7091_v33  ;;  %v7094_v59 = vld [vmem:[%s13378_s3 + $0x2f8] sm:$0xff]  ;;  %v7096_v7 = vld [vmem:[%s13378_s3 + $0x308] sm:$0xff] }
 0x414   : > { %10133 = vmatprep.subr.bf16.mxu1 %v10132_v28  ;;  %v10144_v36 = vpack.c.bf16 %v7094_v59, %v7093_v60  ;;  %v7108_v33 = vld [vmem:[%s13378_s3 + $0x368] sm:$0xff]  ;;  %v13672_v59 = vld [vmem:[#allocation13_spill] sm:$0xff] }
 0x415   : > { %v13671_v60 = vld [vmem:[#allocation12_spill] sm:$0xff] }
 0x416   : > { %9233 = vmatmul.mubr.f32.gmra.mrb[8].mxu1 %v12933_v16 }
 0x417   : > { %9235 = vmatprep.mubr.f32.mxu1 %v12413_v32  ;;  %10135 = vmatpush3.bf16.msra.mxu1 %v10132_v28  ;;  %v7095_v32 = vld [vmem:[%s13378_s3 + $0x300] sm:$0xff] }
 0x418   : > { %10137 = vmatprep.subr.bf16.mxu1 %v10136_v41 }
 0x41a   : > { %9236 = vmatmul.mubr.f32.gmra.mrb[10].mxu1 %v12411_v56  ;;  %v10148_v56 = vpack.c.bf16 %v7096_v7, %v7095_v32  ;;  %v7109_v32 = vld [vmem:[%s13378_s3 + $0x370] sm:$0xff]  ;;  %v7110_v7 = vld [vmem:[%s13378_s3 + $0x378] sm:$0xff] }
 0x41b   : > { %9238 = vmatprep.mubr.f32.mxu1 %v12423_v46  ;;  %10139 = vmatpush3.bf16.msra.mxu1 %v10136_v41  ;;  %v7097_v46 = vld [vmem:[%s13378_s3 + $0x310] sm:$0xff]  ;;  %v7107_v41 = vld [vmem:[%s13378_s3 + $0x360] sm:$0xff] }
 0x41c   : > { %10141 = vmatprep.subr.bf16.mxu1 %v10140_v17 }
 0x41e   : > { %9239 = vmatmul.mubr.f32.gmra.mrb[12].mxu1 %v12420_v43  ;;  %v13662_v43 = vmax.f32 %v12511_v61, 0.0  ;;  %v7105_v61 = vld [vmem:[%s13378_s3 + $0x350] sm:$0xff] }
 0x41f   : > { %9241 = vmatprep.mubr.f32.mxu1 %v12433_v58  ;;  %10143 = vmatpush3.bf16.msra.mxu1 %v10140_v17  ;;  %v13663_v58 = vmax.f32 %v12507_v31, 0.0  ;;  %v13670_v17 = vld [vmem:[#allocation11_spill] sm:$0xff] }
 0x420   : > { %10145 = vmatprep.subr.bf16.mxu1 %v10144_v36 }
 0x422   : > { %9242 = vmatmul.mubr.f32.gmra.mrb[14].mxu1 %v12430_v24  ;;  %v7098_v24 = vld [vmem:[%s13378_s3 + $0x318] sm:$0xff] }
 0x423   : > { %9244 = vmatprep.mubr.f32.mxu1 %v12443_v47  ;;  %10147 = vmatpush3.bf16.msra.mxu1 %v10144_v36  ;;  %v7099_v47 = vld [vmem:[%s13378_s3 + $0x320] sm:$0xff]  ;;  %v10172_v36 = vpack.c.bf16 %v7108_v33, %v7107_v41  ;;  %v7118_v41 = vld [vmem:[%s13378_s3 + $0x3b8] sm:$0xff]  ;;  %v7120_v33 = vld [vmem:[%s13378_s3 + $0x3c8] sm:$0xff] }
 0x424   : > { %10149 = vmatprep.subr.bf16.mxu1 %v10148_v56 }
 0x426   : > { %9245 = vmatmul.mubr.f32.gmra.mrb[16].mxu1 %v12440_v34  ;;  %v10152_v34 = vpack.c.bf16 %v7098_v24, %v7097_v46  ;;  %v7111_v46 = vld [vmem:[%s13378_s3 + $0x380] sm:$0xff]  ;;  %v7112_v24 = vld [vmem:[%s13378_s3 + $0x388] sm:$0xff] }
 0x427   : > { %9247 = vmatprep.mubr.f32.mxu1 %v12453_v51  ;;  %v13664_v51 = vld [vmem:[#allocation5_spill] sm:$0xff] }
 0x42a   : > { %9248 = vmatmul.mubr.f32.gmra.mrb[18].mxu1 %v12450_v19  ;;  %v7100_v19 = vld [vmem:[%s13378_s3 + $0x328] sm:$0xff] }
 0x42b   : > { %9250 = vmatprep.mubr.f32.mxu1 %v12463_v11  ;;  %v7101_v11 = vld [vmem:[%s13378_s3 + $0x330] sm:$0xff] }
 0x42e   : > { %9251 = vmatmul.mubr.f32.gmra.mrb[20].mxu1 %v12460_v20  ;;  %v10156_v20 = vpack.c.bf16 %v7100_v19, %v7099_v47  ;;  %v13675_v47 = vld [vmem:[#allocation16_spill] sm:$0xff]  ;;  %v13677_v19 = vld [vmem:[#allocation18_spill] sm:$0xff] }
 0x42f   : > { %9253 = vmatprep.mubr.f32.mxu1 %v12473_v0  ;;  %v13665_v0 = vld [vmem:[#allocation6_spill] sm:$0xff] }
 0x432   : > { %9254 = vmatmul.mubr.f32.gmra.mrb[22].mxu1 %v12470_v8  ;;  %v7102_v8 = vld [vmem:[%s13378_s3 + $0x338] sm:$0xff] }
 0x433   : > { %9256 = vmatprep.mubr.f32.mxu1 %v12483_v30  ;;  %v10160_v30 = vpack.c.bf16 %v7102_v8, %v7101_v11  ;;  %v13680_v11 = vld [vmem:[#allocation21_spill] sm:$0xff]  ;;  %v13682_v8 = vld [vmem:[#allocation23_spill] sm:$0xff] }
 0x436   : > { %9257 = vmatmul.mubr.f32.gmra.mrb[24].mxu1 %v12480_v1  ;;  %v13666_v1 = vld [vmem:[#allocation7_spill] sm:$0xff] }
 0x437   : > { %9259 = vmatprep.mubr.f32.mxu1 %v12493_v42  ;;  %v7104_v42 = vld [vmem:[%s13378_s3 + $0x348] sm:$0xff] }
 0x43a   : > { %9260 = vmatmul.mubr.f32.gmra.mrb[26].mxu1 %v12490_v52  ;;  %v7103_v52 = vld [vmem:[%s13378_s3 + $0x340] sm:$0xff] }
 0x43b   : > { %9262 = vmatprep.mubr.f32.mxu1 %v12503_v48  ;;  %v13668_v48 = vld [vmem:[#allocation9_spill] sm:$0xff]  ;;  %v10164_v31 = vpack.c.bf16 %v7104_v42, %v7103_v52  ;;  %v13686_v52 = vld [vmem:[#allocation27_spill] sm:$0xff]  ;;  %v13687_v42 = vld [vmem:[#allocation28_spill] sm:$0xff] }
 0x43e   : > { %9263 = vmatmul.mubr.f32.gmra.mrb[28].mxu1 %v12500_v12  ;;  %v13667_v12 = vld [vmem:[#allocation8_spill] sm:$0xff] }
 0x43f   : > { %9265 = vmatprep.mubr.f32.mxu1 %v13662_v43  ;;  %v10176_v43 = vpack.c.bf16 %v7110_v7, %v7109_v32  ;;  %v7128_v32 = vld [vmem:[%s13378_s3 + $0x408] sm:$0xff]  ;;  %v7134_v7 = vld [vmem:[%s13378_s3 + $0x438] sm:$0xff] }
 0x442   : > { %9266 = vmatmul.mubr.f32.gmra.mrb[30].mxu1 %v13663_v58  ;;  %v13674_v58 = vld [vmem:[#allocation15_spill] sm:$0xff] }
 0x443   : > { %9300 = vmatprep.mubr.f32.mxu1 %v12672_v38  ;;  %v13669_v38 = vld [vmem:[#allocation10_spill] sm:$0xff] }
 0x446   : > { %9301 = vmatmul.mubr.f32.vlgmr.msra.gmra.mrb[0].mxu1 %v12675_v54  ;;  %v7106_v54 = vld [vmem:[%s13378_s3 + $0x358] sm:$0xff] }
 0x447   : > { %9303 = vmatprep.mubr.f32.mxu1 %v13664_v51  ;;  %10151 = vmatpush3.bf16.msra.mxu1 %v10148_v56  ;;  %v10168_v28 = vpack.c.bf16 %v7106_v54, %v7105_v61  ;;  %v13673_v56 = vld [vmem:[#allocation14_spill] sm:$0xff]  ;;  %v13678_v51 = vld [vmem:[#allocation19_spill] sm:$0xff]  ;;  %v7113_v61 = vld [vmem:[%s13378_s3 + $0x390] sm:$0xff] }
 0x448   : > { %10153 = vmatprep.subr.bf16.mxu1 %v10152_v34  ;;  %v7114_v54 = vld [vmem:[%s13378_s3 + $0x398] sm:$0xff] }
 0x44a   : > { %9304 = vmatmul.mubr.f32.gmra.mrb[2].mxu1 %v13665_v0  ;;  %v13683_v0 = vld [vmem:[#allocation24_spill] sm:$0xff] }
 0x44b   : > { %9306 = vmatprep.mubr.f32.mxu1 %v13666_v1  ;;  %10155 = vmatpush3.bf16.msra.mxu1 %v10152_v34  ;;  %v10180_v34 = vpack.c.bf16 %v7112_v24, %v7111_v46  ;;  %v13684_v1 = vld [vmem:[#allocation25_spill] sm:$0xff]  ;;  %v7135_v24 = vld [vmem:[%s13378_s3 + $0x440] sm:$0xff] }
 0x44c   : > { %10157 = vmatprep.subr.bf16.mxu1 %v10156_v20 }
 0x44e   : > { %9307 = vmatmul.mubr.f32.gmra.mrb[4].mxu1 %v13667_v12  ;;  %v13688_v12 = vld [vmem:[#allocation29_spill] sm:$0xff] }
 0x44f   : > { %9309 = vmatprep.mubr.f32.mxu1 %v13668_v48  ;;  %10159 = vmatpush3.bf16.msra.mxu1 %v10156_v20  ;;  %v13679_v20 = vld [vmem:[#allocation20_spill] sm:$0xff] }
 0x450   : > { %10161 = vmatprep.subr.bf16.mxu1 %v10160_v30  ;;  %v13056_v48 = vld [vmem:[#allocation2 + $0x209] sm:$0xff] }
 0x452   : > { %9310 = vmatmul.mubr.f32.gmra.mrb[6].mxu1 %v13669_v38  ;;  %v10184_v38 = vpack.c.bf16 %v7114_v54, %v7113_v61  ;;  %v6222_v61 = vld [vmem:[%s13380_s5] sm:$0xff]  ;;  %v6223_v54 = vld [vmem:[%s13380_s5 + $0x8] sm:$0xff] }
 0x453   : > { %9312 = vmatprep.mubr.f32.mxu1 %v13670_v17  ;;  %10163 = vmatpush3.bf16.msra.mxu1 %v10160_v30  ;;  %v13685_v30 = vld [vmem:[#allocation26_spill] sm:$0xff]  ;;  %v7116_v17 = vld [vmem:[%s13378_s3 + $0x3a8] sm:$0xff] }
 0x454   : > { %10165 = vmatprep.subr.bf16.mxu1 %v10164_v31 }
 0x456   : > { %9313 = vmatmul.mubr.f32.gmra.mrb[8].mxu1 %v13671_v60  ;;  %v7122_v60 = vld [vmem:[%s13378_s3 + $0x3d8] sm:$0xff] }
 0x457   : > { %9315 = vmatprep.mubr.f32.mxu1 %v13672_v59  ;;  %10167 = vmatpush3.bf16.msra.mxu1 %v10164_v31  ;;  %v13059_v31 = vld [vmem:[#allocation2 + $0x211] sm:$0xff]  ;;  %v7124_v59 = vld [vmem:[%s13378_s3 + $0x3e8] sm:$0xff] }
 0x458   : > { %10169 = vmatprep.subr.bf16.mxu1 %v10168_v28 }
 0x45a   : > { %9316 = vmatmul.mubr.f32.gmra.mrb[10].mxu1 %v13673_v56  ;;  %v13695_v56 = vld [vmem:[#allocation34_spill] sm:$0xff] }
 0x45b   : > { %9318 = vmatprep.mubr.f32.mxu1 %v12744_v14  ;;  %10171 = vmatpush3.bf16.msra.mxu1 %v10168_v28  ;;  %v13676_v14 = vld [vmem:[#allocation17_spill] sm:$0xff] }
 0x45c   : > { %10173 = vmatprep.subr.bf16.mxu1 %v10172_v36 }
 0x45e   : > { %9319 = vmatmul.mubr.f32.gmra.mrb[12].mxu1 %v12747_v53  ;;  %v13681_v53 = vld [vmem:[#allocation22_spill] sm:$0xff] }
 0x45f   : > { %9321 = vmatprep.mubr.f32.mxu1 %v13674_v58  ;;  %10175 = vmatpush3.bf16.msra.mxu1 %v10172_v36  ;;  %v7126_v36 = vld [vmem:[%s13378_s3 + $0x3f8] sm:$0xff]  ;;  %v7136_v58 = vld [vmem:[%s13378_s3 + $0x448] sm:$0xff] }
 0x460   : > { %10177 = vmatprep.subr.bf16.mxu1 %v10176_v43 }
 0x462   : > { %9322 = vmatmul.mubr.f32.gmra.mrb[14].mxu1 %v13675_v47  ;;  %v10228_v47 = vpack.c.bf16 %v7136_v58, %v7135_v24  ;;  %v5854_v58 = vld [vmem:[#allocation2 + $0xd1] sm:$0xff] }
 0x463   : > { %9324 = vmatprep.mubr.f32.mxu1 %v13676_v14  ;;  %10179 = vmatpush3.bf16.msra.mxu1 %v10176_v43  ;;  %v13696_v43 = vld [vmem:[#allocation35_spill] sm:$0xff]  ;;  %v7137_v14 = vld [vmem:[%s13378_s3 + $0x450] sm:$0xff] }
 0x464   : > { %10181 = vmatprep.subr.bf16.mxu1 %v10180_v34 }
 0x466   : > { %9325 = vmatmul.mubr.f32.gmra.mrb[16].mxu1 %v13677_v19  ;;  %v7138_v19 = vld [vmem:[%s13378_s3 + $0x458] sm:$0xff] }
 0x467   : > { %9327 = vmatprep.mubr.f32.mxu1 %v13678_v51  ;;  %v5547_v51 = vld [vmem:[#allocation2 + $0xc8] sm:$0xff] }
 0x46a   : > { %9328 = vmatmul.mubr.f32.gmra.mrb[18].mxu1 %v13679_v20  ;;  %v5548_v20 = vld [vmem:[#allocation2 + $0xd0] sm:$0xff] }
 0x46b   : > { %9330 = vmatprep.mubr.f32.mxu1 %v13680_v11  ;;  %v7139_v11 = vld [vmem:[%s13378_s3 + $0x460] sm:$0xff] }
 0x46e   : > { %9331 = vmatmul.mubr.f32.gmra.mrb[20].mxu1 %v13681_v53  ;;  %v7140_v53 = vld [vmem:[%s13378_s3 + $0x468] sm:$0xff] }
 0x46f   : > { %9333 = vmatprep.mubr.f32.mxu1 %v13682_v8  ;;  %v5549_v8 = vld [vmem:[#allocation2 + $0xe8] sm:$0xff] }
 0x472   : > { %9334 = vmatmul.mubr.f32.gmra.mrb[22].mxu1 %v13683_v0  ;;  %v5550_v0 = vld [vmem:[#allocation2 + $0xf0] sm:$0xff] }
 0x473   : > { %9336 = vmatprep.mubr.f32.mxu1 %v13684_v1  ;;  %v7141_v1 = vld [vmem:[%s13378_s3 + $0x470] sm:$0xff] }
 0x476   : > { %9337 = vmatmul.mubr.f32.gmra.mrb[24].mxu1 %v13685_v30  ;;  %v7142_v30 = vld [vmem:[%s13378_s3 + $0x478] sm:$0xff] }
 0x477   : > { %9339 = vmatprep.mubr.f32.mxu1 %v13686_v52  ;;  %v5551_v52 = vld [vmem:[#allocation2 + $0x108] sm:$0xff] }
 0x47a   : > { %9340 = vmatmul.mubr.f32.gmra.mrb[26].mxu1 %v13687_v42  ;;  %v10240_v42 = vpack.c.bf16 %v7142_v30, %v7141_v1  ;;  %v5861_v1 = vld [vmem:[#allocation2 + $0x149] sm:$0xff]  ;;  %v5862_v30 = vld [vmem:[#allocation2 + $0x151] sm:$0xff] }
 0x47b   : > { %9342 = vmatprep.mubr.f32.mxu1 %v13688_v12  ;;  %v5552_v12 = vld [vmem:[#allocation2 + $0x110] sm:$0xff] }
 0x47e   : > { %9343 = vmatmul.mubr.f32.gmra.mrb[28].mxu1 %v12795_v26  ;;  %v7115_v26 = vld [vmem:[%s13378_s3 + $0x3a0] sm:$0xff] }
 0x47f   : > { %9345 = vmatprep.mubr.f32.mxu1 %v13056_v48  ;;  %v10188_v28 = vpack.c.bf16 %v7116_v17, %v7115_v26  ;;  %v10244_v26 = vpack.c.bf16 %v6223_v54, %v6222_v61  ;;  %v5554_v17 = vld [vmem:[#allocation2 + $0x130] sm:$0xff] }
 0x480   : > { %v5866_v61 = vld [vmem:[#allocation2 + $0x191] sm:$0xff]  ;;  %v5867_v54 = vld [vmem:[#allocation2 + $0x1a9] sm:$0xff] }
 0x482   : > { %9346 = vmatmul.mubr.f32.gmra.mrb[30].mxu1 %v13059_v31 }
 0x483   : > { %9380 = vmatprep.mubr.f32.mxu1 %v12546_v63  ;;  %v7117_v63 = vld [vmem:[%s13378_s3 + $0x3b0] sm:$0xff] }
 0x486   : > { %9381 = vmatmul.mubr.f32.vlgmr.msra.gmra.mrb[0].mxu1 %v12549_v2  ;;  %v10192_v2 = vpack.c.bf16 %v7118_v41, %v7117_v63  ;;  %v5556_v63 = vld [vmem:[#allocation2 + $0x150] sm:$0xff]  ;;  %v5557_v41 = vld [vmem:[#allocation2 + $0x168] sm:$0xff] }
 0x487   : > { %9383 = vmatprep.mubr.f32.mxu1 %v12558_v55  ;;  %10183 = vmatpush3.bf16.msra.mxu1 %v10180_v34  ;;  %v7119_v55 = vld [vmem:[%s13378_s3 + $0x3c0] sm:$0xff]  ;;  %v13697_v34 = vld [vmem:[#allocation36_spill] sm:$0xff] }
 0x488   : > { %10185 = vmatprep.subr.bf16.mxu1 %v10184_v38 }
 0x48a   : > { %9384 = vmatmul.mubr.f32.gmra.mrb[2].mxu1 %v12561_v4  ;;  %v10196_v4 = vpack.c.bf16 %v7120_v33, %v7119_v55  ;;  %v5559_v55 = vld [vmem:[#allocation2 + $0x188] sm:$0xff]  ;;  %v5560_v33 = vld [vmem:[#allocation2 + $0x190] sm:$0xff] }
 0x48b   : > { %9386 = vmatprep.mubr.f32.mxu1 %v12570_v13  ;;  %10187 = vmatpush3.bf16.msra.mxu1 %v10184_v38  ;;  %v7121_v13 = vld [vmem:[%s13378_s3 + $0x3d0] sm:$0xff]  ;;  %v5553_v38 = vld [vmem:[#allocation2 + $0x128] sm:$0xff] }
 0x48c   : > { %10189 = vmatprep.subr.bf16.mxu1 %v10188_v28 }
 0x48e   : > { %9387 = vmatmul.mubr.f32.gmra.mrb[4].mxu1 %v12573_v5  ;;  %v10200_v5 = vpack.c.bf16 %v7122_v60, %v7121_v13  ;;  %v5562_v13 = vld [vmem:[#allocation2 + $0x1b0] sm:$0xff]  ;;  %v5563_v60 = vld [vmem:[#allocation2 + $0x1c8] sm:$0xff] }
 0x48f   : > { %9389 = vmatprep.mubr.f32.mxu1 %v12582_v22  ;;  %10191 = vmatpush3.bf16.msra.mxu1 %v10188_v28  ;;  %v7123_v22 = vld [vmem:[%s13378_s3 + $0x3e0] sm:$0xff]  ;;  %v5555_v28 = vld [vmem:[#allocation2 + $0x148] sm:$0xff] }
 0x490   : > { %10193 = vmatprep.subr.bf16.mxu1 %v10192_v2 }
 0x492   : > { %9390 = vmatmul.mubr.f32.gmra.mrb[6].mxu1 %v12585_v10  ;;  %v10204_v10 = vpack.c.bf16 %v7124_v59, %v7123_v22  ;;  %v5565_v22 = vld [vmem:[#allocation2 + $0x1e8] sm:$0xff]  ;;  %v5566_v59 = vld [vmem:[#allocation2 + $0x1f0] sm:$0xff] }
 0x493   : > { %9392 = vmatprep.mubr.f32.mxu1 %v12594_v9  ;;  %10195 = vmatpush3.bf16.msra.mxu1 %v10192_v2  ;;  %v7125_v9 = vld [vmem:[%s13378_s3 + $0x3f0] sm:$0xff] }
 0x494   : > { %10197 = vmatprep.subr.bf16.mxu1 %v10196_v4  ;;  %v5558_v2 = vld [vmem:[#allocation2 + $0x170] sm:$0xff] }
 0x496   : > { %9393 = vmatmul.mubr.f32.gmra.mrb[8].mxu1 %v12597_v23  ;;  %v10208_v23 = vpack.c.bf16 %v7126_v36, %v7125_v9  ;;  %v5568_v9 = vld [vmem:[#allocation2 + $0x210] sm:$0xff]  ;;  %v10926_v36 = vld [vmem:[#allocation2] sm:$0xff] }
 0x497   : > { %9395 = vmatprep.mubr.f32.mxu1 %v12606_v45  ;;  %10199 = vmatpush3.bf16.msra.mxu1 %v10196_v4  ;;  %v7127_v45 = vld [vmem:[%s13378_s3 + $0x400] sm:$0xff]  ;;  %v5561_v4 = vld [vmem:[#allocation2 + $0x1a8] sm:$0xff] }
 0x498   : > { %10201 = vmatprep.subr.bf16.mxu1 %v10200_v5 }
 0x49a   : > { %9396 = vmatmul.mubr.f32.gmra.mrb[10].mxu1 %v12609_v37  ;;  %v10212_v37 = vpack.c.bf16 %v7128_v32, %v7127_v45  ;;  %v6225_v45 = vld [vmem:[%s13380_s5 + $0x18] sm:$0xff]  ;;  %v5845_v32 = vld [vmem:[#allocation2 + $0x49] sm:$0xff] }
 0x49b   : > { %9398 = vmatprep.mubr.f32.mxu1 %v12612_v40  ;;  %10203 = vmatpush3.bf16.msra.mxu1 %v10200_v5  ;;  %v13689_v40 = vld [vmem:[#allocation3_spill] sm:$0xff]  ;;  %v5564_v5 = vld [vmem:[#allocation2 + $0x1d0] sm:$0xff] }
 0x49c   : > { %10205 = vmatprep.subr.bf16.mxu1 %v10204_v10 }
 0x49e   : > { %9399 = vmatmul.mubr.f32.gmra.mrb[12].mxu1 %v12615_v27  ;;  %v13690_v27 = vld [vmem:[#allocation4_spill] sm:$0xff] }
 0x49f   : > { %9401 = vmatprep.mubr.f32.mxu1 %v12618_v44  ;;  %10207 = vmatpush3.bf16.msra.mxu1 %v10204_v10  ;;  %v13691_v44 = vld [vmem:[#allocation30_spill] sm:$0xff]  ;;  %v5567_v10 = vld [vmem:[#allocation2 + $0x208] sm:$0xff] }
 0x4a0   : > { %10209 = vmatprep.subr.bf16.mxu1 %v10208_v23 }
 0x4a2   : > { %9402 = vmatmul.mubr.f32.gmra.mrb[14].mxu1 %v12621_v18  ;;  %v5263_v18 = vld [vmem:[#allocation2 + $0x227] sm:$0xff] }
 0x4a3   : > { %9404 = vmatprep.mubr.f32.mxu1 %v12624_v50  ;;  %10211 = vmatpush3.bf16.msra.mxu1 %v10208_v23  ;;  %v13692_v50 = vld [vmem:[#allocation31_spill] sm:$0xff]  ;;  %v6224_v23 = vld [vmem:[%s13380_s5 + $0x10] sm:$0xff] }
 0x4a4   : > { %10213 = vmatprep.subr.bf16.mxu1 %v10212_v37 }
 0x4a6   : > { %9405 = vmatmul.mubr.f32.gmra.mrb[16].mxu1 %v12627_v29  ;;  %v5264_v29 = vld [vmem:[#allocation2 + $0x22f] sm:$0xff] }
 0x4a7   : > { %9407 = vmatprep.mubr.f32.mxu1 %v12630_v62  ;;  %v7129_v62 = vld [vmem:[%s13378_s3 + $0x410] sm:$0xff] }
 0x4aa   : > { %9408 = vmatmul.mubr.f32.gmra.mrb[18].mxu1 %v12633_v21  ;;  %v7130_v21 = vld [vmem:[%s13378_s3 + $0x418] sm:$0xff] }
 0x4ab   : > { %9410 = vmatprep.mubr.f32.mxu1 %v12636_v57  ;;  %v10216_v57 = vpack.c.bf16 %v7130_v21, %v7129_v62  ;;  %v6228_v62 = vld [vmem:[%s13380_s5 + $0x30] sm:$0xff]  ;;  %v6229_v21 = vld [vmem:[%s13380_s5 + $0x38] sm:$0xff] }
 0x4ae   : > { %9411 = vmatmul.mubr.f32.gmra.mrb[20].mxu1 %v12639_v35  ;;  %v7131_v35 = vld [vmem:[%s13378_s3 + $0x420] sm:$0xff] }
 0x4af   : > { %9413 = vmatprep.mubr.f32.mxu1 %v12642_v49  ;;  %v7132_v49 = vld [vmem:[%s13378_s3 + $0x428] sm:$0xff] }
 0x4b2   : > { %9414 = vmatmul.mubr.f32.gmra.mrb[22].mxu1 %v12645_v3  ;;  %v13693_v3 = vld [vmem:[#allocation32_spill] sm:$0xff] }
 0x4b3   : > { %9416 = vmatprep.mubr.f32.mxu1 %v12648_v15  ;;  %v13694_v15 = vld [vmem:[#allocation33_spill] sm:$0xff] }
 0x4b6   : > { %9417 = vmatmul.mubr.f32.gmra.mrb[24].mxu1 %v12651_v6  ;;  %v10220_v6 = vpack.c.bf16 %v7132_v49, %v7131_v35  ;;  %v10256_v35 = vpack.c.bf16 %v6229_v21, %v6228_v62  ;;  %v5850_v49 = vld [vmem:[#allocation2 + $0x91] sm:$0xff]  ;;  %v7167_v62 = vld [vmem:[%s11019_s26 + $0x129] sm:$0xff]  ;;  %v7168_v21 = vld [vmem:[%s11019_s26 + $0x139] sm:$0xff] }
 0x4b7   : > { %9419 = vmatprep.mubr.f32.mxu1 %v13689_v40  ;;  %v5846_v40 = vld [vmem:[#allocation2 + $0x51] sm:$0xff] }
 0x4ba   : > { %9420 = vmatmul.mubr.f32.gmra.mrb[26].mxu1 %v13690_v27  ;;  %v6226_v27 = vld [vmem:[%s13380_s5 + $0x20] sm:$0xff] }
 0x4bb   : > { %9422 = vmatprep.mubr.f32.mxu1 %v13691_v44  ;;  %v6227_v44 = vld [vmem:[%s13380_s5 + $0x28] sm:$0xff] }
 0x4be   : > { %9423 = vmatmul.mubr.f32.gmra.mrb[28].mxu1 %v13692_v50  ;;  %v10252_v50 = vpack.c.bf16 %v6227_v44, %v6226_v27  ;;  %v7162_v27 = vld [vmem:[%s11019_s26 + $0xf1] sm:$0xff]  ;;  %v7163_v44 = vld [vmem:[%s11019_s26 + $0xf9] sm:$0xff] }
 0x4bf   : > { %9425 = vmatprep.mubr.f32.mxu1 %v5263_v18  ;;  %v5847_v18 = vld [vmem:[#allocation2 + $0x69] sm:$0xff] }
 0x4c2   : > { %9426 = vmatmul.mubr.f32.gmra.mrb[30].mxu1 %v5264_v29  ;;  %v5848_v29 = vld [vmem:[#allocation2 + $0x71] sm:$0xff] }
 0x4c3   : > { %9460 = vmatprep.mubr.f32.mxu1 %v12894_v25  ;;  %v7133_v25 = vld [vmem:[%s13378_s3 + $0x430] sm:$0xff] }
 0x4c4   : > { %v10224_v46 = vpack.c.bf16 %v7134_v7, %v7133_v25  ;;  %v5852_v7 = vld [vmem:[#allocation2 + $0xb1] sm:$0xff] }
 0x4c6   : > { %9461 = vmatmul.mubr.f32.vlgmr.msra.gmra.mrb[0].mxu1 %v13693_v3  ;;  %v6230_v3 = vld [vmem:[%s13380_s5 + $0x40] sm:$0xff] }
 0x4c7   : > { %9463 = vmatprep.mubr.f32.mxu1 %v13694_v15  ;;  %10215 = vmatpush3.bf16.msra.mxu1 %v10212_v37  ;;  %v10248_v37 = vpack.c.bf16 %v6225_v45, %v6224_v23  ;;  %v6231_v15 = vld [vmem:[%s13380_s5 + $0x48] sm:$0xff]  ;;  %v7157_v23 = vld [vmem:[%s11019_s26 + $0xb1] sm:$0xff] }
 0x4c8   : > { %10217 = vmatprep.subr.bf16.mxu1 %v10216_v57  ;;  %v10260_v25 = vpack.c.bf16 %v6231_v15, %v6230_v3  ;;  %v7158_v45 = vld [vmem:[%s11019_s26 + $0xc1] sm:$0xff]  ;;  %v7172_v3 = vld [vmem:[%s11019_s26 + $0x169] sm:$0xff]  ;;  %v7173_v15 = vld [vmem:[%s11019_s26 + $0x171] sm:$0xff] }
 0x4ca   : > { %9464 = vmatmul.mubr.f32.gmra.mrb[2].mxu1 %v13695_v56  ;;  %v6232_v56 = vld [vmem:[%s13380_s5 + $0x50] sm:$0xff] }
 0x4cb   : > { %9466 = vmatprep.mubr.f32.mxu1 %v13696_v43  ;;  %10219 = vmatpush3.bf16.msra.mxu1 %v10216_v57  ;;  %v5849_v57 = vld [vmem:[#allocation2 + $0x89] sm:$0xff]  ;;  %v6233_v43 = vld [vmem:[%s13380_s5 + $0x58] sm:$0xff] }
 0x4cc   : > { %10221 = vmatprep.subr.bf16.mxu1 %v10220_v6  ;;  %v10264_v24 = vpack.c.bf16 %v6233_v43, %v6232_v56  ;;  %v7143_v56 = vld [vmem:[%s13379_s4] ss:$0 sm:$0xff] }
 0x4cd   : > { %v7176_v43 = vld [vmem:[%s13381_s6] ss:$0 sm:$0xff] }
 0x4ce   : > { %9467 = vmatmul.mubr.f32.gmra.mrb[4].mxu1 %v12921_v39  ;;  %v10232_v39 = vpack.c.bf16 %v7138_v19, %v7137_v14  ;;  %v5855_v14 = vld [vmem:[#allocation2 + $0xe9] sm:$0xff] }
 0x4cf   : > { %9469 = vmatprep.mubr.f32.mxu1 %v13697_v34  ;;  %10223 = vmatpush3.bf16.msra.mxu1 %v10220_v6  ;;  %v5851_v6 = vld [vmem:[#allocation2 + $0xa9] sm:$0xff]  ;;  %v6234_v34 = vld [vmem:[%s13380_s5 + $0x60] sm:$0xff] }
 0x4d0   : > { %10225 = vmatprep.subr.bf16.mxu1 %v10224_v46 }
 0x4d2   : > { %9470 = vmatmul.mubr.f32.gmra.mrb[6].mxu1 %v12933_v16  ;;  %v10236_v16 = vpack.c.bf16 %v7140_v53, %v7139_v11  ;;  %v5857_v11 = vld [vmem:[#allocation2 + $0x109] sm:$0xff] }
 0x4d3   : > { %9472 = vmatprep.mubr.f32.mxu1 %v5547_v51  ;;  %10227 = vmatpush3.bf16.msra.mxu1 %v10224_v46  ;;  %v5853_v46 = vld [vmem:[#allocation2 + $0xc9] sm:$0xff]  ;;  %v5856_v51 = vld [vmem:[#allocation2 + $0xf1] sm:$0xff] }
 0x4d4   : > { %10229 = vmatprep.subr.bf16.mxu1 %v10228_v47 }
 0x4d6   : > { %9473 = vmatmul.mubr.f32.gmra.mrb[8].mxu1 %v5548_v20  ;;  %v6237_v20 = vld [vmem:[%s13380_s5 + $0x78] sm:$0xff] }
 0x4d7   : > { %9475 = vmatprep.mubr.f32.mxu1 %v5549_v8  ;;  %10231 = vmatpush3.bf16.msra.mxu1 %v10228_v47  ;;  %v6235_v47 = vld [vmem:[%s13380_s5 + $0x68] sm:$0xff]  ;;  %v5858_v8 = vld [vmem:[#allocation2 + $0x111] sm:$0xff] }
 0x4d8   : > { %10233 = vmatprep.subr.bf16.mxu1 %v10232_v39  ;;  %v10268_v19 = vpack.c.bf16 %v6235_v47, %v6234_v34 }
 0x4da   : > { %9476 = vmatmul.mubr.f32.gmra.mrb[10].mxu1 %v5550_v0  ;;  %v5860_v0 = vld [vmem:[#allocation2 + $0x131] sm:$0xff] }
 0x4db   : > { %9478 = vmatprep.mubr.f32.mxu1 %v5551_v52  ;;  %10235 = vmatpush3.bf16.msra.mxu1 %v10232_v39  ;;  %v6236_v39 = vld [vmem:[%s13380_s5 + $0x70] sm:$0xff] }
 0x4dc   : > { %10237 = vmatprep.subr.bf16.mxu1 %v10236_v16  ;;  %v10272_v53 = vpack.c.bf16 %v6237_v20, %v6236_v39  ;;  %v5863_v52 = vld [vmem:[#allocation2 + $0x169] sm:$0xff] }
 0x4de   : > { %9479 = vmatmul.mubr.f32.gmra.mrb[12].mxu1 %v5552_v12  ;;  %v5865_v12 = vld [vmem:[#allocation2 + $0x189] sm:$0xff] }
 0x4df   : > { %9481 = vmatprep.mubr.f32.mxu1 %v5553_v38  ;;  %10239 = vmatpush3.bf16.msra.mxu1 %v10236_v16  ;;  %v5859_v16 = vld [vmem:[#allocation2 + $0x129] sm:$0xff]  ;;  %v5868_v38 = vld [vmem:[#allocation2 + $0x1b1] sm:$0xff] }
 0x4e0   : > { %10241 = vmatprep.subr.bf16.mxu1 %v10240_v42 }
 0x4e2   : > { %9482 = vmatmul.mubr.f32.gmra.mrb[14].mxu1 %v5554_v17  ;;  %v5870_v17 = vld [vmem:[#allocation2 + $0x1d1] sm:$0xff] }
 0x4e3   : > { %9484 = vmatprep.mubr.f32.mxu1 %v5555_v28  ;;  %10243 = vmatpush3.bf16.msra.mxu1 %v10240_v42  ;;  %v5864_v42 = vld [vmem:[#allocation2 + $0x171] sm:$0xff]  ;;  %v5871_v28 = vld [vmem:[#allocation2 + $0x1e9] sm:$0xff] }
 0x4e4   : > { %10245 = vmatprep.subr.bf16.mxu1 %v10244_v26 }
 0x4e6   : > { %9485 = vmatmul.mubr.f32.gmra.mrb[16].mxu1 %v5556_v63  ;;  %v5872_v63 = vld [vmem:[#allocation2 + $0x1f1] sm:$0xff] }
 0x4e7   : > { %9487 = vmatprep.mubr.f32.mxu1 %v5557_v41  ;;  %v5875_v41 = vld [vmem:[#allocation2 + $0x229] sm:$0xff] }
 0x4ea   : > { %9488 = vmatmul.mubr.f32.gmra.mrb[18].mxu1 %v5558_v2  ;;  %v5876_v2 = vld [vmem:[#allocation2 + $0x231] sm:$0xff] }
 0x4eb   : > { %9490 = vmatprep.mubr.f32.mxu1 %v5559_v55  ;;  %v7144_v55 = vld [vmem:[%s11019_s26 + $0x19] sm:$0xff] }
 0x4ee   : > { %9491 = vmatmul.mubr.f32.gmra.mrb[20].mxu1 %v5560_v33  ;;  %v7145_v33 = vld [vmem:[%s11019_s26 + $0x21] sm:$0xff] }
 0x4ef   : > { %9493 = vmatprep.mubr.f32.mxu1 %v5561_v4  ;;  %v7146_v4 = vld [vmem:[%s11019_s26 + $0x31] sm:$0xff] }
 0x4f2   : > { %9494 = vmatmul.mubr.f32.gmra.mrb[22].mxu1 %v5562_v13  ;;  %v7147_v13 = vld [vmem:[%s11019_s26 + $0x39] sm:$0xff] }
 0x4f3   : > { %9496 = vmatprep.mubr.f32.mxu1 %v5563_v60  ;;  %v7150_v60 = vld [vmem:[%s11019_s26 + $0x61] sm:$0xff] }
 0x4f6   : > { %9497 = vmatmul.mubr.f32.gmra.mrb[24].mxu1 %v5564_v5  ;;  %v7151_v5 = vld [vmem:[%s11019_s26 + $0x69] sm:$0xff] }
 0x4f7   : > { %9499 = vmatprep.mubr.f32.mxu1 %v5565_v22  ;;  %v7152_v22 = vld [vmem:[%s11019_s26 + $0x79] sm:$0xff] }
 0x4fa   : > { %9500 = vmatmul.mubr.f32.gmra.mrb[26].mxu1 %v5566_v59  ;;  %v7153_v59 = vld [vmem:[%s11019_s26 + $0x81] sm:$0xff] }
 0x4fb   : > { %9502 = vmatprep.mubr.f32.mxu1 %v5567_v10  ;;  %v7154_v10 = vld [vmem:[%s11019_s26 + $0x91] sm:$0xff] }
 0x4fe   : > { %9503 = vmatmul.mubr.f32.gmra.mrb[28].mxu1 %v5568_v9  ;;  %v7155_v9 = vld [vmem:[%s11019_s26 + $0x99] sm:$0xff] }
 0x4ff   : > { %9505 = vmatprep.mubr.f32.mxu1 %v10926_v36 }
 0x502   : > { %9506 = vmatmul.mubr.f32.gmra.mrb[30].mxu1 %v10926_v36  ;;  %v7156_v36 = vld [vmem:[%s11019_s26 + $0xa9] sm:$0xff] }
 0x503   : > { %9540 = vmatprep.mubr.f32.mxu1 %v5845_v32  ;;  %v7159_v32 = vld [vmem:[%s11019_s26 + $0xc9] sm:$0xff] }
 0x506   : > { %9541 = vmatmul.mubr.f32.vlgmr.msra.gmra.mrb[0].mxu1 %v5846_v40  ;;  %v7161_v40 = vld [vmem:[%s11019_s26 + $0xe1] sm:$0xff] }
 0x507   : > { %9543 = vmatprep.mubr.f32.mxu1 %v5847_v18  ;;  %10247 = vmatpush3.bf16.msra.mxu1 %v10244_v26  ;;  %v5869_v26 = vld [vmem:[#allocation2 + $0x1c9] sm:$0xff] }
 0x508   : > { %10249 = vmatprep.subr.bf16.mxu1 %v10248_v37  ;;  %v7164_v18 = vld [vmem:[%s11019_s26 + $0x109] sm:$0xff] }
 0x50a   : > { %9544 = vmatmul.mubr.f32.gmra.mrb[2].mxu1 %v5848_v29  ;;  %v7166_v29 = vld [vmem:[%s11019_s26 + $0x121] sm:$0xff] }
 0x50b   : > { %9546 = vmatprep.mubr.f32.mxu1 %v5849_v57  ;;  %10251 = vmatpush3.bf16.msra.mxu1 %v10248_v37  ;;  %v7160_v37 = vld [vmem:[%s11019_s26 + $0xd9] sm:$0xff]  ;;  %v7169_v57 = vld [vmem:[%s11019_s26 + $0x141] sm:$0xff] }
 0x50c   : > { %10253 = vmatprep.subr.bf16.mxu1 %v10252_v50 }
 0x50e   : > { %9547 = vmatmul.mubr.f32.gmra.mrb[4].mxu1 %v5850_v49  ;;  %v7171_v49 = vld [vmem:[%s11019_s26 + $0x159] sm:$0xff] }
 0x50f   : > { %9549 = vmatprep.mubr.f32.mxu1 %v5851_v6  ;;  %10255 = vmatpush3.bf16.msra.mxu1 %v10252_v50  ;;  %v7165_v50 = vld [vmem:[%s11019_s26 + $0x111] sm:$0xff]  ;;  %v7174_v6 = vld [vmem:[%s11019_s26 + $0x181] sm:$0xff] }
 0x510   : > { %10257 = vmatprep.subr.bf16.mxu1 %v10256_v35 }
 0x512   : > { %9550 = vmatmul.mubr.f32.gmra.mrb[6].mxu1 %v5852_v7  ;;  %v6503_v7 = vld [vmem:[%s13382_s7 + $0x8] sm:$0xff] }
 0x513   : > { %9552 = vmatprep.mubr.f32.mxu1 %v5853_v46  ;;  %10259 = vmatpush3.bf16.msra.mxu1 %v10256_v35  ;;  %v7170_v35 = vld [vmem:[%s11019_s26 + $0x151] sm:$0xff] }
 0x514   : > { %10261 = vmatprep.subr.bf16.mxu1 %v10260_v25  ;;  %6582 = vmatprep.mubr.f32.mxu0 %v6503_v7 }
 0x516   : > { %9553 = vmatmul.mubr.f32.gmra.mrb[8].mxu1 %v5854_v58  ;;  %v13281_v58 = vadd.f32 %v7176_v43, %v7143_v56 }
 0x517   : > { %9555 = vmatprep.mubr.f32.mxu1 %v5855_v14  ;;  %10263 = vmatpush3.bf16.msra.mxu1 %v10260_v25  ;;  %v7175_v25 = vld [vmem:[%s11019_s26 + $0x189] sm:$0xff] }
 0x518   : > { %10265 = vmatprep.subr.bf16.mxu1 %v10264_v24 }
 0x51a   : > { %9556 = vmatmul.mubr.f32.gmra.mrb[10].mxu1 %v5856_v51 }
 0x51b   : > { %9558 = vmatprep.mubr.f32.mxu1 %v5857_v11  ;;  %10267 = vmatpush3.bf16.msra.mxu1 %v10264_v24 }
 0x51c   : > { %10269 = vmatprep.subr.bf16.mxu1 %v10268_v19 }
 0x51e   : > { %9559 = vmatmul.mubr.f32.gmra.mrb[12].mxu1 %v5858_v8 }
 0x51f   : > { %9561 = vmatprep.mubr.f32.mxu1 %v5859_v16  ;;  %10271 = vmatpush3.bf16.msra.mxu1 %v10268_v19 }
 0x520   : > { %10273 = vmatprep.subr.bf16.mxu1 %v10272_v53 }
 0x522   : > { %9562 = vmatmul.mubr.f32.gmra.mrb[14].mxu1 %v5860_v0 }
 0x523   : > { %9564 = vmatprep.mubr.f32.mxu1 %v5861_v1  ;;  %10275 = vmatpush3.bf16.msra.mxu1 %v10272_v53 }
 0x526   : > { %9565 = vmatmul.mubr.f32.gmra.mrb[16].mxu1 %v5862_v30 }
 0x527   : > { %9567 = vmatprep.mubr.f32.mxu1 %v5863_v52 }
 0x52a   : > { %9568 = vmatmul.mubr.f32.gmra.mrb[18].mxu1 %v5864_v42 }
 0x52b   : > { %9570 = vmatprep.mubr.f32.mxu1 %v5865_v12 }
 0x52e   : > { %9571 = vmatmul.mubr.f32.gmra.mrb[20].mxu1 %v5866_v61 }
 0x52f   : > { %9573 = vmatprep.mubr.f32.mxu1 %v5867_v54 }
 0x532   : > { %9574 = vmatmul.mubr.f32.gmra.mrb[22].mxu1 %v5868_v38 }
 0x533   : > { %9576 = vmatprep.mubr.f32.mxu1 %v5869_v26 }
 0x536   : > { %9577 = vmatmul.mubr.f32.gmra.mrb[24].mxu1 %v5870_v17 }
 0x537   : > { %9579 = vmatprep.mubr.f32.mxu1 %v5871_v28 }
 0x53a   : > { %9580 = vmatmul.mubr.f32.gmra.mrb[26].mxu1 %v5872_v63 }
 0x53b   : > { %9582 = vmatprep.mubr.f32.mxu1 %v13056_v48  ;;  %v7148_v48 = vld [vmem:[%s11019_s26 + $0x49] sm:$0xff] }
 0x53e   : > { %9583 = vmatmul.mubr.f32.gmra.mrb[28].mxu1 %v13059_v31  ;;  %v7149_v31 = vld [vmem:[%s11019_s26 + $0x51] sm:$0xff] }
 0x53f   : > { %9585 = vmatprep.mubr.f32.mxu1 %v5875_v41 }
 0x542   : > { %9586 = vmatmul.mubr.f32.gmra.mrb[30].mxu1 %v5876_v2 }
 0x543   : > { %9620 = vmatprep.mubr.f32.mxu1 %v7144_v55 }
 0x546   : > { %9621 = vmatmul.mubr.f32.vlgmr.msra.gmra.mrb[0].mxu1 %v7145_v33 }
 0x547   : > { %9623 = vmatprep.mubr.f32.mxu1 %v7146_v4 }
 0x54a   : > { %9624 = vmatmul.mubr.f32.gmra.mrb[2].mxu1 %v7147_v13 }
 0x54b   : > { %9626 = vmatprep.mubr.f32.mxu1 %v7148_v48 }
 0x54e   : > { %9627 = vmatmul.mubr.f32.gmra.mrb[4].mxu1 %v7149_v31 }
 0x54f   : > { %9629 = vmatprep.mubr.f32.mxu1 %v7150_v60 }
 0x552   : > { %9630 = vmatmul.mubr.f32.gmra.mrb[6].mxu1 %v7151_v5 }
 0x553   : > { %9632 = vmatprep.mubr.f32.mxu1 %v7152_v22 }
 0x556   : > { %9633 = vmatmul.mubr.f32.gmra.mrb[8].mxu1 %v7153_v59 }
 0x557   : > { %9635 = vmatprep.mubr.f32.mxu1 %v7154_v10 }
 0x55a   : > { %9636 = vmatmul.mubr.f32.gmra.mrb[10].mxu1 %v7155_v9 }
 0x55b   : > { %9638 = vmatprep.mubr.f32.mxu1 %v7156_v36 }
 0x55e   : > { %9639 = vmatmul.mubr.f32.gmra.mrb[12].mxu1 %v7157_v23 }
 0x55f   : > { %9641 = vmatprep.mubr.f32.mxu1 %v7158_v45 }
 0x562   : > { %9642 = vmatmul.mubr.f32.gmra.mrb[14].mxu1 %v7159_v32 }
 0x563   : > { %9644 = vmatprep.mubr.f32.mxu1 %v7160_v37 }
 0x566   : > { %9645 = vmatmul.mubr.f32.gmra.mrb[16].mxu1 %v7161_v40 }
 0x567   : > { %9647 = vmatprep.mubr.f32.mxu1 %v7162_v27 }
 0x56a   : > { %9648 = vmatmul.mubr.f32.gmra.mrb[18].mxu1 %v7163_v44 }
 0x56b   : > { %9650 = vmatprep.mubr.f32.mxu1 %v7164_v18 }
 0x56e   : > { %9651 = vmatmul.mubr.f32.gmra.mrb[20].mxu1 %v7165_v50 }
 0x56f   : > { %9653 = vmatprep.mubr.f32.mxu1 %v7166_v29 }
 0x572   : > { %9654 = vmatmul.mubr.f32.gmra.mrb[22].mxu1 %v7167_v62 }
 0x573   : > { %9656 = vmatprep.mubr.f32.mxu1 %v7168_v21 }
 0x576   : > { %9657 = vmatmul.mubr.f32.gmra.mrb[24].mxu1 %v7169_v57 }
 0x577   : > { %9659 = vmatprep.mubr.f32.mxu1 %v7170_v35 }
 0x57a   : > { %9660 = vmatmul.mubr.f32.gmra.mrb[26].mxu1 %v7171_v49 }
 0x57b   : > { %9662 = vmatprep.mubr.f32.mxu1 %v7172_v3 }
 0x57e   : > { %9663 = vmatmul.mubr.f32.gmra.mrb[28].mxu1 %v7173_v15 }
 0x57f   : > { %9665 = vmatprep.mubr.f32.mxu1 %v7174_v6 }
 0x582   : > { %9666 = vmatmul.mubr.f32.gmra.mrb[30].mxu1 %v7175_v25 }
 0x619   : > { %v9622_v46 = vpop.f32.mrb[0].mxu1 }
 0x61a   : > { %v10308_v24 = vadd.f32 %v9622_v46, %v7143_v56  ;;  %v6311_v34 = vpop.f32.mrb[1].mxu1 }
 0x61b   : > { %v10310_v47 = vadd.f32 %v7143_v56, %v6311_v34 }
 0x61c   : > { %v10309_v14 = vadd.f32 %v10308_v24, %v7176_v43 }
 0x61d   : > { %v10311_v19 = vadd.f32 %v10310_v47, %v7176_v43  ;;  %v9625_v51 = vpop.f32.mrb[2].mxu1 }
 0x61e   : > { %v10313_v39 = vadd.f32 %v13281_v58, %v9625_v51  ;;  %v6321_v20 = vpop.f32.mrb[3].mxu1 }
 0x61f   : > { %v10278_v11 = vpack.c.bf16 %v10309_v14, %v10311_v19  ;;  %v10315_v53 = vadd.f32 %v13281_v58, %v6321_v20 }
 0x621   : > { %v10282_v8 = vpack.c.bf16 %v10313_v39, %v10315_v53  ;;  %v9628_v16 = vpop.f32.mrb[4].mxu1 }
 0x622   : > { %v10317_v0 = vadd.f32 %v13281_v58, %v9628_v16  ;;  %v6331_v1 = vpop.f32.mrb[5].mxu1 }
 0x623   : > { %v10319_v30 = vadd.f32 %v13281_v58, %v6331_v1 }
 0x625   : > { %v10286_v52 = vpack.c.bf16 %v10317_v0, %v10319_v30  ;;  %v9631_v42 = vpop.f32.mrb[6].mxu1 }
 0x626   : > { %v10321_v12 = vadd.f32 %v13281_v58, %v9631_v42  ;;  %v6341_v61 = vpop.f32.mrb[7].mxu1 }
 0x627   : > { %v10323_v54 = vadd.f32 %v13281_v58, %v6341_v61  ;;  %v6502_v61 = vld [vmem:[%s13382_s7] sm:$0xff] }
 0x629   : > { %v10290_v38 = vpack.c.bf16 %v10321_v12, %v10323_v54  ;;  %v9634_v26 = vpop.f32.mrb[8].mxu1  ;;  %v6505_v54 = vld [vmem:[%s13382_s7 + $0x18] sm:$0xff] }
 0x62a   : > { %v10325_v17 = vadd.f32 %v13281_v58, %v9634_v26  ;;  %v6351_v28 = vpop.f32.mrb[9].mxu1  ;;  %v6506_v26 = vld [vmem:[%s13382_s7 + $0x20] sm:$0xff] }
 0x62b   : > { %v10327_v63 = vadd.f32 %v13281_v58, %v6351_v28  ;;  %v6508_v28 = vld [vmem:[%s13382_s7 + $0x30] sm:$0xff] }
 0x62d   : > { %v10294_v41 = vpack.c.bf16 %v10325_v17, %v10327_v63  ;;  %v9637_v2 = vpop.f32.mrb[10].mxu1  ;;  %v6509_v17 = vld [vmem:[%s13382_s7 + $0x38] sm:$0xff]  ;;  %v6511_v63 = vld [vmem:[%s13382_s7 + $0x48] sm:$0xff] }
 0x62e   : > { %v10329_v55 = vadd.f32 %v13281_v58, %v9637_v2  ;;  %v6361_v33 = vpop.f32.mrb[11].mxu1  ;;  %v6513_v2 = vld [vmem:[%s13382_s7 + $0x58] sm:$0xff] }
 0x62f   : > { %v10331_v4 = vadd.f32 %v13281_v58, %v6361_v33  ;;  %v6515_v33 = vld [vmem:[%s13382_s7 + $0x68] sm:$0xff] }
 0x631   : > { %v10298_v13 = vpack.c.bf16 %v10329_v55, %v10331_v4  ;;  %v9640_v48 = vpop.f32.mrb[12].mxu1  ;;  %v6512_v55 = vld [vmem:[%s13382_s7 + $0x50] sm:$0xff]  ;;  %v6514_v4 = vld [vmem:[%s13382_s7 + $0x60] sm:$0xff] }
 0x632   : > { %v10333_v31 = vadd.f32 %v13281_v58, %v9640_v48  ;;  %v6371_v60 = vpop.f32.mrb[13].mxu1  ;;  %v6516_v48 = vld [vmem:[%s13382_s7 + $0x70] sm:$0xff] }
 0x633   : > { %v10335_v5 = vadd.f32 %v13281_v58, %v6371_v60 }
 0x635   : > { %v10302_v22 = vpack.c.bf16 %v10333_v31, %v10335_v5  ;;  %v9643_v59 = vpop.f32.mrb[14].mxu1 }
 0x636   : > { %v10337_v10 = vadd.f32 %v13281_v58, %v9643_v59  ;;  %v6381_v9 = vpop.f32.mrb[15].mxu1 }
 0x637   : > { %v10339_v36 = vadd.f32 %v13281_v58, %v6381_v9 }
 0x639   : > { %v10306_v23 = vpack.c.bf16 %v10337_v10, %v10339_v36  ;;  %v9646_v45 = vpop.f32.mrb[16].mxu1 }
 0x63a   : > { %v10341_v32 = vadd.f32 %v13281_v58, %v9646_v45  ;;  %v6391_v37 = vpop.f32.mrb[17].mxu1 }
 0x63b   : > { %v10343_v40 = vadd.f32 %v13281_v58, %v6391_v37 }
 0x63d   : > { %v10276_v27 = vpack.c.bf16 %v10341_v32, %v10343_v40  ;;  %v9649_v44 = vpop.f32.mrb[18].mxu1 }
 0x63e   : > { %v10345_v18 = vadd.f32 %v13281_v58, %v9649_v44  ;;  %v6401_v50 = vpop.f32.mrb[19].mxu1 }
 0x63f   : > { %v10347_v29 = vadd.f32 %v13281_v58, %v6401_v50  ;;  %10277 = vmatprep.subr.bf16.mxu0 %v10276_v27 }
 0x640   : > { %10279 = vmatpush3.bf16.msra.mxu0 %v10278_v11 }
 0x641   : > { %v10280_v62 = vpack.c.bf16 %v10345_v18, %v10347_v29  ;;  %v9652_v21 = vpop.f32.mrb[20].mxu1 }
 0x642   : > { %v10349_v57 = vadd.f32 %v13281_v58, %v9652_v21  ;;  %v6411_v35 = vpop.f32.mrb[21].mxu1 }
 0x643   : > { %v10351_v49 = vadd.f32 %v13281_v58, %v6411_v35  ;;  %10281 = vmatprep.subr.bf16.mxu0 %v10280_v62 }
 0x644   : > { %10283 = vmatpush3.bf16.msra.mxu0 %v10282_v8 }
 0x645   : > { %v10284_v3 = vpack.c.bf16 %v10349_v57, %v10351_v49  ;;  %v9655_v15 = vpop.f32.mrb[22].mxu1 }
 0x646   : > { %v10353_v6 = vadd.f32 %v13281_v58, %v9655_v15  ;;  %v6421_v25 = vpop.f32.mrb[23].mxu1 }
 0x647   : > { %v10355_v7 = vadd.f32 %v13281_v58, %v6421_v25  ;;  %10285 = vmatprep.subr.bf16.mxu0 %v10284_v3 }
 0x648   : > { %10287 = vmatpush3.bf16.msra.mxu0 %v10286_v52 }
 0x649   : > { %v10288_v56 = vpack.c.bf16 %v10353_v6, %v10355_v7  ;;  %v9658_v43 = vpop.f32.mrb[24].mxu1 }
 0x64a   : > { %v10357_v46 = vadd.f32 %v13281_v58, %v9658_v43  ;;  %v6431_v24 = vpop.f32.mrb[25].mxu1 }
 0x64b   : > { %v10359_v34 = vadd.f32 %v13281_v58, %v6431_v24  ;;  %10289 = vmatprep.subr.bf16.mxu0 %v10288_v56 }
 0x64c   : > { %10291 = vmatpush3.bf16.msra.mxu0 %v10290_v38  ;;  %v6504_v38 = vld [vmem:[%s13382_s7 + $0x10] sm:$0xff] }
 0x64d   : > { %v10292_v47 = vpack.c.bf16 %v10357_v46, %v10359_v34  ;;  %v9661_v14 = vpop.f32.mrb[26].mxu1 }
 0x64e   : > { %v10361_v19 = vadd.f32 %v13281_v58, %v9661_v14  ;;  %v6441_v51 = vpop.f32.mrb[27].mxu1 }
 0x64f   : > { %v10363_v39 = vadd.f32 %v13281_v58, %v6441_v51  ;;  %10293 = vmatprep.subr.bf16.mxu0 %v10292_v47 }
 0x650   : > { %10295 = vmatpush3.bf16.msra.mxu0 %v10294_v41  ;;  %v6510_v41 = vld [vmem:[%s13382_s7 + $0x40] sm:$0xff] }
 0x651   : > { %v10296_v20 = vpack.c.bf16 %v10361_v19, %v10363_v39  ;;  %v9664_v11 = vpop.f32.mrb[28].mxu1 }
 0x652   : > { %v10365_v53 = vadd.f32 %v13281_v58, %v9664_v11  ;;  %v6451_v8 = vpop.f32.mrb[29].mxu1 }
 0x653   : > { %v10367_v16 = vadd.f32 %v13281_v58, %v6451_v8  ;;  %10297 = vmatprep.subr.bf16.mxu0 %v10296_v20 }
 0x654   : > { %10299 = vmatpush3.bf16.msra.mxu0 %v10298_v13  ;;  %v6517_v13 = vld [vmem:[%s13382_s7 + $0x78] sm:$0xff] }
 0x655   : > { %v10300_v0 = vpack.c.bf16 %v10365_v53, %v10367_v16  ;;  %v9667_v1 = vpop.f32.mrb[30].mxu1 }
 0x656   : > { %v10369_v30 = vadd.f32 %v13281_v58, %v9667_v1  ;;  %v6461_v52 = vpop.f32.mrb[31].mxu1 }
 0x657   : > { %v10371_v42 = vadd.f32 %v13281_v58, %v6461_v52  ;;  %10301 = vmatprep.subr.bf16.mxu0 %v10300_v0  ;;  %v6507_v58 = vld [vmem:[%s13382_s7 + $0x28] sm:$0xff] }
 0x658   : > { %10303 = vmatpush3.bf16.msra.mxu0 %v10302_v22 }
 0x659   : > { %v10304_v12 = vpack.c.bf16 %v10369_v30, %v10371_v42 }
 0x65b   : > { %10305 = vmatprep.subr.bf16.mxu0 %v10304_v12 }
 0x65c   : > { %10307 = vmatpush3.bf16.msra.mxu0 %v10306_v23 }
 0x65f   : > { %6583 = vmatmul.mubr.f32.vlgmr.msra.gmra.mrb[32].mxu0 %v6502_v61 }
 0x660   : > { %6587 = vmatprep.mubr.f32.mxu0 %v6505_v54 }
 0x663   : > { %6588 = vmatmul.mubr.f32.gmra.mrb[34].mxu0 %v6504_v38 }
 0x664   : > { %6592 = vmatprep.mubr.f32.mxu0 %v6507_v58 }
 0x667   : > { %6593 = vmatmul.mubr.f32.gmra.mrb[36].mxu0 %v6506_v26 }
 0x668   : > { %6597 = vmatprep.mubr.f32.mxu0 %v6509_v17 }
 0x66b   : > { %6598 = vmatmul.mubr.f32.gmra.mrb[38].mxu0 %v6508_v28 }
 0x66c   : > { %6602 = vmatprep.mubr.f32.mxu0 %v6511_v63 }
 0x66f   : > { %6603 = vmatmul.mubr.f32.gmra.mrb[40].mxu0 %v6510_v41 }
 0x670   : > { %6607 = vmatprep.mubr.f32.mxu0 %v6513_v2 }
 0x673   : > { %6608 = vmatmul.mubr.f32.gmra.mrb[42].mxu0 %v6512_v55 }
 0x674   : > { %6612 = vmatprep.mubr.f32.mxu0 %v6515_v33 }
 0x677   : > { %6613 = vmatmul.mubr.f32.gmra.mrb[44].mxu0 %v6514_v4 }
 0x678   : > { %6617 = vmatprep.mubr.f32.mxu0 %v6517_v13 }
 0x67b   : > { %6618 = vmatmul.mubr.f32.gmra.mrb[46].mxu0 %v6516_v48 }
 0x732   : > { %v8124_v31 = vpop.f32.mrb[32].mxu0 }
 0x733   : > { %v8125_v60 = vpop.f32.mrb[33].mxu0 }
 0x734   : > { %v8126_v5 = vadd.f32 %v8125_v60, %v8124_v31 }
 0x736   : > { %6623 = vst [vmem:[%s13362_s11] sm:$0xff] %v8126_v5  ;;  %v8127_v22 = vpop.f32.mrb[34].mxu0 }
 0x737   : > { %v8128_v59 = vpop.f32.mrb[35].mxu0 }
 0x738   : > { %v8129_v10 = vadd.f32 %v8128_v59, %v8127_v22 }
 0x73a   : > { %6624 = vst [vmem:[%s13362_s11 + $0x8] sm:$0xff] %v8129_v10  ;;  %v8130_v9 = vpop.f32.mrb[36].mxu0 }
 0x73b   : > { %v8131_v36 = vpop.f32.mrb[37].mxu0 }
 0x73c   : > { %v8132_v23 = vadd.f32 %v8131_v36, %v8130_v9 }
 0x73e   : > { %6625 = vst [vmem:[%s13362_s11 + $0x10] sm:$0xff] %v8132_v23  ;;  %v8133_v45 = vpop.f32.mrb[38].mxu0 }
 0x73f   : > { %v8134_v32 = vpop.f32.mrb[39].mxu0 }
 0x740   : > { %v8135_v37 = vadd.f32 %v8134_v32, %v8133_v45 }
 0x742   : > { %6626 = vst [vmem:[%s13362_s11 + $0x18] sm:$0xff] %v8135_v37  ;;  %v8136_v40 = vpop.f32.mrb[40].mxu0 }
 0x743   : > { %v8137_v27 = vpop.f32.mrb[41].mxu0 }
 0x744   : > { %v8138_v44 = vadd.f32 %v8137_v27, %v8136_v40 }
 0x746   : > { %6627 = vst [vmem:[%s13362_s11 + $0x20] sm:$0xff] %v8138_v44  ;;  %v8139_v18 = vpop.f32.mrb[42].mxu0 }
 0x747   : > { %v8140_v50 = vpop.f32.mrb[43].mxu0 }
 0x748   : > { %v8141_v29 = vadd.f32 %v8140_v50, %v8139_v18 }
 0x74a   : > { %6628 = vst [vmem:[%s13362_s11 + $0x28] sm:$0xff] %v8141_v29  ;;  %v8142_v62 = vpop.f32.mrb[44].mxu0 }
 0x74b   : > { %v8143_v21 = vpop.f32.mrb[45].mxu0 }
 0x74c   : > { %v8144_v57 = vadd.f32 %v8143_v21, %v8142_v62 }
 0x74e   : > { %6629 = vst [vmem:[%s13362_s11 + $0x30] sm:$0xff] %v8144_v57  ;;  %v8145_v35 = vpop.f32.mrb[46].mxu0 }
 0x74f   : > { %v8146_v49 = vpop.f32.mrb[47].mxu0 }
 0x750   : > { %v8147_v3 = vadd.f32 %v8146_v49, %v8145_v35 }
 0x752   : > { %6630 = vst [vmem:[%s13362_s11 + $0x38] sm:$0xff] %v8147_v3 }
 0x753 PF: > { %s18_s27 = sadd.s32 1, %s10933_s27  }
 0x754   : > { %p15_p4 = scmp.ge.s32.totalorder %s18_s27, 4  }
 0x756   :  { %17 = sbr.rel (!%p15_p4) target bundleno = 1 (0x1), region = 102 }

</bundles_post_ra>
